<compile_context>
chip_gen: v7x
topology: tpu7x:2x2x1
jax: 0.10.0
libtpu: 0.0.40
codegen_flags: <defaults>
</compile_context>

<pallas_src>
import functools

import jax
import jax.numpy as jnp
from jax.experimental import pallas as pl
from jax.experimental.pallas import tpu as pltpu


def calc_same_padding(kernel_size):
    # Matches the original module (right pad = pad - (K+1)%2); for odd K (module default 31)
    # this equals the spec snippet's formula and keeps the residual add shape-valid.
    pad = kernel_size // 2
    return (pad, pad - (kernel_size + 1) % 2)


def _round_up(n, m):
    return ((n + m - 1) // m) * m


def _sigmoid(x):
    # sigmoid via the EUP tanh unit (keeps the divide off the VALU): sigmoid(x) = 0.5*(tanh(x/2)+1)
    return 0.5 * (jnp.tanh(0.5 * x) + 1.0)


def _conformer_conv_kernel(xp_ref, xc_ref, xn_ref,
                           ln_g_ref, ln_b_ref,
                           w_val_ref, b_val_ref, w_gate_ref, b_gate_ref,
                           w_dw_ref, b_dw_ref, w_do_ref, b_do_ref,
                           bn_scale_ref, bn_bias_ref, w_pw2_ref, b_pw2_ref,
                           o_ref, gext_ref,
                           *, kernel_size, pad_l, h_l, h_r, tile_t, seq_len, eps):
    t = pl.program_id(1)

    ln_g = ln_g_ref[...].astype(jnp.float32)
    ln_b = ln_b_ref[...].astype(jnp.float32)
    b_val = b_val_ref[...].astype(jnp.float32)
    b_gate = b_gate_ref[...].astype(jnp.float32)

    # ---- LayerNorm + pointwise Conv1d(dim, 2*inner, 1) + GLU, written into the halo'd
    #      depthwise scratch slab at 8-aligned offsets; rows outside [0, seq_len) masked to 0
    #      (this implements the depthwise conv's 'same' zero padding and the T->T_pad tail). ----
    def glu_block(x_rows, row0, n_rows):
        xf = x_rows.astype(jnp.float32)
        mu = jnp.mean(xf, axis=-1, keepdims=True)
        xcen = xf - mu
        var = jnp.mean(xcen * xcen, axis=-1, keepdims=True)
        ln = xcen * jax.lax.rsqrt(var + eps) * ln_g + ln_b
        ln_mx = ln.astype(w_val_ref.dtype)             # feed the MXU in the weight dtype
        val = jnp.dot(ln_mx, w_val_ref[...], preferred_element_type=jnp.float32) + b_val
        gate = jnp.dot(ln_mx, w_gate_ref[...], preferred_element_type=jnp.float32) + b_gate
        g = val * _sigmoid(gate)
        gidx = (t * tile_t - h_l + row0
                + jax.lax.broadcasted_iota(jnp.int32, (n_rows, 1), 0))
        g = jnp.where(jnp.logical_and(gidx >= 0, gidx < seq_len), g, 0.0)
        gext_ref[row0:row0 + n_rows, :] = g

    if h_l > 0:                                        # left halo: tail of previous time tile
        glu_block(xp_ref[0][tile_t - h_l:, :], 0, h_l)
    glu_block(xc_ref[0], h_l, tile_t)                  # current tile
    if h_r > 0:                                        # right halo: head of next time tile
        glu_block(xn_ref[0][:h_r, :], h_l + tile_t, h_r)

    # ---- depthwise Conv1d over time: K shifted FMAs with 4 partial accumulators (ILP). ----
    base = h_l - pad_l
    n_acc = 4 if kernel_size >= 4 else kernel_size
    parts = []
    for a in range(n_acc):
        acc = None
        for k in range(a, kernel_size, n_acc):
            w_k = w_dw_ref[k:k + 1, :].astype(jnp.float32)          # (1, inner)
            term = gext_ref[base + k:base + k + tile_t, :] * w_k
            acc = term if acc is None else acc + term
        parts.append(acc)
    while len(parts) > 1:                              # pairwise tree sum
        nxt = []
        for i in range(0, len(parts), 2):
            nxt.append(parts[i] + parts[i + 1] if i + 1 < len(parts) else parts[i])
        parts = nxt
    dw = parts[0] + b_dw_ref[...].astype(jnp.float32)

    # ---- pointwise Conv1d(inner, inner, 1) ----
    y = jnp.dot(dw.astype(w_do_ref.dtype), w_do_ref[...],
                preferred_element_type=jnp.float32)
    y = y + b_do_ref[...].astype(jnp.float32)

    # ---- BatchNorm1d (eval mode, folded) + Swish ----
    y = y * bn_scale_ref[...] + bn_bias_ref[...]
    y = y * _sigmoid(y)

    # ---- pointwise Conv1d(inner, dim, 1) + residual (Dropout = identity) ----
    out = jnp.dot(y.astype(w_pw2_ref.dtype), w_pw2_ref[...],
                  preferred_element_type=jnp.float32)
    out = out + b_pw2_ref[...].astype(jnp.float32) + xc_ref[0].astype(jnp.float32)
    o_ref[0] = out.astype(o_ref.dtype)


def conformer_conv_module(x, ln_gamma, ln_beta, w_pw1, b_pw1, w_dw, b_dw,
                          w_do, b_do, bn_gamma, bn_beta, bn_mean, bn_var,
                          w_pw2, b_pw2, *, kernel_size=31, time_tile=512,
                          ln_eps=1e-5, bn_eps=1e-5, mxu_dtype=None):
    """Fused ConformerConvModule forward (non-causal, eval-mode BN / dropout).

    Shapes (JAX convention; torch Conv1d weight (out, in, 1) maps to (in, out),
    depthwise weight (inner, 1, K) maps to (K, inner)):
      x: (B, T, dim)
      w_pw1: (dim, 2*inner)   b_pw1: (2*inner,)
      w_dw:  (K, inner)       b_dw:  (inner,)
      w_do:  (inner, inner)   b_do:  (inner,)
      w_pw2: (inner, dim)     b_pw2: (dim,)
    mxu_dtype: optional dtype (e.g. jnp.bfloat16) to pre-cast the pointwise-conv weights/MXU
      feeds to; accumulation stays f32.
    """
    B, T, dim = x.shape
    two_inner = w_pw1.shape[1]
    inner = two_inner // 2
    K = kernel_size
    pad_l, pad_r = calc_same_padding(K)
    h_l = _round_up(pad_l, 8) if pad_l > 0 else 0      # 8-aligned halos
    h_r = _round_up(pad_r, 8) if pad_r > 0 else 0

    # --- time tiling: TT multiple of 8, >= each halo; T padded up to a multiple of TT. ---
    TT = int(min(max(int(time_tile), 8), _round_up(T, 8)))
    TT = _round_up(TT, 8)
    TT = max(TT, h_l, h_r, 8)
    NT = -(-T // TT)
    T_pad = NT * TT
    xpad = x if T_pad == T else jnp.pad(x, ((0, 0), (0, T_pad - T), (0, 0)))
    E = h_l + TT + h_r                                  # depthwise scratch rows (multiple of 8)

    # Split pointwise-conv-1 into GLU value/gate halves (no lane slicing in the kernel);
    # GLU(dim=1) takes the first half as value, second as gate.
    w_val, w_gate = w_pw1[:, :inner], w_pw1[:, inner:]
    b_val, b_gate = b_pw1[:inner], b_pw1[inner:]
    if mxu_dtype is not None:
        w_val = w_val.astype(mxu_dtype)
        w_gate = w_gate.astype(mxu_dtype)
        w_do = w_do.astype(mxu_dtype)
        w_pw2 = w_pw2.astype(mxu_dtype)

    # Fold eval-mode BatchNorm into a per-channel scale/bias.
    bn_scale = (bn_gamma / jnp.sqrt(bn_var + bn_eps)).astype(jnp.float32)
    bn_bias = (bn_beta - bn_mean * bn_scale).astype(jnp.float32)

    def row(v):
        return v.reshape(1, -1)

    params = [row(ln_gamma), row(ln_beta),
              w_val, row(b_val), w_gate, row(b_gate),
              w_dw, row(b_dw), w_do, row(b_do),
              row(bn_scale), row(bn_bias), w_pw2, row(b_pw2)]

    # --- VMEM budget: derive the limit from the actual chip (<= half of physical VMEM). ---
    itemsize = jnp.dtype(x.dtype).itemsize
    param_bytes = sum(int(p.size) * jnp.dtype(p.dtype).itemsize for p in params)
    block_bytes = TT * dim * itemsize
    est = (3 * 2 * block_bytes            # three (halo'd) x views, double-buffered
           + 2 * block_bytes              # output block, double-buffered
           + param_bytes                  # weights/biases (single-buffered)
           + E * inner * 4                # depthwise scratch slab
           + 8 * E * max(inner, dim) * 4)  # headroom for live f32 temporaries
    try:
        vmem_phys = int(getattr(pltpu.get_tpu_info(), "vmem_capacity_bytes", 128 * 2 ** 20))
    except Exception:
        vmem_phys = 128 * 2 ** 20
    vmem_limit = int(min(max(2 * est, 16 * 2 ** 20), vmem_phys // 2))

    flops = int(2 * B * T_pad * (dim * two_inner + inner * K + inner * inner + inner * dim))
    transcendentals = int(2 * B * T_pad * inner)
    bytes_accessed = int(4 * B * T_pad * dim * itemsize + param_bytes)

    kern = functools.partial(_conformer_conv_kernel,
                             kernel_size=K, pad_l=pad_l, h_l=h_l, h_r=h_r,
                             tile_t=TT, seq_len=T, eps=ln_eps)

    x_specs = [
        pl.BlockSpec((1, TT, dim), lambda b, t: (b, jnp.maximum(t - 1, 0), 0)),
        pl.BlockSpec((1, TT, dim), lambda b, t: (b, t, 0)),
        pl.BlockSpec((1, TT, dim), lambda b, t: (b, jnp.minimum(t + 1, NT - 1), 0)),
    ]
    out_spec = pl.BlockSpec((1, TT, dim), lambda b, t: (b, t, 0))

    def build(single_buffer_weights):
        if single_buffer_weights:
            def const_spec(p):
                return pl.BlockSpec(p.shape, lambda b, t: (0, 0),
                                    pipeline_mode=pl.Buffered(1))
        else:
            def const_spec(p):
                return pl.BlockSpec(p.shape, lambda b, t: (0, 0))
        return pl.pallas_call(
            kern,
            out_shape=jax.ShapeDtypeStruct((B, T_pad, dim), x.dtype),
            grid_spec=pltpu.PrefetchScalarGridSpec(
                num_scalar_prefetch=0,
                grid=(B, NT),
                in_specs=x_specs + [const_spec(p) for p in params],
                out_specs=out_spec,
                scratch_shapes=[pltpu.VMEM((E, inner), jnp.float32)],
            ),
            compiler_params=pltpu.CompilerParams(
                dimension_semantics=("parallel", "parallel"),
                vmem_limit_bytes=vmem_limit),
            cost_estimate=pl.CostEstimate(flops=flops,
                                          transcendentals=transcendentals,
                                          bytes_accessed=bytes_accessed),
        )

    try:
        out = build(True)(xpad, xpad, xpad, *params)
    except Exception:
        # Fallback if this JAX version rejects single-buffered (pl.Buffered(1)) operands.
        out = build(False)(xpad, xpad, xpad, *params)

    return out if T_pad == T else out[:, :T]


def _reference(x, ln_gamma, ln_beta, w_pw1, b_pw1, w_dw, b_dw, w_do, b_do,
               bn_gamma, bn_beta, bn_mean, bn_var, w_pw2, b_pw2,
               *, kernel_size, ln_eps=1e-5, bn_eps=1e-5):
    B, T, dim = x.shape
    inner = w_pw1.shape[1] // 2
    pad_l, pad_r = calc_same_padding(kernel_size)

    mean = jnp.mean(x, axis=-1, keepdims=True)
    var = jnp.mean((x - mean) ** 2, axis=-1, keepdims=True)
    ln = (x - mean) / jnp.sqrt(var + ln_eps) * ln_gamma + ln_beta

    p = ln @ w_pw1 + b_pw1
    g = p[..., :inner] * jax.nn.sigmoid(p[..., inner:])

    gpad = jnp.pad(g, ((0, 0), (pad_l, pad_r), (0, 0)))
    dw = sum(gpad[:, k:k + T, :] * w_dw[k] for k in range(kernel_size)) + b_dw

    y = dw @ w_do + b_do
    y = (y - bn_mean) / jnp.sqrt(bn_var + bn_eps) * bn_gamma + bn_beta
    y = y * jax.nn.sigmoid(y)
    out = y @ w_pw2 + b_pw2
    return out + x


if __name__ == "__main__":
    key = jax.random.PRNGKey(0)
    B, T, dim = 2, 40, 32
    expansion_factor = 2
    kernel_size = 31
    inner = dim * expansion_factor

    ks = jax.random.split(key, 16)
    x = jax.random.normal(ks[0], (B, T, dim), jnp.float32)

    ln_gamma = 1.0 + 0.1 * jax.random.normal(ks[1], (dim,))
    ln_beta = 0.1 * jax.random.normal(ks[2], (dim,))
    lim1 = 1.0 / (dim ** 0.5)
    w_pw1 = jax.random.uniform(ks[3], (dim, 2 * inner), jnp.float32, -lim1, lim1)
    b_pw1 = jax.random.uniform(ks[4], (2 * inner,), jnp.float32, -lim1, lim1)
    limd = 1.0 / (kernel_size ** 0.5)
    w_dw = jax.random.uniform(ks[5], (kernel_size, inner), jnp.float32, -limd, limd)
    b_dw = jax.random.uniform(ks[6], (inner,), jnp.float32, -limd, limd)
    lim2 = 1.0 / (inner ** 0.5)
    w_do = jax.random.uniform(ks[7], (inner, inner), jnp.float32, -lim2, lim2)
    b_do = jax.random.uniform(ks[8], (inner,), jnp.float32, -lim2, lim2)
    bn_gamma = 1.0 + 0.1 * jax.random.normal(ks[9], (inner,))
    bn_beta = 0.1 * jax.random.normal(ks[10], (inner,))
    bn_mean = 0.1 * jax.random.normal(ks[11], (inner,))
    bn_var = jax.random.uniform(ks[12], (inner,), jnp.float32, 0.5, 1.5)
    w_pw2 = jax.random.uniform(ks[13], (inner, dim), jnp.float32, -lim2, lim2)
    b_pw2 = jax.random.uniform(ks[14], (dim,), jnp.float32, -lim2, lim2)

    args = (x, ln_gamma, ln_beta, w_pw1, b_pw1, w_dw, b_dw, w_do, b_do,
            bn_gamma, bn_beta, bn_mean, bn_var, w_pw2, b_pw2)

    ref = _reference(*args, kernel_size=kernel_size)

    # 1) single time-tile path, f32 weights
    out1 = jax.block_until_ready(conformer_conv_module(*args, kernel_size=kernel_size))
    assert out1.shape == (B, T, dim)
    err1 = float(jnp.max(jnp.abs(out1 - ref)))
    assert jnp.allclose(out1, ref, atol=5e-4, rtol=5e-4), err1

    # 2) multi-tile path (3 time tiles of 16, halos + masked padded tail), f32 weights
    out2 = jax.block_until_ready(conformer_conv_module(*args, kernel_size=kernel_size,
                                                       time_tile=16))
    err2 = float(jnp.max(jnp.abs(out2 - ref)))
    assert jnp.allclose(out2, ref, atol=5e-4, rtol=5e-4), err2

    # 3) bf16-fed MXU variant (production setting for f32 checkpoints), looser tolerance
    out3 = jax.block_until_ready(conformer_conv_module(*args, kernel_size=kernel_size,
                                                       mxu_dtype=jnp.bfloat16))
    err3 = float(jnp.max(jnp.abs(out3 - ref)))
    assert jnp.allclose(out3, ref, atol=5e-2, rtol=5e-2), err3

    print("KERNEL_OK")
</pallas_src>

<mosaic_0001>
module attributes {stable_mosaic.version = 11 : i64} {
  func.func @_conformer_conv_kernel(%arg0: i32, %arg1: i32, %arg2: memref<1x40x32xf32, #tpu.memory_space<vmem>>, %arg3: memref<1x40x32xf32, #tpu.memory_space<vmem>>, %arg4: memref<1x40x32xf32, #tpu.memory_space<vmem>>, %arg5: memref<1x32xf32, #tpu.memory_space<vmem>>, %arg6: memref<1x32xf32, #tpu.memory_space<vmem>>, %arg7: memref<32x64xf32, #tpu.memory_space<vmem>>, %arg8: memref<1x64xf32, #tpu.memory_space<vmem>>, %arg9: memref<32x64xf32, #tpu.memory_space<vmem>>, %arg10: memref<1x64xf32, #tpu.memory_space<vmem>>, %arg11: memref<31x64xf32, #tpu.memory_space<vmem>>, %arg12: memref<1x64xf32, #tpu.memory_space<vmem>>, %arg13: memref<64x64xf32, #tpu.memory_space<vmem>>, %arg14: memref<1x64xf32, #tpu.memory_space<vmem>>, %arg15: memref<1x64xf32, #tpu.memory_space<vmem>>, %arg16: memref<1x64xf32, #tpu.memory_space<vmem>>, %arg17: memref<64x32xf32, #tpu.memory_space<vmem>>, %arg18: memref<1x32xf32, #tpu.memory_space<vmem>>, %arg19: memref<1x40x32xf32, #tpu.memory_space<vmem>>, %arg20: memref<72x64xf32, #tpu.memory_space<vmem>>) attributes {dimension_semantics = [#tpu.dimension_semantics<parallel>, #tpu.dimension_semantics<parallel>], iteration_bounds = array<i64: 2, 1>, scalar_prefetch = 0 : i64, scratch_operands = 1 : i64, tpu.core_type = #tpu.core_type<tc>, window_params = [{transform_indices = @transform_0, window_bounds = array<i64: 1, 40, 32>}, {transform_indices = @transform_1, window_bounds = array<i64: 1, 40, 32>}, {transform_indices = @transform_2, window_bounds = array<i64: 1, 40, 32>}, {pipeline_mode = #tpu.pipeline_mode<synchronous>, transform_indices = @transform_3, window_bounds = array<i64: 1, 32>}, {pipeline_mode = #tpu.pipeline_mode<synchronous>, transform_indices = @transform_4, window_bounds = array<i64: 1, 32>}, {pipeline_mode = #tpu.pipeline_mode<synchronous>, transform_indices = @transform_5, window_bounds = array<i64: 32, 64>}, {pipeline_mode = #tpu.pipeline_mode<synchronous>, transform_indices = @transform_6, window_bounds = array<i64: 1, 64>}, {pipeline_mode = #tpu.pipeline_mode<synchronous>, transform_indices = @transform_7, window_bounds = array<i64: 32, 64>}, {pipeline_mode = #tpu.pipeline_mode<synchronous>, transform_indices = @transform_8, window_bounds = array<i64: 1, 64>}, {pipeline_mode = #tpu.pipeline_mode<synchronous>, transform_indices = @transform_9, window_bounds = array<i64: 31, 64>}, {pipeline_mode = #tpu.pipeline_mode<synchronous>, transform_indices = @transform_10, window_bounds = array<i64: 1, 64>}, {pipeline_mode = #tpu.pipeline_mode<synchronous>, transform_indices = @transform_11, window_bounds = array<i64: 64, 64>}, {pipeline_mode = #tpu.pipeline_mode<synchronous>, transform_indices = @transform_12, window_bounds = array<i64: 1, 64>}, {pipeline_mode = #tpu.pipeline_mode<synchronous>, transform_indices = @transform_13, window_bounds = array<i64: 1, 64>}, {pipeline_mode = #tpu.pipeline_mode<synchronous>, transform_indices = @transform_14, window_bounds = array<i64: 1, 64>}, {pipeline_mode = #tpu.pipeline_mode<synchronous>, transform_indices = @transform_15, window_bounds = array<i64: 64, 32>}, {pipeline_mode = #tpu.pipeline_mode<synchronous>, transform_indices = @transform_16, window_bounds = array<i64: 1, 32>}, {transform_indices = @transform_17, window_bounds = array<i64: 1, 40, 32>}]} {
    %c0 = arith.constant 0 : index
    %c0_0 = arith.constant 0 : index
    %0 = vector.load %arg5[%c0, %c0_0] : memref<1x32xf32, #tpu.memory_space<vmem>>, vector<1x32xf32>
    %c0_1 = arith.constant 0 : index
    %c0_2 = arith.constant 0 : index
    %1 = vector.load %arg6[%c0_1, %c0_2] : memref<1x32xf32, #tpu.memory_space<vmem>>, vector<1x32xf32>
    %c0_3 = arith.constant 0 : index
    %c0_4 = arith.constant 0 : index
    %2 = vector.load %arg8[%c0_3, %c0_4] : memref<1x64xf32, #tpu.memory_space<vmem>>, vector<1x64xf32>
    %c0_5 = arith.constant 0 : index
    %c0_6 = arith.constant 0 : index
    %3 = vector.load %arg10[%c0_5, %c0_6] : memref<1x64xf32, #tpu.memory_space<vmem>>, vector<1x64xf32>
    %c0_7 = arith.constant 0 : index
    %c0_8 = arith.constant 0 : index
    %c0_9 = arith.constant 0 : index
    %4 = vector.load %arg2[%c0_7, %c0_8, %c0_9] : memref<1x40x32xf32, #tpu.memory_space<vmem>>, vector<1x40x32xf32>
    %5 = vector.shape_cast %4 : vector<1x40x32xf32> to vector<40x32xf32>
    %6 = vector.extract_strided_slice %5 {offsets = [24, 0], sizes = [16, 32], strides = [1, 1]} : vector<40x32xf32> to vector<16x32xf32>
    %cst = arith.constant dense<0.000000e+00> : vector<16xf32>
    %7 = vector.multi_reduction <add>, %6, %cst [1] : vector<16x32xf32> to vector<16xf32>
    %8 = vector.shape_cast %7 : vector<16xf32> to vector<16x1xf32>
    %cst_10 = arith.constant 3.200000e+01 : f32
    %9 = vector.broadcast %cst_10 : f32 to vector<16x1xf32>
    %10 = arith.divf %8, %9 : vector<16x1xf32>
    %11 = vector.broadcast %10 : vector<16x1xf32> to vector<16x32xf32>
    %12 = arith.subf %6, %11 : vector<16x32xf32>
    %13 = arith.mulf %12, %12 : vector<16x32xf32>
    %cst_11 = arith.constant dense<0.000000e+00> : vector<16xf32>
    %14 = vector.multi_reduction <add>, %13, %cst_11 [1] : vector<16x32xf32> to vector<16xf32>
    %15 = vector.shape_cast %14 : vector<16xf32> to vector<16x1xf32>
    %cst_12 = arith.constant 3.200000e+01 : f32
    %16 = vector.broadcast %cst_12 : f32 to vector<16x1xf32>
    %17 = arith.divf %15, %16 : vector<16x1xf32>
    %cst_13 = arith.constant 9.99999974E-6 : f32
    %18 = vector.broadcast %cst_13 : f32 to vector<16x1xf32>
    %19 = arith.addf %17, %18 : vector<16x1xf32>
    %20 = math.rsqrt %19 : vector<16x1xf32>
    %21 = vector.broadcast %20 : vector<16x1xf32> to vector<16x32xf32>
    %22 = arith.mulf %12, %21 : vector<16x32xf32>
    %23 = vector.broadcast %0 : vector<1x32xf32> to vector<16x32xf32>
    %24 = arith.mulf %22, %23 : vector<16x32xf32>
    %25 = vector.broadcast %1 : vector<1x32xf32> to vector<16x32xf32>
    %26 = arith.addf %24, %25 : vector<16x32xf32>
    %c0_14 = arith.constant 0 : index
    %c0_15 = arith.constant 0 : index
    %27 = vector.load %arg7[%c0_14, %c0_15] : memref<32x64xf32, #tpu.memory_space<vmem>>, vector<32x64xf32>
    %cst_16 = arith.constant dense<0.000000e+00> : vector<16x64xf32>
    %28 = tpu.matmul %26, %27, %cst_16 {dimension_numbers = #tpu.dot_dimension_numbers<[1], [0], [0], [1], [0, 0, 1, 1], [], []>} : vector<16x32xf32>, vector<32x64xf32>, vector<16x64xf32> -> vector<16x64xf32>
    %29 = vector.broadcast %2 : vector<1x64xf32> to vector<16x64xf32>
    %30 = arith.addf %28, %29 : vector<16x64xf32>
    %c0_17 = arith.constant 0 : index
    %c0_18 = arith.constant 0 : index
    %31 = vector.load %arg9[%c0_17, %c0_18] : memref<32x64xf32, #tpu.memory_space<vmem>>, vector<32x64xf32>
    %cst_19 = arith.constant dense<0.000000e+00> : vector<16x64xf32>
    %32 = tpu.matmul %26, %31, %cst_19 {dimension_numbers = #tpu.dot_dimension_numbers<[1], [0], [0], [1], [0, 0, 1, 1], [], []>} : vector<16x32xf32>, vector<32x64xf32>, vector<16x64xf32> -> vector<16x64xf32>
    %33 = vector.broadcast %3 : vector<1x64xf32> to vector<16x64xf32>
    %34 = arith.addf %32, %33 : vector<16x64xf32>
    %cst_20 = arith.constant 5.000000e-01 : f32
    %35 = vector.broadcast %cst_20 : f32 to vector<16x64xf32>
    %36 = arith.mulf %35, %34 : vector<16x64xf32>
    %37 = math.tanh %36 : vector<16x64xf32>
    %cst_21 = arith.constant 1.000000e+00 : f32
    %38 = vector.broadcast %cst_21 : f32 to vector<16x64xf32>
    %39 = arith.addf %37, %38 : vector<16x64xf32>
    %cst_22 = arith.constant 5.000000e-01 : f32
    %40 = vector.broadcast %cst_22 : f32 to vector<16x64xf32>
    %41 = arith.mulf %40, %39 : vector<16x64xf32>
    %42 = arith.mulf %30, %41 : vector<16x64xf32>
    %c40_i32 = arith.constant 40 : i32
    %43 = arith.muli %arg1, %c40_i32 : i32
    %c16_i32 = arith.constant 16 : i32
    %44 = arith.subi %43, %c16_i32 : i32
    %c0_i32 = arith.constant 0 : i32
    %45 = arith.addi %44, %c0_i32 : i32
    %46 = tpu.iota {dimensions = array<i32: 0>} : vector<16x1xi32>
    %47 = vector.broadcast %45 : i32 to vector<16x1xi32>
    %48 = arith.addi %47, %46 : vector<16x1xi32>
    %c0_i32_23 = arith.constant 0 : i32
    %49 = vector.broadcast %c0_i32_23 : i32 to vector<16x1xi32>
    %50 = arith.cmpi sge, %48, %49 : vector<16x1xi32>
    %c40_i32_24 = arith.constant 40 : i32
    %51 = vector.broadcast %c40_i32_24 : i32 to vector<16x1xi32>
    %52 = arith.cmpi slt, %48, %51 : vector<16x1xi32>
    %53 = arith.andi %50, %52 : vector<16x1xi1>
    %cst_25 = arith.constant 0.000000e+00 : f32
    %54 = vector.shape_cast %53 : vector<16x1xi1> to vector<16x1xi1>
    %55 = vector.broadcast %54 : vector<16x1xi1> to vector<16x64xi1>
    %56 = vector.broadcast %cst_25 : f32 to vector<16x64xf32>
    %57 = arith.select %55, %42, %56 : vector<16x64xi1>, vector<16x64xf32>
    %c0_26 = arith.constant 0 : index
    %c0_27 = arith.constant 0 : index
    %58 = vector.load %arg20[%c0_26, %c0_27] : memref<72x64xf32, #tpu.memory_space<vmem>>, vector<16x64xf32>
    tpu.vector_store %arg20[%c0_26, %c0_27], %57 {strides = array<i32>} : memref<72x64xf32, #tpu.memory_space<vmem>>, vector<16x64xf32>,
    %c0_28 = arith.constant 0 : index
    %c0_29 = arith.constant 0 : index
    %c0_30 = arith.constant 0 : index
    %59 = vector.load %arg3[%c0_28, %c0_29, %c0_30] : memref<1x40x32xf32, #tpu.memory_space<vmem>>, vector<1x40x32xf32>
    %60 = vector.shape_cast %59 : vector<1x40x32xf32> to vector<40x32xf32>
    %cst_31 = arith.constant dense<0.000000e+00> : vector<40xf32>
    %61 = vector.multi_reduction <add>, %60, %cst_31 [1] : vector<40x32xf32> to vector<40xf32>
    %62 = vector.shape_cast %61 : vector<40xf32> to vector<40x1xf32>
    %cst_32 = arith.constant 3.200000e+01 : f32
    %63 = vector.broadcast %cst_32 : f32 to vector<40x1xf32>
    %64 = arith.divf %62, %63 : vector<40x1xf32>
    %65 = vector.broadcast %64 : vector<40x1xf32> to vector<40x32xf32>
    %66 = arith.subf %60, %65 : vector<40x32xf32>
    %67 = arith.mulf %66, %66 : vector<40x32xf32>
    %cst_33 = arith.constant dense<0.000000e+00> : vector<40xf32>
    %68 = vector.multi_reduction <add>, %67, %cst_33 [1] : vector<40x32xf32> to vector<40xf32>
    %69 = vector.shape_cast %68 : vector<40xf32> to vector<40x1xf32>
    %cst_34 = arith.constant 3.200000e+01 : f32
    %70 = vector.broadcast %cst_34 : f32 to vector<40x1xf32>
    %71 = arith.divf %69, %70 : vector<40x1xf32>
    %cst_35 = arith.constant 9.99999974E-6 : f32
    %72 = vector.broadcast %cst_35 : f32 to vector<40x1xf32>
    %73 = arith.addf %71, %72 : vector<40x1xf32>
    %74 = math.rsqrt %73 : vector<40x1xf32>
    %75 = vector.broadcast %74 : vector<40x1xf32> to vector<40x32xf32>
    %76 = arith.mulf %66, %75 : vector<40x32xf32>
    %77 = vector.broadcast %0 : vector<1x32xf32> to vector<40x32xf32>
    %78 = arith.mulf %76, %77 : vector<40x32xf32>
    %79 = vector.broadcast %1 : vector<1x32xf32> to vector<40x32xf32>
    %80 = arith.addf %78, %79 : vector<40x32xf32>
    %c0_36 = arith.constant 0 : index
    %c0_37 = arith.constant 0 : index
    %81 = vector.load %arg7[%c0_36, %c0_37] : memref<32x64xf32, #tpu.memory_space<vmem>>, vector<32x64xf32>
    %cst_38 = arith.constant dense<0.000000e+00> : vector<40x64xf32>
    %82 = tpu.matmul %80, %81, %cst_38 {dimension_numbers = #tpu.dot_dimension_numbers<[1], [0], [0], [1], [0, 0, 1, 1], [], []>} : vector<40x32xf32>, vector<32x64xf32>, vector<40x64xf32> -> vector<40x64xf32>
    %83 = vector.broadcast %2 : vector<1x64xf32> to vector<40x64xf32>
    %84 = arith.addf %82, %83 : vector<40x64xf32>
    %c0_39 = arith.constant 0 : index
    %c0_40 = arith.constant 0 : index
    %85 = vector.load %arg9[%c0_39, %c0_40] : memref<32x64xf32, #tpu.memory_space<vmem>>, vector<32x64xf32>
    %cst_41 = arith.constant dense<0.000000e+00> : vector<40x64xf32>
    %86 = tpu.matmul %80, %85, %cst_41 {dimension_numbers = #tpu.dot_dimension_numbers<[1], [0], [0], [1], [0, 0, 1, 1], [], []>} : vector<40x32xf32>, vector<32x64xf32>, vector<40x64xf32> -> vector<40x64xf32>
    %87 = vector.broadcast %3 : vector<1x64xf32> to vector<40x64xf32>
    %88 = arith.addf %86, %87 : vector<40x64xf32>
    %cst_42 = arith.constant 5.000000e-01 : f32
    %89 = vector.broadcast %cst_42 : f32 to vector<40x64xf32>
    %90 = arith.mulf %89, %88 : vector<40x64xf32>
    %91 = math.tanh %90 : vector<40x64xf32>
    %cst_43 = arith.constant 1.000000e+00 : f32
    %92 = vector.broadcast %cst_43 : f32 to vector<40x64xf32>
    %93 = arith.addf %91, %92 : vector<40x64xf32>
    %cst_44 = arith.constant 5.000000e-01 : f32
    %94 = vector.broadcast %cst_44 : f32 to vector<40x64xf32>
    %95 = arith.mulf %94, %93 : vector<40x64xf32>
    %96 = arith.mulf %84, %95 : vector<40x64xf32>
    %c40_i32_45 = arith.constant 40 : i32
    %97 = arith.muli %arg1, %c40_i32_45 : i32
    %c16_i32_46 = arith.constant 16 : i32
    %98 = arith.subi %97, %c16_i32_46 : i32
    %c16_i32_47 = arith.constant 16 : i32
    %99 = arith.addi %98, %c16_i32_47 : i32
    %100 = tpu.iota {dimensions = array<i32: 0>} : vector<40x1xi32>
    %101 = vector.broadcast %99 : i32 to vector<40x1xi32>
    %102 = arith.addi %101, %100 : vector<40x1xi32>
    %c0_i32_48 = arith.constant 0 : i32
    %103 = vector.broadcast %c0_i32_48 : i32 to vector<40x1xi32>
    %104 = arith.cmpi sge, %102, %103 : vector<40x1xi32>
    %c40_i32_49 = arith.constant 40 : i32
    %105 = vector.broadcast %c40_i32_49 : i32 to vector<40x1xi32>
    %106 = arith.cmpi slt, %102, %105 : vector<40x1xi32>
    %107 = arith.andi %104, %106 : vector<40x1xi1>
    %cst_50 = arith.constant 0.000000e+00 : f32
    %108 = vector.shape_cast %107 : vector<40x1xi1> to vector<40x1xi1>
    %109 = vector.broadcast %108 : vector<40x1xi1> to vector<40x64xi1>
    %110 = vector.broadcast %cst_50 : f32 to vector<40x64xf32>
    %111 = arith.select %109, %96, %110 : vector<40x64xi1>, vector<40x64xf32>
    %c16 = arith.constant 16 : index
    %c0_51 = arith.constant 0 : index
    %112 = vector.load %arg20[%c16, %c0_51] : memref<72x64xf32, #tpu.memory_space<vmem>>, vector<40x64xf32>
    tpu.vector_store %arg20[%c16, %c0_51], %111 {strides = array<i32>} : memref<72x64xf32, #tpu.memory_space<vmem>>, vector<40x64xf32>,
    %c0_52 = arith.constant 0 : index
    %c0_53 = arith.constant 0 : index
    %c0_54 = arith.constant 0 : index
    %113 = vector.load %arg4[%c0_52, %c0_53, %c0_54] : memref<1x40x32xf32, #tpu.memory_space<vmem>>, vector<1x40x32xf32>
    %114 = vector.shape_cast %113 : vector<1x40x32xf32> to vector<40x32xf32>
    %115 = vector.extract_strided_slice %114 {offsets = [0, 0], sizes = [16, 32], strides = [1, 1]} : vector<40x32xf32> to vector<16x32xf32>
    %cst_55 = arith.constant dense<0.000000e+00> : vector<16xf32>
    %116 = vector.multi_reduction <add>, %115, %cst_55 [1] : vector<16x32xf32> to vector<16xf32>
    %117 = vector.shape_cast %116 : vector<16xf32> to vector<16x1xf32>
    %cst_56 = arith.constant 3.200000e+01 : f32
    %118 = vector.broadcast %cst_56 : f32 to vector<16x1xf32>
    %119 = arith.divf %117, %118 : vector<16x1xf32>
    %120 = vector.broadcast %119 : vector<16x1xf32> to vector<16x32xf32>
    %121 = arith.subf %115, %120 : vector<16x32xf32>
    %122 = arith.mulf %121, %121 : vector<16x32xf32>
    %cst_57 = arith.constant dense<0.000000e+00> : vector<16xf32>
    %123 = vector.multi_reduction <add>, %122, %cst_57 [1] : vector<16x32xf32> to vector<16xf32>
    %124 = vector.shape_cast %123 : vector<16xf32> to vector<16x1xf32>
    %cst_58 = arith.constant 3.200000e+01 : f32
    %125 = vector.broadcast %cst_58 : f32 to vector<16x1xf32>
    %126 = arith.divf %124, %125 : vector<16x1xf32>
    %cst_59 = arith.constant 9.99999974E-6 : f32
    %127 = vector.broadcast %cst_59 : f32 to vector<16x1xf32>
    %128 = arith.addf %126, %127 : vector<16x1xf32>
    %129 = math.rsqrt %128 : vector<16x1xf32>
    %130 = vector.broadcast %129 : vector<16x1xf32> to vector<16x32xf32>
    %131 = arith.mulf %121, %130 : vector<16x32xf32>
    %132 = vector.broadcast %0 : vector<1x32xf32> to vector<16x32xf32>
    %133 = arith.mulf %131, %132 : vector<16x32xf32>
    %134 = vector.broadcast %1 : vector<1x32xf32> to vector<16x32xf32>
    %135 = arith.addf %133, %134 : vector<16x32xf32>
    %c0_60 = arith.constant 0 : index
    %c0_61 = arith.constant 0 : index
    %136 = vector.load %arg7[%c0_60, %c0_61] : memref<32x64xf32, #tpu.memory_space<vmem>>, vector<32x64xf32>
    %cst_62 = arith.constant dense<0.000000e+00> : vector<16x64xf32>
    %137 = tpu.matmul %135, %136, %cst_62 {dimension_numbers = #tpu.dot_dimension_numbers<[1], [0], [0], [1], [0, 0, 1, 1], [], []>} : vector<16x32xf32>, vector<32x64xf32>, vector<16x64xf32> -> vector<16x64xf32>
    %138 = vector.broadcast %2 : vector<1x64xf32> to vector<16x64xf32>
    %139 = arith.addf %137, %138 : vector<16x64xf32>
    %c0_63 = arith.constant 0 : index
    %c0_64 = arith.constant 0 : index
    %140 = vector.load %arg9[%c0_63, %c0_64] : memref<32x64xf32, #tpu.memory_space<vmem>>, vector<32x64xf32>
    %cst_65 = arith.constant dense<0.000000e+00> : vector<16x64xf32>
    %141 = tpu.matmul %135, %140, %cst_65 {dimension_numbers = #tpu.dot_dimension_numbers<[1], [0], [0], [1], [0, 0, 1, 1], [], []>} : vector<16x32xf32>, vector<32x64xf32>, vector<16x64xf32> -> vector<16x64xf32>
    %142 = vector.broadcast %3 : vector<1x64xf32> to vector<16x64xf32>
    %143 = arith.addf %141, %142 : vector<16x64xf32>
    %cst_66 = arith.constant 5.000000e-01 : f32
    %144 = vector.broadcast %cst_66 : f32 to vector<16x64xf32>
    %145 = arith.mulf %144, %143 : vector<16x64xf32>
    %146 = math.tanh %145 : vector<16x64xf32>
    %cst_67 = arith.constant 1.000000e+00 : f32
    %147 = vector.broadcast %cst_67 : f32 to vector<16x64xf32>
    %148 = arith.addf %146, %147 : vector<16x64xf32>
    %cst_68 = arith.constant 5.000000e-01 : f32
    %149 = vector.broadcast %cst_68 : f32 to vector<16x64xf32>
    %150 = arith.mulf %149, %148 : vector<16x64xf32>
    %151 = arith.mulf %139, %150 : vector<16x64xf32>
    %c40_i32_69 = arith.constant 40 : i32
    %152 = arith.muli %arg1, %c40_i32_69 : i32
    %c16_i32_70 = arith.constant 16 : i32
    %153 = arith.subi %152, %c16_i32_70 : i32
    %c56_i32 = arith.constant 56 : i32
    %154 = arith.addi %153, %c56_i32 : i32
    %155 = tpu.iota {dimensions = array<i32: 0>} : vector<16x1xi32>
    %156 = vector.broadcast %154 : i32 to vector<16x1xi32>
    %157 = arith.addi %156, %155 : vector<16x1xi32>
    %c0_i32_71 = arith.constant 0 : i32
    %158 = vector.broadcast %c0_i32_71 : i32 to vector<16x1xi32>
    %159 = arith.cmpi sge, %157, %158 : vector<16x1xi32>
    %c40_i32_72 = arith.constant 40 : i32
    %160 = vector.broadcast %c40_i32_72 : i32 to vector<16x1xi32>
    %161 = arith.cmpi slt, %157, %160 : vector<16x1xi32>
    %162 = arith.andi %159, %161 : vector<16x1xi1>
    %cst_73 = arith.constant 0.000000e+00 : f32
    %163 = vector.shape_cast %162 : vector<16x1xi1> to vector<16x1xi1>
    %164 = vector.broadcast %163 : vector<16x1xi1> to vector<16x64xi1>
    %165 = vector.broadcast %cst_73 : f32 to vector<16x64xf32>
    %166 = arith.select %164, %151, %165 : vector<16x64xi1>, vector<16x64xf32>
    %c56 = arith.constant 56 : index
    %c0_74 = arith.constant 0 : index
    %167 = vector.load %arg20[%c56, %c0_74] : memref<72x64xf32, #tpu.memory_space<vmem>>, vector<16x64xf32>
    tpu.vector_store %arg20[%c56, %c0_74], %166 {strides = array<i32>} : memref<72x64xf32, #tpu.memory_space<vmem>>, vector<16x64xf32>,
    %c0_75 = arith.constant 0 : index
    %c0_76 = arith.constant 0 : index
    %168 = vector.load %arg11[%c0_75, %c0_76] : memref<31x64xf32, #tpu.memory_space<vmem>>, vector<1x64xf32>
    %c1 = arith.constant 1 : index
    %c0_77 = arith.constant 0 : index
    %169 = vector.load %arg20[%c1, %c0_77] : memref<72x64xf32, #tpu.memory_space<vmem>>, vector<40x64xf32>
    %170 = vector.broadcast %168 : vector<1x64xf32> to vector<40x64xf32>
    %171 = arith.mulf %169, %170 : vector<40x64xf32>
    %c4 = arith.constant 4 : index
    %c0_78 = arith.constant 0 : index
    %172 = vector.load %arg11[%c4, %c0_78] : memref<31x64xf32, #tpu.memory_space<vmem>>, vector<1x64xf32>
    %c5 = arith.constant 5 : index
    %c0_79 = arith.constant 0 : index
    %173 = vector.load %arg20[%c5, %c0_79] : memref<72x64xf32, #tpu.memory_space<vmem>>, vector<40x64xf32>
    %174 = vector.broadcast %172 : vector<1x64xf32> to vector<40x64xf32>
    %175 = arith.mulf %173, %174 : vector<40x64xf32>
    %176 = arith.addf %171, %175 : vector<40x64xf32>
    %c8 = arith.constant 8 : index
    %c0_80 = arith.constant 0 : index
    %177 = vector.load %arg11[%c8, %c0_80] : memref<31x64xf32, #tpu.memory_space<vmem>>, vector<1x64xf32>
    %c9 = arith.constant 9 : index
    %c0_81 = arith.constant 0 : index
    %178 = vector.load %arg20[%c9, %c0_81] : memref<72x64xf32, #tpu.memory_space<vmem>>, vector<40x64xf32>
    %179 = vector.broadcast %177 : vector<1x64xf32> to vector<40x64xf32>
    %180 = arith.mulf %178, %179 : vector<40x64xf32>
    %181 = arith.addf %176, %180 : vector<40x64xf32>
    %c12 = arith.constant 12 : index
    %c0_82 = arith.constant 0 : index
    %182 = vector.load %arg11[%c12, %c0_82] : memref<31x64xf32, #tpu.memory_space<vmem>>, vector<1x64xf32>
    %c13 = arith.constant 13 : index
    %c0_83 = arith.constant 0 : index
    %183 = vector.load %arg20[%c13, %c0_83] : memref<72x64xf32, #tpu.memory_space<vmem>>, vector<40x64xf32>
    %184 = vector.broadcast %182 : vector<1x64xf32> to vector<40x64xf32>
    %185 = arith.mulf %183, %184 : vector<40x64xf32>
    %186 = arith.addf %181, %185 : vector<40x64xf32>
    %c16_84 = arith.constant 16 : index
    %c0_85 = arith.constant 0 : index
    %187 = vector.load %arg11[%c16_84, %c0_85] : memref<31x64xf32, #tpu.memory_space<vmem>>, vector<1x64xf32>
    %c17 = arith.constant 17 : index
    %c0_86 = arith.constant 0 : index
    %188 = vector.load %arg20[%c17, %c0_86] : memref<72x64xf32, #tpu.memory_space<vmem>>, vector<40x64xf32>
    %189 = vector.broadcast %187 : vector<1x64xf32> to vector<40x64xf32>
    %190 = arith.mulf %188, %189 : vector<40x64xf32>
    %191 = arith.addf %186, %190 : vector<40x64xf32>
    %c20 = arith.constant 20 : index
    %c0_87 = arith.constant 0 : index
    %192 = vector.load %arg11[%c20, %c0_87] : memref<31x64xf32, #tpu.memory_space<vmem>>, vector<1x64xf32>
    %c21 = arith.constant 21 : index
    %c0_88 = arith.constant 0 : index
    %193 = vector.load %arg20[%c21, %c0_88] : memref<72x64xf32, #tpu.memory_space<vmem>>, vector<40x64xf32>
    %194 = vector.broadcast %192 : vector<1x64xf32> to vector<40x64xf32>
    %195 = arith.mulf %193, %194 : vector<40x64xf32>
    %196 = arith.addf %191, %195 : vector<40x64xf32>
    %c24 = arith.constant 24 : index
    %c0_89 = arith.constant 0 : index
    %197 = vector.load %arg11[%c24, %c0_89] : memref<31x64xf32, #tpu.memory_space<vmem>>, vector<1x64xf32>
    %c25 = arith.constant 25 : index
    %c0_90 = arith.constant 0 : index
    %198 = vector.load %arg20[%c25, %c0_90] : memref<72x64xf32, #tpu.memory_space<vmem>>, vector<40x64xf32>
    %199 = vector.broadcast %197 : vector<1x64xf32> to vector<40x64xf32>
    %200 = arith.mulf %198, %199 : vector<40x64xf32>
    %201 = arith.addf %196, %200 : vector<40x64xf32>
    %c28 = arith.constant 28 : index
    %c0_91 = arith.constant 0 : index
    %202 = vector.load %arg11[%c28, %c0_91] : memref<31x64xf32, #tpu.memory_space<vmem>>, vector<1x64xf32>
    %c29 = arith.constant 29 : index
    %c0_92 = arith.constant 0 : index
    %203 = vector.load %arg20[%c29, %c0_92] : memref<72x64xf32, #tpu.memory_space<vmem>>, vector<40x64xf32>
    %204 = vector.broadcast %202 : vector<1x64xf32> to vector<40x64xf32>
    %205 = arith.mulf %203, %204 : vector<40x64xf32>
    %206 = arith.addf %201, %205 : vector<40x64xf32>
    %c1_93 = arith.constant 1 : index
    %c0_94 = arith.constant 0 : index
    %207 = vector.load %arg11[%c1_93, %c0_94] : memref<31x64xf32, #tpu.memory_space<vmem>>, vector<1x64xf32>
    %c2 = arith.constant 2 : index
    %c0_95 = arith.constant 0 : index
    %208 = vector.load %arg20[%c2, %c0_95] : memref<72x64xf32, #tpu.memory_space<vmem>>, vector<40x64xf32>
    %209 = vector.broadcast %207 : vector<1x64xf32> to vector<40x64xf32>
    %210 = arith.mulf %208, %209 : vector<40x64xf32>
    %c5_96 = arith.constant 5 : index
    %c0_97 = arith.constant 0 : index
    %211 = vector.load %arg11[%c5_96, %c0_97] : memref<31x64xf32, #tpu.memory_space<vmem>>, vector<1x64xf32>
    %c6 = arith.constant 6 : index
    %c0_98 = arith.constant 0 : index
    %212 = vector.load %arg20[%c6, %c0_98] : memref<72x64xf32, #tpu.memory_space<vmem>>, vector<40x64xf32>
    %213 = vector.broadcast %211 : vector<1x64xf32> to vector<40x64xf32>
    %214 = arith.mulf %212, %213 : vector<40x64xf32>
    %215 = arith.addf %210, %214 : vector<40x64xf32>
    %c9_99 = arith.constant 9 : index
    %c0_100 = arith.constant 0 : index
    %216 = vector.load %arg11[%c9_99, %c0_100] : memref<31x64xf32, #tpu.memory_space<vmem>>, vector<1x64xf32>
    %c10 = arith.constant 10 : index
    %c0_101 = arith.constant 0 : index
    %217 = vector.load %arg20[%c10, %c0_101] : memref<72x64xf32, #tpu.memory_space<vmem>>, vector<40x64xf32>
    %218 = vector.broadcast %216 : vector<1x64xf32> to vector<40x64xf32>
    %219 = arith.mulf %217, %218 : vector<40x64xf32>
    %220 = arith.addf %215, %219 : vector<40x64xf32>
    %c13_102 = arith.constant 13 : index
    %c0_103 = arith.constant 0 : index
    %221 = vector.load %arg11[%c13_102, %c0_103] : memref<31x64xf32, #tpu.memory_space<vmem>>, vector<1x64xf32>
    %c14 = arith.constant 14 : index
    %c0_104 = arith.constant 0 : index
    %222 = vector.load %arg20[%c14, %c0_104] : memref<72x64xf32, #tpu.memory_space<vmem>>, vector<40x64xf32>
    %223 = vector.broadcast %221 : vector<1x64xf32> to vector<40x64xf32>
    %224 = arith.mulf %222, %223 : vector<40x64xf32>
    %225 = arith.addf %220, %224 : vector<40x64xf32>
    %c17_105 = arith.constant 17 : index
    %c0_106 = arith.constant 0 : index
    %226 = vector.load %arg11[%c17_105, %c0_106] : memref<31x64xf32, #tpu.memory_space<vmem>>, vector<1x64xf32>
    %c18 = arith.constant 18 : index
    %c0_107 = arith.constant 0 : index
    %227 = vector.load %arg20[%c18, %c0_107] : memref<72x64xf32, #tpu.memory_space<vmem>>, vector<40x64xf32>
    %228 = vector.broadcast %226 : vector<1x64xf32> to vector<40x64xf32>
    %229 = arith.mulf %227, %228 : vector<40x64xf32>
    %230 = arith.addf %225, %229 : vector<40x64xf32>
    %c21_108 = arith.constant 21 : index
    %c0_109 = arith.constant 0 : index
    %231 = vector.load %arg11[%c21_108, %c0_109] : memref<31x64xf32, #tpu.memory_space<vmem>>, vector<1x64xf32>
    %c22 = arith.constant 22 : index
    %c0_110 = arith.constant 0 : index
    %232 = vector.load %arg20[%c22, %c0_110] : memref<72x64xf32, #tpu.memory_space<vmem>>, vector<40x64xf32>
    %233 = vector.broadcast %231 : vector<1x64xf32> to vector<40x64xf32>
    %234 = arith.mulf %232, %233 : vector<40x64xf32>
    %235 = arith.addf %230, %234 : vector<40x64xf32>
    %c25_111 = arith.constant 25 : index
    %c0_112 = arith.constant 0 : index
    %236 = vector.load %arg11[%c25_111, %c0_112] : memref<31x64xf32, #tpu.memory_space<vmem>>, vector<1x64xf32>
    %c26 = arith.constant 26 : index
    %c0_113 = arith.constant 0 : index
    %237 = vector.load %arg20[%c26, %c0_113] : memref<72x64xf32, #tpu.memory_space<vmem>>, vector<40x64xf32>
    %238 = vector.broadcast %236 : vector<1x64xf32> to vector<40x64xf32>
    %239 = arith.mulf %237, %238 : vector<40x64xf32>
    %240 = arith.addf %235, %239 : vector<40x64xf32>
    %c29_114 = arith.constant 29 : index
    %c0_115 = arith.constant 0 : index
    %241 = vector.load %arg11[%c29_114, %c0_115] : memref<31x64xf32, #tpu.memory_space<vmem>>, vector<1x64xf32>
    %c30 = arith.constant 30 : index
    %c0_116 = arith.constant 0 : index
    %242 = vector.load %arg20[%c30, %c0_116] : memref<72x64xf32, #tpu.memory_space<vmem>>, vector<40x64xf32>
    %243 = vector.broadcast %241 : vector<1x64xf32> to vector<40x64xf32>
    %244 = arith.mulf %242, %243 : vector<40x64xf32>
    %245 = arith.addf %240, %244 : vector<40x64xf32>
    %c2_117 = arith.constant 2 : index
    %c0_118 = arith.constant 0 : index
    %246 = vector.load %arg11[%c2_117, %c0_118] : memref<31x64xf32, #tpu.memory_space<vmem>>, vector<1x64xf32>
    %c3 = arith.constant 3 : index
    %c0_119 = arith.constant 0 : index
    %247 = vector.load %arg20[%c3, %c0_119] : memref<72x64xf32, #tpu.memory_space<vmem>>, vector<40x64xf32>
    %248 = vector.broadcast %246 : vector<1x64xf32> to vector<40x64xf32>
    %249 = arith.mulf %247, %248 : vector<40x64xf32>
    %c6_120 = arith.constant 6 : index
    %c0_121 = arith.constant 0 : index
    %250 = vector.load %arg11[%c6_120, %c0_121] : memref<31x64xf32, #tpu.memory_space<vmem>>, vector<1x64xf32>
    %c7 = arith.constant 7 : index
    %c0_122 = arith.constant 0 : index
    %251 = vector.load %arg20[%c7, %c0_122] : memref<72x64xf32, #tpu.memory_space<vmem>>, vector<40x64xf32>
    %252 = vector.broadcast %250 : vector<1x64xf32> to vector<40x64xf32>
    %253 = arith.mulf %251, %252 : vector<40x64xf32>
    %254 = arith.addf %249, %253 : vector<40x64xf32>
    %c10_123 = arith.constant 10 : index
    %c0_124 = arith.constant 0 : index
    %255 = vector.load %arg11[%c10_123, %c0_124] : memref<31x64xf32, #tpu.memory_space<vmem>>, vector<1x64xf32>
    %c11 = arith.constant 11 : index
    %c0_125 = arith.constant 0 : index
    %256 = vector.load %arg20[%c11, %c0_125] : memref<72x64xf32, #tpu.memory_space<vmem>>, vector<40x64xf32>
    %257 = vector.broadcast %255 : vector<1x64xf32> to vector<40x64xf32>
    %258 = arith.mulf %256, %257 : vector<40x64xf32>
    %259 = arith.addf %254, %258 : vector<40x64xf32>
    %c14_126 = arith.constant 14 : index
    %c0_127 = arith.constant 0 : index
    %260 = vector.load %arg11[%c14_126, %c0_127] : memref<31x64xf32, #tpu.memory_space<vmem>>, vector<1x64xf32>
    %c15 = arith.constant 15 : index
    %c0_128 = arith.constant 0 : index
    %261 = vector.load %arg20[%c15, %c0_128] : memref<72x64xf32, #tpu.memory_space<vmem>>, vector<40x64xf32>
    %262 = vector.broadcast %260 : vector<1x64xf32> to vector<40x64xf32>
    %263 = arith.mulf %261, %262 : vector<40x64xf32>
    %264 = arith.addf %259, %263 : vector<40x64xf32>
    %c18_129 = arith.constant 18 : index
    %c0_130 = arith.constant 0 : index
    %265 = vector.load %arg11[%c18_129, %c0_130] : memref<31x64xf32, #tpu.memory_space<vmem>>, vector<1x64xf32>
    %c19 = arith.constant 19 : index
    %c0_131 = arith.constant 0 : index
    %266 = vector.load %arg20[%c19, %c0_131] : memref<72x64xf32, #tpu.memory_space<vmem>>, vector<40x64xf32>
    %267 = vector.broadcast %265 : vector<1x64xf32> to vector<40x64xf32>
    %268 = arith.mulf %266, %267 : vector<40x64xf32>
    %269 = arith.addf %264, %268 : vector<40x64xf32>
    %c22_132 = arith.constant 22 : index
    %c0_133 = arith.constant 0 : index
    %270 = vector.load %arg11[%c22_132, %c0_133] : memref<31x64xf32, #tpu.memory_space<vmem>>, vector<1x64xf32>
    %c23 = arith.constant 23 : index
    %c0_134 = arith.constant 0 : index
    %271 = vector.load %arg20[%c23, %c0_134] : memref<72x64xf32, #tpu.memory_space<vmem>>, vector<40x64xf32>
    %272 = vector.broadcast %270 : vector<1x64xf32> to vector<40x64xf32>
    %273 = arith.mulf %271, %272 : vector<40x64xf32>
    %274 = arith.addf %269, %273 : vector<40x64xf32>
    %c26_135 = arith.constant 26 : index
    %c0_136 = arith.constant 0 : index
    %275 = vector.load %arg11[%c26_135, %c0_136] : memref<31x64xf32, #tpu.memory_space<vmem>>, vector<1x64xf32>
    %c27 = arith.constant 27 : index
    %c0_137 = arith.constant 0 : index
    %276 = vector.load %arg20[%c27, %c0_137] : memref<72x64xf32, #tpu.memory_space<vmem>>, vector<40x64xf32>
    %277 = vector.broadcast %275 : vector<1x64xf32> to vector<40x64xf32>
    %278 = arith.mulf %276, %277 : vector<40x64xf32>
    %279 = arith.addf %274, %278 : vector<40x64xf32>
    %c30_138 = arith.constant 30 : index
    %c0_139 = arith.constant 0 : index
    %280 = vector.load %arg11[%c30_138, %c0_139] : memref<31x64xf32, #tpu.memory_space<vmem>>, vector<1x64xf32>
    %c31 = arith.constant 31 : index
    %c0_140 = arith.constant 0 : index
    %281 = vector.load %arg20[%c31, %c0_140] : memref<72x64xf32, #tpu.memory_space<vmem>>, vector<40x64xf32>
    %282 = vector.broadcast %280 : vector<1x64xf32> to vector<40x64xf32>
    %283 = arith.mulf %281, %282 : vector<40x64xf32>
    %284 = arith.addf %279, %283 : vector<40x64xf32>
    %c3_141 = arith.constant 3 : index
    %c0_142 = arith.constant 0 : index
    %285 = vector.load %arg11[%c3_141, %c0_142] : memref<31x64xf32, #tpu.memory_space<vmem>>, vector<1x64xf32>
    %c4_143 = arith.constant 4 : index
    %c0_144 = arith.constant 0 : index
    %286 = vector.load %arg20[%c4_143, %c0_144] : memref<72x64xf32, #tpu.memory_space<vmem>>, vector<40x64xf32>
    %287 = vector.broadcast %285 : vector<1x64xf32> to vector<40x64xf32>
    %288 = arith.mulf %286, %287 : vector<40x64xf32>
    %c7_145 = arith.constant 7 : index
    %c0_146 = arith.constant 0 : index
    %289 = vector.load %arg11[%c7_145, %c0_146] : memref<31x64xf32, #tpu.memory_space<vmem>>, vector<1x64xf32>
    %c8_147 = arith.constant 8 : index
    %c0_148 = arith.constant 0 : index
    %290 = vector.load %arg20[%c8_147, %c0_148] : memref<72x64xf32, #tpu.memory_space<vmem>>, vector<40x64xf32>
    %291 = vector.broadcast %289 : vector<1x64xf32> to vector<40x64xf32>
    %292 = arith.mulf %290, %291 : vector<40x64xf32>
    %293 = arith.addf %288, %292 : vector<40x64xf32>
    %c11_149 = arith.constant 11 : index
    %c0_150 = arith.constant 0 : index
    %294 = vector.load %arg11[%c11_149, %c0_150] : memref<31x64xf32, #tpu.memory_space<vmem>>, vector<1x64xf32>
    %c12_151 = arith.constant 12 : index
    %c0_152 = arith.constant 0 : index
    %295 = vector.load %arg20[%c12_151, %c0_152] : memref<72x64xf32, #tpu.memory_space<vmem>>, vector<40x64xf32>
    %296 = vector.broadcast %294 : vector<1x64xf32> to vector<40x64xf32>
    %297 = arith.mulf %295, %296 : vector<40x64xf32>
    %298 = arith.addf %293, %297 : vector<40x64xf32>
    %c15_153 = arith.constant 15 : index
    %c0_154 = arith.constant 0 : index
    %299 = vector.load %arg11[%c15_153, %c0_154] : memref<31x64xf32, #tpu.memory_space<vmem>>, vector<1x64xf32>
    %c16_155 = arith.constant 16 : index
    %c0_156 = arith.constant 0 : index
    %300 = vector.load %arg20[%c16_155, %c0_156] : memref<72x64xf32, #tpu.memory_space<vmem>>, vector<40x64xf32>
    %301 = vector.broadcast %299 : vector<1x64xf32> to vector<40x64xf32>
    %302 = arith.mulf %300, %301 : vector<40x64xf32>
    %303 = arith.addf %298, %302 : vector<40x64xf32>
    %c19_157 = arith.constant 19 : index
    %c0_158 = arith.constant 0 : index
    %304 = vector.load %arg11[%c19_157, %c0_158] : memref<31x64xf32, #tpu.memory_space<vmem>>, vector<1x64xf32>
    %c20_159 = arith.constant 20 : index
    %c0_160 = arith.constant 0 : index
    %305 = vector.load %arg20[%c20_159, %c0_160] : memref<72x64xf32, #tpu.memory_space<vmem>>, vector<40x64xf32>
    %306 = vector.broadcast %304 : vector<1x64xf32> to vector<40x64xf32>
    %307 = arith.mulf %305, %306 : vector<40x64xf32>
    %308 = arith.addf %303, %307 : vector<40x64xf32>
    %c23_161 = arith.constant 23 : index
    %c0_162 = arith.constant 0 : index
    %309 = vector.load %arg11[%c23_161, %c0_162] : memref<31x64xf32, #tpu.memory_space<vmem>>, vector<1x64xf32>
    %c24_163 = arith.constant 24 : index
    %c0_164 = arith.constant 0 : index
    %310 = vector.load %arg20[%c24_163, %c0_164] : memref<72x64xf32, #tpu.memory_space<vmem>>, vector<40x64xf32>
    %311 = vector.broadcast %309 : vector<1x64xf32> to vector<40x64xf32>
    %312 = arith.mulf %310, %311 : vector<40x64xf32>
    %313 = arith.addf %308, %312 : vector<40x64xf32>
    %c27_165 = arith.constant 27 : index
    %c0_166 = arith.constant 0 : index
    %314 = vector.load %arg11[%c27_165, %c0_166] : memref<31x64xf32, #tpu.memory_space<vmem>>, vector<1x64xf32>
    %c28_167 = arith.constant 28 : index
    %c0_168 = arith.constant 0 : index
    %315 = vector.load %arg20[%c28_167, %c0_168] : memref<72x64xf32, #tpu.memory_space<vmem>>, vector<40x64xf32>
    %316 = vector.broadcast %314 : vector<1x64xf32> to vector<40x64xf32>
    %317 = arith.mulf %315, %316 : vector<40x64xf32>
    %318 = arith.addf %313, %317 : vector<40x64xf32>
    %319 = arith.addf %206, %245 : vector<40x64xf32>
    %320 = arith.addf %284, %318 : vector<40x64xf32>
    %321 = arith.addf %319, %320 : vector<40x64xf32>
    %c0_169 = arith.constant 0 : index
    %c0_170 = arith.constant 0 : index
    %322 = vector.load %arg12[%c0_169, %c0_170] : memref<1x64xf32, #tpu.memory_space<vmem>>, vector<1x64xf32>
    %323 = vector.broadcast %322 : vector<1x64xf32> to vector<40x64xf32>
    %324 = arith.addf %321, %323 : vector<40x64xf32>
    %c0_171 = arith.constant 0 : index
    %c0_172 = arith.constant 0 : index
    %325 = vector.load %arg13[%c0_171, %c0_172] : memref<64x64xf32, #tpu.memory_space<vmem>>, vector<64x64xf32>
    %cst_173 = arith.constant dense<0.000000e+00> : vector<40x64xf32>
    %326 = tpu.matmul %324, %325, %cst_173 {dimension_numbers = #tpu.dot_dimension_numbers<[1], [0], [0], [1], [0, 0, 1, 1], [], []>} : vector<40x64xf32>, vector<64x64xf32>, vector<40x64xf32> -> vector<40x64xf32>
    %c0_174 = arith.constant 0 : index
    %c0_175 = arith.constant 0 : index
    %327 = vector.load %arg14[%c0_174, %c0_175] : memref<1x64xf32, #tpu.memory_space<vmem>>, vector<1x64xf32>
    %328 = vector.broadcast %327 : vector<1x64xf32> to vector<40x64xf32>
    %329 = arith.addf %326, %328 : vector<40x64xf32>
    %c0_176 = arith.constant 0 : index
    %c0_177 = arith.constant 0 : index
    %330 = vector.load %arg15[%c0_176, %c0_177] : memref<1x64xf32, #tpu.memory_space<vmem>>, vector<1x64xf32>
    %331 = vector.broadcast %330 : vector<1x64xf32> to vector<40x64xf32>
    %332 = arith.mulf %329, %331 : vector<40x64xf32>
    %c0_178 = arith.constant 0 : index
    %c0_179 = arith.constant 0 : index
    %333 = vector.load %arg16[%c0_178, %c0_179] : memref<1x64xf32, #tpu.memory_space<vmem>>, vector<1x64xf32>
    %334 = vector.broadcast %333 : vector<1x64xf32> to vector<40x64xf32>
    %335 = arith.addf %332, %334 : vector<40x64xf32>
    %cst_180 = arith.constant 5.000000e-01 : f32
    %336 = vector.broadcast %cst_180 : f32 to vector<40x64xf32>
    %337 = arith.mulf %336, %335 : vector<40x64xf32>
    %338 = math.tanh %337 : vector<40x64xf32>
    %cst_181 = arith.constant 1.000000e+00 : f32
    %339 = vector.broadcast %cst_181 : f32 to vector<40x64xf32>
    %340 = arith.addf %338, %339 : vector<40x64xf32>
    %cst_182 = arith.constant 5.000000e-01 : f32
    %341 = vector.broadcast %cst_182 : f32 to vector<40x64xf32>
    %342 = arith.mulf %341, %340 : vector<40x64xf32>
    %343 = arith.mulf %335, %342 : vector<40x64xf32>
    %c0_183 = arith.constant 0 : index
    %c0_184 = arith.constant 0 : index
    %344 = vector.load %arg17[%c0_183, %c0_184] : memref<64x32xf32, #tpu.memory_space<vmem>>, vector<64x32xf32>
    %cst_185 = arith.constant dense<0.000000e+00> : vector<40x32xf32>
    %345 = tpu.matmul %343, %344, %cst_185 {dimension_numbers = #tpu.dot_dimension_numbers<[1], [0], [0], [1], [0, 0, 1, 1], [], []>} : vector<40x64xf32>, vector<64x32xf32>, vector<40x32xf32> -> vector<40x32xf32>
    %c0_186 = arith.constant 0 : index
    %c0_187 = arith.constant 0 : index
    %346 = vector.load %arg18[%c0_186, %c0_187] : memref<1x32xf32, #tpu.memory_space<vmem>>, vector<1x32xf32>
    %347 = vector.broadcast %346 : vector<1x32xf32> to vector<40x32xf32>
    %348 = arith.addf %345, %347 : vector<40x32xf32>
    %c0_188 = arith.constant 0 : index
    %c0_189 = arith.constant 0 : index
    %c0_190 = arith.constant 0 : index
    %349 = vector.load %arg3[%c0_188, %c0_189, %c0_190] : memref<1x40x32xf32, #tpu.memory_space<vmem>>, vector<1x40x32xf32>
    %350 = vector.shape_cast %349 : vector<1x40x32xf32> to vector<40x32xf32>
    %351 = arith.addf %348, %350 : vector<40x32xf32>
    %c0_191 = arith.constant 0 : index
    %c0_192 = arith.constant 0 : index
    %c0_193 = arith.constant 0 : index
    %352 = vector.load %arg19[%c0_191, %c0_192, %c0_193] : memref<1x40x32xf32, #tpu.memory_space<vmem>>, vector<1x40x32xf32>
    %353 = vector.shape_cast %352 : vector<1x40x32xf32> to vector<40x32xf32>
    %354 = vector.shape_cast %351 : vector<40x32xf32> to vector<1x40x32xf32>
    tpu.vector_store %arg19[%c0_191, %c0_192, %c0_193], %354 {strides = array<i32>} : memref<1x40x32xf32, #tpu.memory_space<vmem>>, vector<1x40x32xf32>,
    return
  }
  func.func @transform_0(%arg0: i32, %arg1: i32) -> (i32, i32, i32) {
    %c1_i32 = arith.constant 1 : i32
    %0 = arith.subi %arg1, %c1_i32 : i32
    %c0_i32 = arith.constant 0 : i32
    %1 = arith.maxsi %0, %c0_i32 : i32
    %c0_i32_0 = arith.constant 0 : i32
    %c0_i32_1 = arith.constant 0 : i32
    return %arg0, %1, %c0_i32_0 : i32, i32, i32
  }
  func.func @transform_1(%arg0: i32, %arg1: i32) -> (i32, i32, i32) {
    %c0_i32 = arith.constant 0 : i32
    %c0_i32_0 = arith.constant 0 : i32
    return %arg0, %arg1, %c0_i32 : i32, i32, i32
  }
  func.func @transform_2(%arg0: i32, %arg1: i32) -> (i32, i32, i32) {
    %c1_i32 = arith.constant 1 : i32
    %0 = arith.addi %arg1, %c1_i32 : i32
    %c0_i32 = arith.constant 0 : i32
    %1 = arith.minsi %0, %c0_i32 : i32
    %c0_i32_0 = arith.constant 0 : i32
    %c0_i32_1 = arith.constant 0 : i32
    return %arg0, %1, %c0_i32_0 : i32, i32, i32
  }
  func.func @transform_3(%arg0: i32, %arg1: i32) -> (i32, i32) {
    %c0_i32 = arith.constant 0 : i32
    %c0_i32_0 = arith.constant 0 : i32
    %c0_i32_1 = arith.constant 0 : i32
    return %c0_i32, %c0_i32_0 : i32, i32
  }
  func.func @transform_4(%arg0: i32, %arg1: i32) -> (i32, i32) {
    %c0_i32 = arith.constant 0 : i32
    %c0_i32_0 = arith.constant 0 : i32
    %c0_i32_1 = arith.constant 0 : i32
    return %c0_i32, %c0_i32_0 : i32, i32
  }
  func.func @transform_5(%arg0: i32, %arg1: i32) -> (i32, i32) {
    %c0_i32 = arith.constant 0 : i32
    %c0_i32_0 = arith.constant 0 : i32
    %c0_i32_1 = arith.constant 0 : i32
    return %c0_i32, %c0_i32_0 : i32, i32
  }
  func.func @transform_6(%arg0: i32, %arg1: i32) -> (i32, i32) {
    %c0_i32 = arith.constant 0 : i32
    %c0_i32_0 = arith.constant 0 : i32
    %c0_i32_1 = arith.constant 0 : i32
    return %c0_i32, %c0_i32_0 : i32, i32
  }
  func.func @transform_7(%arg0: i32, %arg1: i32) -> (i32, i32) {
    %c0_i32 = arith.constant 0 : i32
    %c0_i32_0 = arith.constant 0 : i32
    %c0_i32_1 = arith.constant 0 : i32
    return %c0_i32, %c0_i32_0 : i32, i32
  }
  func.func @transform_8(%arg0: i32, %arg1: i32) -> (i32, i32) {
    %c0_i32 = arith.constant 0 : i32
    %c0_i32_0 = arith.constant 0 : i32
    %c0_i32_1 = arith.constant 0 : i32
    return %c0_i32, %c0_i32_0 : i32, i32
  }
  func.func @transform_9(%arg0: i32, %arg1: i32) -> (i32, i32) {
    %c0_i32 = arith.constant 0 : i32
    %c0_i32_0 = arith.constant 0 : i32
    %c0_i32_1 = arith.constant 0 : i32
    return %c0_i32, %c0_i32_0 : i32, i32
  }
  func.func @transform_10(%arg0: i32, %arg1: i32) -> (i32, i32) {
    %c0_i32 = arith.constant 0 : i32
    %c0_i32_0 = arith.constant 0 : i32
    %c0_i32_1 = arith.constant 0 : i32
    return %c0_i32, %c0_i32_0 : i32, i32
  }
  func.func @transform_11(%arg0: i32, %arg1: i32) -> (i32, i32) {
    %c0_i32 = arith.constant 0 : i32
    %c0_i32_0 = arith.constant 0 : i32
    %c0_i32_1 = arith.constant 0 : i32
    return %c0_i32, %c0_i32_0 : i32, i32
  }
  func.func @transform_12(%arg0: i32, %arg1: i32) -> (i32, i32) {
    %c0_i32 = arith.constant 0 : i32
    %c0_i32_0 = arith.constant 0 : i32
    %c0_i32_1 = arith.constant 0 : i32
    return %c0_i32, %c0_i32_0 : i32, i32
  }
  func.func @transform_13(%arg0: i32, %arg1: i32) -> (i32, i32) {
    %c0_i32 = arith.constant 0 : i32
    %c0_i32_0 = arith.constant 0 : i32
    %c0_i32_1 = arith.constant 0 : i32
    return %c0_i32, %c0_i32_0 : i32, i32
  }
  func.func @transform_14(%arg0: i32, %arg1: i32) -> (i32, i32) {
    %c0_i32 = arith.constant 0 : i32
    %c0_i32_0 = arith.constant 0 : i32
    %c0_i32_1 = arith.constant 0 : i32
    return %c0_i32, %c0_i32_0 : i32, i32
  }
  func.func @transform_15(%arg0: i32, %arg1: i32) -> (i32, i32) {
    %c0_i32 = arith.constant 0 : i32
    %c0_i32_0 = arith.constant 0 : i32
    %c0_i32_1 = arith.constant 0 : i32
    return %c0_i32, %c0_i32_0 : i32, i32
  }
  func.func @transform_16(%arg0: i32, %arg1: i32) -> (i32, i32) {
    %c0_i32 = arith.constant 0 : i32
    %c0_i32_0 = arith.constant 0 : i32
    %c0_i32_1 = arith.constant 0 : i32
    return %c0_i32, %c0_i32_0 : i32, i32
  }
  func.func @transform_17(%arg0: i32, %arg1: i32) -> (i32, i32, i32) {
    %c0_i32 = arith.constant 0 : i32
    %c0_i32_0 = arith.constant 0 : i32
    return %arg0, %arg1, %c0_i32 : i32, i32, i32
  }
}

module attributes {stable_mosaic.version = 11 : i64} {
  func.func @_conformer_conv_kernel(%arg0: i32, %arg1: i32, %arg2: memref<1x40x32xf32, #tpu.memory_space<vmem>>, %arg3: memref<1x40x32xf32, #tpu.memory_space<vmem>>, %arg4: memref<1x40x32xf32, #tpu.memory_space<vmem>>, %arg5: memref<1x32xf32, #tpu.memory_space<vmem>>, %arg6: memref<1x32xf32, #tpu.memory_space<vmem>>, %arg7: memref<32x64xf32, #tpu.memory_space<vmem>>, %arg8: memref<1x64xf32, #tpu.memory_space<vmem>>, %arg9: memref<32x64xf32, #tpu.memory_space<vmem>>, %arg10: memref<1x64xf32, #tpu.memory_space<vmem>>, %arg11: memref<31x64xf32, #tpu.memory_space<vmem>>, %arg12: memref<1x64xf32, #tpu.memory_space<vmem>>, %arg13: memref<64x64xf32, #tpu.memory_space<vmem>>, %arg14: memref<1x64xf32, #tpu.memory_space<vmem>>, %arg15: memref<1x64xf32, #tpu.memory_space<vmem>>, %arg16: memref<1x64xf32, #tpu.memory_space<vmem>>, %arg17: memref<64x32xf32, #tpu.memory_space<vmem>>, %arg18: memref<1x32xf32, #tpu.memory_space<vmem>>, %arg19: memref<1x40x32xf32, #tpu.memory_space<vmem>>, %arg20: memref<72x64xf32, #tpu.memory_space<vmem>>) attributes {dimension_semantics = [#tpu.dimension_semantics<parallel>, #tpu.dimension_semantics<parallel>], iteration_bounds = array<i64: 2, 1>, scalar_prefetch = 0 : i64, scratch_operands = 1 : i64, tpu.core_type = #tpu.core_type<tc>, window_params = [{transform_indices = @transform_0, window_bounds = array<i64: 1, 40, 32>}, {transform_indices = @transform_1, window_bounds = array<i64: 1, 40, 32>}, {transform_indices = @transform_2, window_bounds = array<i64: 1, 40, 32>}, {pipeline_mode = #tpu.pipeline_mode<synchronous>, transform_indices = @transform_3, window_bounds = array<i64: 1, 32>}, {pipeline_mode = #tpu.pipeline_mode<synchronous>, transform_indices = @transform_4, window_bounds = array<i64: 1, 32>}, {pipeline_mode = #tpu.pipeline_mode<synchronous>, transform_indices = @transform_5, window_bounds = array<i64: 32, 64>}, {pipeline_mode = #tpu.pipeline_mode<synchronous>, transform_indices = @transform_6, window_bounds = array<i64: 1, 64>}, {pipeline_mode = #tpu.pipeline_mode<synchronous>, transform_indices = @transform_7, window_bounds = array<i64: 32, 64>}, {pipeline_mode = #tpu.pipeline_mode<synchronous>, transform_indices = @transform_8, window_bounds = array<i64: 1, 64>}, {pipeline_mode = #tpu.pipeline_mode<synchronous>, transform_indices = @transform_9, window_bounds = array<i64: 31, 64>}, {pipeline_mode = #tpu.pipeline_mode<synchronous>, transform_indices = @transform_10, window_bounds = array<i64: 1, 64>}, {pipeline_mode = #tpu.pipeline_mode<synchronous>, transform_indices = @transform_11, window_bounds = array<i64: 64, 64>}, {pipeline_mode = #tpu.pipeline_mode<synchronous>, transform_indices = @transform_12, window_bounds = array<i64: 1, 64>}, {pipeline_mode = #tpu.pipeline_mode<synchronous>, transform_indices = @transform_13, window_bounds = array<i64: 1, 64>}, {pipeline_mode = #tpu.pipeline_mode<synchronous>, transform_indices = @transform_14, window_bounds = array<i64: 1, 64>}, {pipeline_mode = #tpu.pipeline_mode<synchronous>, transform_indices = @transform_15, window_bounds = array<i64: 64, 32>}, {pipeline_mode = #tpu.pipeline_mode<synchronous>, transform_indices = @transform_16, window_bounds = array<i64: 1, 32>}, {transform_indices = @transform_17, window_bounds = array<i64: 1, 40, 32>}]} {
    %c0 = arith.constant 0 : index
    %c0_0 = arith.constant 0 : index
    %0 = vector.load %arg5[%c0, %c0_0] : memref<1x32xf32, #tpu.memory_space<vmem>>, vector<1x32xf32>
    %c0_1 = arith.constant 0 : index
    %c0_2 = arith.constant 0 : index
    %1 = vector.load %arg6[%c0_1, %c0_2] : memref<1x32xf32, #tpu.memory_space<vmem>>, vector<1x32xf32>
    %c0_3 = arith.constant 0 : index
    %c0_4 = arith.constant 0 : index
    %2 = vector.load %arg8[%c0_3, %c0_4] : memref<1x64xf32, #tpu.memory_space<vmem>>, vector<1x64xf32>
    %c0_5 = arith.constant 0 : index
    %c0_6 = arith.constant 0 : index
    %3 = vector.load %arg10[%c0_5, %c0_6] : memref<1x64xf32, #tpu.memory_space<vmem>>, vector<1x64xf32>
    %c0_7 = arith.constant 0 : index
    %c0_8 = arith.constant 0 : index
    %c0_9 = arith.constant 0 : index
    %4 = vector.load %arg2[%c0_7, %c0_8, %c0_9] : memref<1x40x32xf32, #tpu.memory_space<vmem>>, vector<1x40x32xf32>
    %5 = vector.shape_cast %4 : vector<1x40x32xf32> to vector<40x32xf32>
    %6 = vector.extract_strided_slice %5 {offsets = [24, 0], sizes = [16, 32], strides = [1, 1]} : vector<40x32xf32> to vector<16x32xf32>
    %cst = arith.constant dense<0.000000e+00> : vector<16xf32>
    %7 = vector.multi_reduction <add>, %6, %cst [1] : vector<16x32xf32> to vector<16xf32>
    %8 = vector.shape_cast %7 : vector<16xf32> to vector<16x1xf32>
    %cst_10 = arith.constant 3.200000e+01 : f32
    %9 = vector.broadcast %cst_10 : f32 to vector<16x1xf32>
    %10 = arith.divf %8, %9 : vector<16x1xf32>
    %11 = vector.broadcast %10 : vector<16x1xf32> to vector<16x32xf32>
    %12 = arith.subf %6, %11 : vector<16x32xf32>
    %13 = arith.mulf %12, %12 : vector<16x32xf32>
    %cst_11 = arith.constant dense<0.000000e+00> : vector<16xf32>
    %14 = vector.multi_reduction <add>, %13, %cst_11 [1] : vector<16x32xf32> to vector<16xf32>
    %15 = vector.shape_cast %14 : vector<16xf32> to vector<16x1xf32>
    %cst_12 = arith.constant 3.200000e+01 : f32
    %16 = vector.broadcast %cst_12 : f32 to vector<16x1xf32>
    %17 = arith.divf %15, %16 : vector<16x1xf32>
    %cst_13 = arith.constant 9.99999974E-6 : f32
    %18 = vector.broadcast %cst_13 : f32 to vector<16x1xf32>
    %19 = arith.addf %17, %18 : vector<16x1xf32>
    %20 = math.rsqrt %19 : vector<16x1xf32>
    %21 = vector.broadcast %20 : vector<16x1xf32> to vector<16x32xf32>
    %22 = arith.mulf %12, %21 : vector<16x32xf32>
    %23 = vector.broadcast %0 : vector<1x32xf32> to vector<16x32xf32>
    %24 = arith.mulf %22, %23 : vector<16x32xf32>
    %25 = vector.broadcast %1 : vector<1x32xf32> to vector<16x32xf32>
    %26 = arith.addf %24, %25 : vector<16x32xf32>
    %c0_14 = arith.constant 0 : index
    %c0_15 = arith.constant 0 : index
    %27 = vector.load %arg7[%c0_14, %c0_15] : memref<32x64xf32, #tpu.memory_space<vmem>>, vector<32x64xf32>
    %cst_16 = arith.constant dense<0.000000e+00> : vector<16x64xf32>
    %28 = tpu.matmul %26, %27, %cst_16 {dimension_numbers = #tpu.dot_dimension_numbers<[1], [0], [0], [1], [0, 0, 1, 1], [], []>} : vector<16x32xf32>, vector<32x64xf32>, vector<16x64xf32> -> vector<16x64xf32>
    %29 = vector.broadcast %2 : vector<1x64xf32> to vector<16x64xf32>
    %30 = arith.addf %28, %29 : vector<16x64xf32>
    %c0_17 = arith.constant 0 : index
    %c0_18 = arith.constant 0 : index
    %31 = vector.load %arg9[%c0_17, %c0_18] : memref<32x64xf32, #tpu.memory_space<vmem>>, vector<32x64xf32>
    %cst_19 = arith.constant dense<0.000000e+00> : vector<16x64xf32>
    %32 = tpu.matmul %26, %31, %cst_19 {dimension_numbers = #tpu.dot_dimension_numbers<[1], [0], [0], [1], [0, 0, 1, 1], [], []>} : vector<16x32xf32>, vector<32x64xf32>, vector<16x64xf32> -> vector<16x64xf32>
    %33 = vector.broadcast %3 : vector<1x64xf32> to vector<16x64xf32>
    %34 = arith.addf %32, %33 : vector<16x64xf32>
    %cst_20 = arith.constant 5.000000e-01 : f32
    %35 = vector.broadcast %cst_20 : f32 to vector<16x64xf32>
    %36 = arith.mulf %35, %34 : vector<16x64xf32>
    %37 = math.tanh %36 : vector<16x64xf32>
    %cst_21 = arith.constant 1.000000e+00 : f32
    %38 = vector.broadcast %cst_21 : f32 to vector<16x64xf32>
    %39 = arith.addf %37, %38 : vector<16x64xf32>
    %cst_22 = arith.constant 5.000000e-01 : f32
    %40 = vector.broadcast %cst_22 : f32 to vector<16x64xf32>
    %41 = arith.mulf %40, %39 : vector<16x64xf32>
    %42 = arith.mulf %30, %41 : vector<16x64xf32>
    %c40_i32 = arith.constant 40 : i32
    %43 = arith.muli %arg1, %c40_i32 : i32
    %c16_i32 = arith.constant 16 : i32
    %44 = arith.subi %43, %c16_i32 : i32
    %c0_i32 = arith.constant 0 : i32
    %45 = arith.addi %44, %c0_i32 : i32
    %46 = tpu.iota {dimensions = array<i32: 0>} : vector<16x1xi32>
    %47 = vector.broadcast %45 : i32 to vector<16x1xi32>
    %48 = arith.addi %47, %46 : vector<16x1xi32>
    %c0_i32_23 = arith.constant 0 : i32
    %49 = vector.broadcast %c0_i32_23 : i32 to vector<16x1xi32>
    %50 = arith.cmpi sge, %48, %49 : vector<16x1xi32>
    %c40_i32_24 = arith.constant 40 : i32
    %51 = vector.broadcast %c40_i32_24 : i32 to vector<16x1xi32>
    %52 = arith.cmpi slt, %48, %51 : vector<16x1xi32>
    %53 = arith.andi %50, %52 : vector<16x1xi1>
    %cst_25 = arith.constant 0.000000e+00 : f32
    %54 = vector.shape_cast %53 : vector<16x1xi1> to vector<16x1xi1>
    %55 = vector.broadcast %54 : vector<16x1xi1> to vector<16x64xi1>
    %56 = vector.broadcast %cst_25 : f32 to vector<16x64xf32>
    %57 = arith.select %55, %42, %56 : vector<16x64xi1>, vector<16x64xf32>
    %c0_26 = arith.constant 0 : index
    %c0_27 = arith.constant 0 : index
    %58 = vector.load %arg20[%c0_26, %c0_27] : memref<72x64xf32, #tpu.memory_space<vmem>>, vector<16x64xf32>
    tpu.vector_store %arg20[%c0_26, %c0_27], %57 {strides = array<i32>} : memref<72x64xf32, #tpu.memory_space<vmem>>, vector<16x64xf32>,
    %c0_28 = arith.constant 0 : index
    %c0_29 = arith.constant 0 : index
    %c0_30 = arith.constant 0 : index
    %59 = vector.load %arg3[%c0_28, %c0_29, %c0_30] : memref<1x40x32xf32, #tpu.memory_space<vmem>>, vector<1x40x32xf32>
    %60 = vector.shape_cast %59 : vector<1x40x32xf32> to vector<40x32xf32>
    %cst_31 = arith.constant dense<0.000000e+00> : vector<40xf32>
    %61 = vector.multi_reduction <add>, %60, %cst_31 [1] : vector<40x32xf32> to vector<40xf32>
    %62 = vector.shape_cast %61 : vector<40xf32> to vector<40x1xf32>
    %cst_32 = arith.constant 3.200000e+01 : f32
    %63 = vector.broadcast %cst_32 : f32 to vector<40x1xf32>
    %64 = arith.divf %62, %63 : vector<40x1xf32>
    %65 = vector.broadcast %64 : vector<40x1xf32> to vector<40x32xf32>
    %66 = arith.subf %60, %65 : vector<40x32xf32>
    %67 = arith.mulf %66, %66 : vector<40x32xf32>
    %cst_33 = arith.constant dense<0.000000e+00> : vector<40xf32>
    %68 = vector.multi_reduction <add>, %67, %cst_33 [1] : vector<40x32xf32> to vector<40xf32>
    %69 = vector.shape_cast %68 : vector<40xf32> to vector<40x1xf32>
    %cst_34 = arith.constant 3.200000e+01 : f32
    %70 = vector.broadcast %cst_34 : f32 to vector<40x1xf32>
    %71 = arith.divf %69, %70 : vector<40x1xf32>
    %cst_35 = arith.constant 9.99999974E-6 : f32
    %72 = vector.broadcast %cst_35 : f32 to vector<40x1xf32>
    %73 = arith.addf %71, %72 : vector<40x1xf32>
    %74 = math.rsqrt %73 : vector<40x1xf32>
    %75 = vector.broadcast %74 : vector<40x1xf32> to vector<40x32xf32>
    %76 = arith.mulf %66, %75 : vector<40x32xf32>
    %77 = vector.broadcast %0 : vector<1x32xf32> to vector<40x32xf32>
    %78 = arith.mulf %76, %77 : vector<40x32xf32>
    %79 = vector.broadcast %1 : vector<1x32xf32> to vector<40x32xf32>
    %80 = arith.addf %78, %79 : vector<40x32xf32>
    %c0_36 = arith.constant 0 : index
    %c0_37 = arith.constant 0 : index
    %81 = vector.load %arg7[%c0_36, %c0_37] : memref<32x64xf32, #tpu.memory_space<vmem>>, vector<32x64xf32>
    %cst_38 = arith.constant dense<0.000000e+00> : vector<40x64xf32>
    %82 = tpu.matmul %80, %81, %cst_38 {dimension_numbers = #tpu.dot_dimension_numbers<[1], [0], [0], [1], [0, 0, 1, 1], [], []>} : vector<40x32xf32>, vector<32x64xf32>, vector<40x64xf32> -> vector<40x64xf32>
    %83 = vector.broadcast %2 : vector<1x64xf32> to vector<40x64xf32>
    %84 = arith.addf %82, %83 : vector<40x64xf32>
    %c0_39 = arith.constant 0 : index
    %c0_40 = arith.constant 0 : index
    %85 = vector.load %arg9[%c0_39, %c0_40] : memref<32x64xf32, #tpu.memory_space<vmem>>, vector<32x64xf32>
    %cst_41 = arith.constant dense<0.000000e+00> : vector<40x64xf32>
    %86 = tpu.matmul %80, %85, %cst_41 {dimension_numbers = #tpu.dot_dimension_numbers<[1], [0], [0], [1], [0, 0, 1, 1], [], []>} : vector<40x32xf32>, vector<32x64xf32>, vector<40x64xf32> -> vector<40x64xf32>
    %87 = vector.broadcast %3 : vector<1x64xf32> to vector<40x64xf32>
    %88 = arith.addf %86, %87 : vector<40x64xf32>
    %cst_42 = arith.constant 5.000000e-01 : f32
    %89 = vector.broadcast %cst_42 : f32 to vector<40x64xf32>
    %90 = arith.mulf %89, %88 : vector<40x64xf32>
    %91 = math.tanh %90 : vector<40x64xf32>
    %cst_43 = arith.constant 1.000000e+00 : f32
    %92 = vector.broadcast %cst_43 : f32 to vector<40x64xf32>
    %93 = arith.addf %91, %92 : vector<40x64xf32>
    %cst_44 = arith.constant 5.000000e-01 : f32
    %94 = vector.broadcast %cst_44 : f32 to vector<40x64xf32>
    %95 = arith.mulf %94, %93 : vector<40x64xf32>
    %96 = arith.mulf %84, %95 : vector<40x64xf32>
    %c40_i32_45 = arith.constant 40 : i32
    %97 = arith.muli %arg1, %c40_i32_45 : i32
    %c16_i32_46 = arith.constant 16 : i32
    %98 = arith.subi %97, %c16_i32_46 : i32
    %c16_i32_47 = arith.constant 16 : i32
    %99 = arith.addi %98, %c16_i32_47 : i32
    %100 = tpu.iota {dimensions = array<i32: 0>} : vector<40x1xi32>
    %101 = vector.broadcast %99 : i32 to vector<40x1xi32>
    %102 = arith.addi %101, %100 : vector<40x1xi32>
    %c0_i32_48 = arith.constant 0 : i32
    %103 = vector.broadcast %c0_i32_48 : i32 to vector<40x1xi32>
    %104 = arith.cmpi sge, %102, %103 : vector<40x1xi32>
    %c40_i32_49 = arith.constant 40 : i32
    %105 = vector.broadcast %c40_i32_49 : i32 to vector<40x1xi32>
    %106 = arith.cmpi slt, %102, %105 : vector<40x1xi32>
    %107 = arith.andi %104, %106 : vector<40x1xi1>
    %cst_50 = arith.constant 0.000000e+00 : f32
    %108 = vector.shape_cast %107 : vector<40x1xi1> to vector<40x1xi1>
    %109 = vector.broadcast %108 : vector<40x1xi1> to vector<40x64xi1>
    %110 = vector.broadcast %cst_50 : f32 to vector<40x64xf32>
    %111 = arith.select %109, %96, %110 : vector<40x64xi1>, vector<40x64xf32>
    %c16 = arith.constant 16 : index
    %c0_51 = arith.constant 0 : index
    %112 = vector.load %arg20[%c16, %c0_51] : memref<72x64xf32, #tpu.memory_space<vmem>>, vector<40x64xf32>
    tpu.vector_store %arg20[%c16, %c0_51], %111 {strides = array<i32>} : memref<72x64xf32, #tpu.memory_space<vmem>>, vector<40x64xf32>,
    %c0_52 = arith.constant 0 : index
    %c0_53 = arith.constant 0 : index
    %c0_54 = arith.constant 0 : index
    %113 = vector.load %arg4[%c0_52, %c0_53, %c0_54] : memref<1x40x32xf32, #tpu.memory_space<vmem>>, vector<1x40x32xf32>
    %114 = vector.shape_cast %113 : vector<1x40x32xf32> to vector<40x32xf32>
    %115 = vector.extract_strided_slice %114 {offsets = [0, 0], sizes = [16, 32], strides = [1, 1]} : vector<40x32xf32> to vector<16x32xf32>
    %cst_55 = arith.constant dense<0.000000e+00> : vector<16xf32>
    %116 = vector.multi_reduction <add>, %115, %cst_55 [1] : vector<16x32xf32> to vector<16xf32>
    %117 = vector.shape_cast %116 : vector<16xf32> to vector<16x1xf32>
    %cst_56 = arith.constant 3.200000e+01 : f32
    %118 = vector.broadcast %cst_56 : f32 to vector<16x1xf32>
    %119 = arith.divf %117, %118 : vector<16x1xf32>
    %120 = vector.broadcast %119 : vector<16x1xf32> to vector<16x32xf32>
    %121 = arith.subf %115, %120 : vector<16x32xf32>
    %122 = arith.mulf %121, %121 : vector<16x32xf32>
    %cst_57 = arith.constant dense<0.000000e+00> : vector<16xf32>
    %123 = vector.multi_reduction <add>, %122, %cst_57 [1] : vector<16x32xf32> to vector<16xf32>
    %124 = vector.shape_cast %123 : vector<16xf32> to vector<16x1xf32>
    %cst_58 = arith.constant 3.200000e+01 : f32
    %125 = vector.broadcast %cst_58 : f32 to vector<16x1xf32>
    %126 = arith.divf %124, %125 : vector<16x1xf32>
    %cst_59 = arith.constant 9.99999974E-6 : f32
    %127 = vector.broadcast %cst_59 : f32 to vector<16x1xf32>
    %128 = arith.addf %126, %127 : vector<16x1xf32>
    %129 = math.rsqrt %128 : vector<16x1xf32>
    %130 = vector.broadcast %129 : vector<16x1xf32> to vector<16x32xf32>
    %131 = arith.mulf %121, %130 : vector<16x32xf32>
    %132 = vector.broadcast %0 : vector<1x32xf32> to vector<16x32xf32>
    %133 = arith.mulf %131, %132 : vector<16x32xf32>
    %134 = vector.broadcast %1 : vector<1x32xf32> to vector<16x32xf32>
    %135 = arith.addf %133, %134 : vector<16x32xf32>
    %c0_60 = arith.constant 0 : index
    %c0_61 = arith.constant 0 : index
    %136 = vector.load %arg7[%c0_60, %c0_61] : memref<32x64xf32, #tpu.memory_space<vmem>>, vector<32x64xf32>
    %cst_62 = arith.constant dense<0.000000e+00> : vector<16x64xf32>
    %137 = tpu.matmul %135, %136, %cst_62 {dimension_numbers = #tpu.dot_dimension_numbers<[1], [0], [0], [1], [0, 0, 1, 1], [], []>} : vector<16x32xf32>, vector<32x64xf32>, vector<16x64xf32> -> vector<16x64xf32>
    %138 = vector.broadcast %2 : vector<1x64xf32> to vector<16x64xf32>
    %139 = arith.addf %137, %138 : vector<16x64xf32>
    %c0_63 = arith.constant 0 : index
    %c0_64 = arith.constant 0 : index
    %140 = vector.load %arg9[%c0_63, %c0_64] : memref<32x64xf32, #tpu.memory_space<vmem>>, vector<32x64xf32>
    %cst_65 = arith.constant dense<0.000000e+00> : vector<16x64xf32>
    %141 = tpu.matmul %135, %140, %cst_65 {dimension_numbers = #tpu.dot_dimension_numbers<[1], [0], [0], [1], [0, 0, 1, 1], [], []>} : vector<16x32xf32>, vector<32x64xf32>, vector<16x64xf32> -> vector<16x64xf32>
    %142 = vector.broadcast %3 : vector<1x64xf32> to vector<16x64xf32>
    %143 = arith.addf %141, %142 : vector<16x64xf32>
    %cst_66 = arith.constant 5.000000e-01 : f32
    %144 = vector.broadcast %cst_66 : f32 to vector<16x64xf32>
    %145 = arith.mulf %144, %143 : vector<16x64xf32>
    %146 = math.tanh %145 : vector<16x64xf32>
    %cst_67 = arith.constant 1.000000e+00 : f32
    %147 = vector.broadcast %cst_67 : f32 to vector<16x64xf32>
    %148 = arith.addf %146, %147 : vector<16x64xf32>
    %cst_68 = arith.constant 5.000000e-01 : f32
    %149 = vector.broadcast %cst_68 : f32 to vector<16x64xf32>
    %150 = arith.mulf %149, %148 : vector<16x64xf32>
    %151 = arith.mulf %139, %150 : vector<16x64xf32>
    %c40_i32_69 = arith.constant 40 : i32
    %152 = arith.muli %arg1, %c40_i32_69 : i32
    %c16_i32_70 = arith.constant 16 : i32
    %153 = arith.subi %152, %c16_i32_70 : i32
    %c56_i32 = arith.constant 56 : i32
    %154 = arith.addi %153, %c56_i32 : i32
    %155 = tpu.iota {dimensions = array<i32: 0>} : vector<16x1xi32>
    %156 = vector.broadcast %154 : i32 to vector<16x1xi32>
    %157 = arith.addi %156, %155 : vector<16x1xi32>
    %c0_i32_71 = arith.constant 0 : i32
    %158 = vector.broadcast %c0_i32_71 : i32 to vector<16x1xi32>
    %159 = arith.cmpi sge, %157, %158 : vector<16x1xi32>
    %c40_i32_72 = arith.constant 40 : i32
    %160 = vector.broadcast %c40_i32_72 : i32 to vector<16x1xi32>
    %161 = arith.cmpi slt, %157, %160 : vector<16x1xi32>
    %162 = arith.andi %159, %161 : vector<16x1xi1>
    %cst_73 = arith.constant 0.000000e+00 : f32
    %163 = vector.shape_cast %162 : vector<16x1xi1> to vector<16x1xi1>
    %164 = vector.broadcast %163 : vector<16x1xi1> to vector<16x64xi1>
    %165 = vector.broadcast %cst_73 : f32 to vector<16x64xf32>
    %166 = arith.select %164, %151, %165 : vector<16x64xi1>, vector<16x64xf32>
    %c56 = arith.constant 56 : index
    %c0_74 = arith.constant 0 : index
    %167 = vector.load %arg20[%c56, %c0_74] : memref<72x64xf32, #tpu.memory_space<vmem>>, vector<16x64xf32>
    tpu.vector_store %arg20[%c56, %c0_74], %166 {strides = array<i32>} : memref<72x64xf32, #tpu.memory_space<vmem>>, vector<16x64xf32>,
    %c0_75 = arith.constant 0 : index
    %c0_76 = arith.constant 0 : index
    %168 = vector.load %arg11[%c0_75, %c0_76] : memref<31x64xf32, #tpu.memory_space<vmem>>, vector<1x64xf32>
    %c1 = arith.constant 1 : index
    %c0_77 = arith.constant 0 : index
    %169 = vector.load %arg20[%c1, %c0_77] : memref<72x64xf32, #tpu.memory_space<vmem>>, vector<40x64xf32>
    %170 = vector.broadcast %168 : vector<1x64xf32> to vector<40x64xf32>
    %171 = arith.mulf %169, %170 : vector<40x64xf32>
    %c4 = arith.constant 4 : index
    %c0_78 = arith.constant 0 : index
    %172 = vector.load %arg11[%c4, %c0_78] : memref<31x64xf32, #tpu.memory_space<vmem>>, vector<1x64xf32>
    %c5 = arith.constant 5 : index
    %c0_79 = arith.constant 0 : index
    %173 = vector.load %arg20[%c5, %c0_79] : memref<72x64xf32, #tpu.memory_space<vmem>>, vector<40x64xf32>
    %174 = vector.broadcast %172 : vector<1x64xf32> to vector<40x64xf32>
    %175 = arith.mulf %173, %174 : vector<40x64xf32>
    %176 = arith.addf %171, %175 : vector<40x64xf32>
    %c8 = arith.constant 8 : index
    %c0_80 = arith.constant 0 : index
    %177 = vector.load %arg11[%c8, %c0_80] : memref<31x64xf32, #tpu.memory_space<vmem>>, vector<1x64xf32>
    %c9 = arith.constant 9 : index
    %c0_81 = arith.constant 0 : index
    %178 = vector.load %arg20[%c9, %c0_81] : memref<72x64xf32, #tpu.memory_space<vmem>>, vector<40x64xf32>
    %179 = vector.broadcast %177 : vector<1x64xf32> to vector<40x64xf32>
    %180 = arith.mulf %178, %179 : vector<40x64xf32>
    %181 = arith.addf %176, %180 : vector<40x64xf32>
    %c12 = arith.constant 12 : index
    %c0_82 = arith.constant 0 : index
    %182 = vector.load %arg11[%c12, %c0_82] : memref<31x64xf32, #tpu.memory_space<vmem>>, vector<1x64xf32>
    %c13 = arith.constant 13 : index
    %c0_83 = arith.constant 0 : index
    %183 = vector.load %arg20[%c13, %c0_83] : memref<72x64xf32, #tpu.memory_space<vmem>>, vector<40x64xf32>
    %184 = vector.broadcast %182 : vector<1x64xf32> to vector<40x64xf32>
    %185 = arith.mulf %183, %184 : vector<40x64xf32>
    %186 = arith.addf %181, %185 : vector<40x64xf32>
    %c16_84 = arith.constant 16 : index
    %c0_85 = arith.constant 0 : index
    %187 = vector.load %arg11[%c16_84, %c0_85] : memref<31x64xf32, #tpu.memory_space<vmem>>, vector<1x64xf32>
    %c17 = arith.constant 17 : index
    %c0_86 = arith.constant 0 : index
    %188 = vector.load %arg20[%c17, %c0_86] : memref<72x64xf32, #tpu.memory_space<vmem>>, vector<40x64xf32>
    %189 = vector.broadcast %187 : vector<1x64xf32> to vector<40x64xf32>
    %190 = arith.mulf %188, %189 : vector<40x64xf32>
    %191 = arith.addf %186, %190 : vector<40x64xf32>
    %c20 = arith.constant 20 : index
    %c0_87 = arith.constant 0 : index
    %192 = vector.load %arg11[%c20, %c0_87] : memref<31x64xf32, #tpu.memory_space<vmem>>, vector<1x64xf32>
    %c21 = arith.constant 21 : index
    %c0_88 = arith.constant 0 : index
    %193 = vector.load %arg20[%c21, %c0_88] : memref<72x64xf32, #tpu.memory_space<vmem>>, vector<40x64xf32>
    %194 = vector.broadcast %192 : vector<1x64xf32> to vector<40x64xf32>
    %195 = arith.mulf %193, %194 : vector<40x64xf32>
    %196 = arith.addf %191, %195 : vector<40x64xf32>
    %c24 = arith.constant 24 : index
    %c0_89 = arith.constant 0 : index
    %197 = vector.load %arg11[%c24, %c0_89] : memref<31x64xf32, #tpu.memory_space<vmem>>, vector<1x64xf32>
    %c25 = arith.constant 25 : index
    %c0_90 = arith.constant 0 : index
    %198 = vector.load %arg20[%c25, %c0_90] : memref<72x64xf32, #tpu.memory_space<vmem>>, vector<40x64xf32>
    %199 = vector.broadcast %197 : vector<1x64xf32> to vector<40x64xf32>
    %200 = arith.mulf %198, %199 : vector<40x64xf32>
    %201 = arith.addf %196, %200 : vector<40x64xf32>
    %c28 = arith.constant 28 : index
    %c0_91 = arith.constant 0 : index
    %202 = vector.load %arg11[%c28, %c0_91] : memref<31x64xf32, #tpu.memory_space<vmem>>, vector<1x64xf32>
    %c29 = arith.constant 29 : index
    %c0_92 = arith.constant 0 : index
    %203 = vector.load %arg20[%c29, %c0_92] : memref<72x64xf32, #tpu.memory_space<vmem>>, vector<40x64xf32>
    %204 = vector.broadcast %202 : vector<1x64xf32> to vector<40x64xf32>
    %205 = arith.mulf %203, %204 : vector<40x64xf32>
    %206 = arith.addf %201, %205 : vector<40x64xf32>
    %c1_93 = arith.constant 1 : index
    %c0_94 = arith.constant 0 : index
    %207 = vector.load %arg11[%c1_93, %c0_94] : memref<31x64xf32, #tpu.memory_space<vmem>>, vector<1x64xf32>
    %c2 = arith.constant 2 : index
    %c0_95 = arith.constant 0 : index
    %208 = vector.load %arg20[%c2, %c0_95] : memref<72x64xf32, #tpu.memory_space<vmem>>, vector<40x64xf32>
    %209 = vector.broadcast %207 : vector<1x64xf32> to vector<40x64xf32>
    %210 = arith.mulf %208, %209 : vector<40x64xf32>
    %c5_96 = arith.constant 5 : index
    %c0_97 = arith.constant 0 : index
    %211 = vector.load %arg11[%c5_96, %c0_97] : memref<31x64xf32, #tpu.memory_space<vmem>>, vector<1x64xf32>
    %c6 = arith.constant 6 : index
    %c0_98 = arith.constant 0 : index
    %212 = vector.load %arg20[%c6, %c0_98] : memref<72x64xf32, #tpu.memory_space<vmem>>, vector<40x64xf32>
    %213 = vector.broadcast %211 : vector<1x64xf32> to vector<40x64xf32>
    %214 = arith.mulf %212, %213 : vector<40x64xf32>
    %215 = arith.addf %210, %214 : vector<40x64xf32>
    %c9_99 = arith.constant 9 : index
    %c0_100 = arith.constant 0 : index
    %216 = vector.load %arg11[%c9_99, %c0_100] : memref<31x64xf32, #tpu.memory_space<vmem>>, vector<1x64xf32>
    %c10 = arith.constant 10 : index
    %c0_101 = arith.constant 0 : index
    %217 = vector.load %arg20[%c10, %c0_101] : memref<72x64xf32, #tpu.memory_space<vmem>>, vector<40x64xf32>
    %218 = vector.broadcast %216 : vector<1x64xf32> to vector<40x64xf32>
    %219 = arith.mulf %217, %218 : vector<40x64xf32>
    %220 = arith.addf %215, %219 : vector<40x64xf32>
    %c13_102 = arith.constant 13 : index
    %c0_103 = arith.constant 0 : index
    %221 = vector.load %arg11[%c13_102, %c0_103] : memref<31x64xf32, #tpu.memory_space<vmem>>, vector<1x64xf32>
    %c14 = arith.constant 14 : index
    %c0_104 = arith.constant 0 : index
    %222 = vector.load %arg20[%c14, %c0_104] : memref<72x64xf32, #tpu.memory_space<vmem>>, vector<40x64xf32>
    %223 = vector.broadcast %221 : vector<1x64xf32> to vector<40x64xf32>
    %224 = arith.mulf %222, %223 : vector<40x64xf32>
    %225 = arith.addf %220, %224 : vector<40x64xf32>
    %c17_105 = arith.constant 17 : index
    %c0_106 = arith.constant 0 : index
    %226 = vector.load %arg11[%c17_105, %c0_106] : memref<31x64xf32, #tpu.memory_space<vmem>>, vector<1x64xf32>
    %c18 = arith.constant 18 : index
    %c0_107 = arith.constant 0 : index
    %227 = vector.load %arg20[%c18, %c0_107] : memref<72x64xf32, #tpu.memory_space<vmem>>, vector<40x64xf32>
    %228 = vector.broadcast %226 : vector<1x64xf32> to vector<40x64xf32>
    %229 = arith.mulf %227, %228 : vector<40x64xf32>
    %230 = arith.addf %225, %229 : vector<40x64xf32>
    %c21_108 = arith.constant 21 : index
    %c0_109 = arith.constant 0 : index
    %231 = vector.load %arg11[%c21_108, %c0_109] : memref<31x64xf32, #tpu.memory_space<vmem>>, vector<1x64xf32>
    %c22 = arith.constant 22 : index
    %c0_110 = arith.constant 0 : index
    %232 = vector.load %arg20[%c22, %c0_110] : memref<72x64xf32, #tpu.memory_space<vmem>>, vector<40x64xf32>
    %233 = vector.broadcast %231 : vector<1x64xf32> to vector<40x64xf32>
    %234 = arith.mulf %232, %233 : vector<40x64xf32>
    %235 = arith.addf %230, %234 : vector<40x64xf32>
    %c25_111 = arith.constant 25 : index
    %c0_112 = arith.constant 0 : index
    %236 = vector.load %arg11[%c25_111, %c0_112] : memref<31x64xf32, #tpu.memory_space<vmem>>, vector<1x64xf32>
    %c26 = arith.constant 26 : index
    %c0_113 = arith.constant 0 : index
    %237 = vector.load %arg20[%c26, %c0_113] : memref<72x64xf32, #tpu.memory_space<vmem>>, vector<40x64xf32>
    %238 = vector.broadcast %236 : vector<1x64xf32> to vector<40x64xf32>
    %239 = arith.mulf %237, %238 : vector<40x64xf32>
    %240 = arith.addf %235, %239 : vector<40x64xf32>
    %c29_114 = arith.constant 29 : index
    %c0_115 = arith.constant 0 : index
    %241 = vector.load %arg11[%c29_114, %c0_115] : memref<31x64xf32, #tpu.memory_space<vmem>>, vector<1x64xf32>
    %c30 = arith.constant 30 : index
    %c0_116 = arith.constant 0 : index
    %242 = vector.load %arg20[%c30, %c0_116] : memref<72x64xf32, #tpu.memory_space<vmem>>, vector<40x64xf32>
    %243 = vector.broadcast %241 : vector<1x64xf32> to vector<40x64xf32>
    %244 = arith.mulf %242, %243 : vector<40x64xf32>
    %245 = arith.addf %240, %244 : vector<40x64xf32>
    %c2_117 = arith.constant 2 : index
    %c0_118 = arith.constant 0 : index
    %246 = vector.load %arg11[%c2_117, %c0_118] : memref<31x64xf32, #tpu.memory_space<vmem>>, vector<1x64xf32>
    %c3 = arith.constant 3 : index
    %c0_119 = arith.constant 0 : index
    %247 = vector.load %arg20[%c3, %c0_119] : memref<72x64xf32, #tpu.memory_space<vmem>>, vector<40x64xf32>
    %248 = vector.broadcast %246 : vector<1x64xf32> to vector<40x64xf32>
    %249 = arith.mulf %247, %248 : vector<40x64xf32>
    %c6_120 = arith.constant 6 : index
    %c0_121 = arith.constant 0 : index
    %250 = vector.load %arg11[%c6_120, %c0_121] : memref<31x64xf32, #tpu.memory_space<vmem>>, vector<1x64xf32>
    %c7 = arith.constant 7 : index
    %c0_122 = arith.constant 0 : index
    %251 = vector.load %arg20[%c7, %c0_122] : memref<72x64xf32, #tpu.memory_space<vmem>>, vector<40x64xf32>
    %252 = vector.broadcast %250 : vector<1x64xf32> to vector<40x64xf32>
    %253 = arith.mulf %251, %252 : vector<40x64xf32>
    %254 = arith.addf %249, %253 : vector<40x64xf32>
    %c10_123 = arith.constant 10 : index
    %c0_124 = arith.constant 0 : index
    %255 = vector.load %arg11[%c10_123, %c0_124] : memref<31x64xf32, #tpu.memory_space<vmem>>, vector<1x64xf32>
    %c11 = arith.constant 11 : index
    %c0_125 = arith.constant 0 : index
    %256 = vector.load %arg20[%c11, %c0_125] : memref<72x64xf32, #tpu.memory_space<vmem>>, vector<40x64xf32>
    %257 = vector.broadcast %255 : vector<1x64xf32> to vector<40x64xf32>
    %258 = arith.mulf %256, %257 : vector<40x64xf32>
    %259 = arith.addf %254, %258 : vector<40x64xf32>
    %c14_126 = arith.constant 14 : index
    %c0_127 = arith.constant 0 : index
    %260 = vector.load %arg11[%c14_126, %c0_127] : memref<31x64xf32, #tpu.memory_space<vmem>>, vector<1x64xf32>
    %c15 = arith.constant 15 : index
    %c0_128 = arith.constant 0 : index
    %261 = vector.load %arg20[%c15, %c0_128] : memref<72x64xf32, #tpu.memory_space<vmem>>, vector<40x64xf32>
    %262 = vector.broadcast %260 : vector<1x64xf32> to vector<40x64xf32>
    %263 = arith.mulf %261, %262 : vector<40x64xf32>
    %264 = arith.addf %259, %263 : vector<40x64xf32>
    %c18_129 = arith.constant 18 : index
    %c0_130 = arith.constant 0 : index
    %265 = vector.load %arg11[%c18_129, %c0_130] : memref<31x64xf32, #tpu.memory_space<vmem>>, vector<1x64xf32>
    %c19 = arith.constant 19 : index
    %c0_131 = arith.constant 0 : index
    %266 = vector.load %arg20[%c19, %c0_131] : memref<72x64xf32, #tpu.memory_space<vmem>>, vector<40x64xf32>
    %267 = vector.broadcast %265 : vector<1x64xf32> to vector<40x64xf32>
    %268 = arith.mulf %266, %267 : vector<40x64xf32>
    %269 = arith.addf %264, %268 : vector<40x64xf32>
    %c22_132 = arith.constant 22 : index
    %c0_133 = arith.constant 0 : index
    %270 = vector.load %arg11[%c22_132, %c0_133] : memref<31x64xf32, #tpu.memory_space<vmem>>, vector<1x64xf32>
    %c23 = arith.constant 23 : index
    %c0_134 = arith.constant 0 : index
    %271 = vector.load %arg20[%c23, %c0_134] : memref<72x64xf32, #tpu.memory_space<vmem>>, vector<40x64xf32>
    %272 = vector.broadcast %270 : vector<1x64xf32> to vector<40x64xf32>
    %273 = arith.mulf %271, %272 : vector<40x64xf32>
    %274 = arith.addf %269, %273 : vector<40x64xf32>
    %c26_135 = arith.constant 26 : index
    %c0_136 = arith.constant 0 : index
    %275 = vector.load %arg11[%c26_135, %c0_136] : memref<31x64xf32, #tpu.memory_space<vmem>>, vector<1x64xf32>
    %c27 = arith.constant 27 : index
    %c0_137 = arith.constant 0 : index
    %276 = vector.load %arg20[%c27, %c0_137] : memref<72x64xf32, #tpu.memory_space<vmem>>, vector<40x64xf32>
    %277 = vector.broadcast %275 : vector<1x64xf32> to vector<40x64xf32>
    %278 = arith.mulf %276, %277 : vector<40x64xf32>
    %279 = arith.addf %274, %278 : vector<40x64xf32>
    %c30_138 = arith.constant 30 : index
    %c0_139 = arith.constant 0 : index
    %280 = vector.load %arg11[%c30_138, %c0_139] : memref<31x64xf32, #tpu.memory_space<vmem>>, vector<1x64xf32>
    %c31 = arith.constant 31 : index
    %c0_140 = arith.constant 0 : index
    %281 = vector.load %arg20[%c31, %c0_140] : memref<72x64xf32, #tpu.memory_space<vmem>>, vector<40x64xf32>
    %282 = vector.broadcast %280 : vector<1x64xf32> to vector<40x64xf32>
    %283 = arith.mulf %281, %282 : vector<40x64xf32>
    %284 = arith.addf %279, %283 : vector<40x64xf32>
    %c3_141 = arith.constant 3 : index
    %c0_142 = arith.constant 0 : index
    %285 = vector.load %arg11[%c3_141, %c0_142] : memref<31x64xf32, #tpu.memory_space<vmem>>, vector<1x64xf32>
    %c4_143 = arith.constant 4 : index
    %c0_144 = arith.constant 0 : index
    %286 = vector.load %arg20[%c4_143, %c0_144] : memref<72x64xf32, #tpu.memory_space<vmem>>, vector<40x64xf32>
    %287 = vector.broadcast %285 : vector<1x64xf32> to vector<40x64xf32>
    %288 = arith.mulf %286, %287 : vector<40x64xf32>
    %c7_145 = arith.constant 7 : index
    %c0_146 = arith.constant 0 : index
    %289 = vector.load %arg11[%c7_145, %c0_146] : memref<31x64xf32, #tpu.memory_space<vmem>>, vector<1x64xf32>
    %c8_147 = arith.constant 8 : index
    %c0_148 = arith.constant 0 : index
    %290 = vector.load %arg20[%c8_147, %c0_148] : memref<72x64xf32, #tpu.memory_space<vmem>>, vector<40x64xf32>
    %291 = vector.broadcast %289 : vector<1x64xf32> to vector<40x64xf32>
    %292 = arith.mulf %290, %291 : vector<40x64xf32>
    %293 = arith.addf %288, %292 : vector<40x64xf32>
    %c11_149 = arith.constant 11 : index
    %c0_150 = arith.constant 0 : index
    %294 = vector.load %arg11[%c11_149, %c0_150] : memref<31x64xf32, #tpu.memory_space<vmem>>, vector<1x64xf32>
    %c12_151 = arith.constant 12 : index
    %c0_152 = arith.constant 0 : index
    %295 = vector.load %arg20[%c12_151, %c0_152] : memref<72x64xf32, #tpu.memory_space<vmem>>, vector<40x64xf32>
    %296 = vector.broadcast %294 : vector<1x64xf32> to vector<40x64xf32>
    %297 = arith.mulf %295, %296 : vector<40x64xf32>
    %298 = arith.addf %293, %297 : vector<40x64xf32>
    %c15_153 = arith.constant 15 : index
    %c0_154 = arith.constant 0 : index
    %299 = vector.load %arg11[%c15_153, %c0_154] : memref<31x64xf32, #tpu.memory_space<vmem>>, vector<1x64xf32>
    %c16_155 = arith.constant 16 : index
    %c0_156 = arith.constant 0 : index
    %300 = vector.load %arg20[%c16_155, %c0_156] : memref<72x64xf32, #tpu.memory_space<vmem>>, vector<40x64xf32>
    %301 = vector.broadcast %299 : vector<1x64xf32> to vector<40x64xf32>
    %302 = arith.mulf %300, %301 : vector<40x64xf32>
    %303 = arith.addf %298, %302 : vector<40x64xf32>
    %c19_157 = arith.constant 19 : index
    %c0_158 = arith.constant 0 : index
    %304 = vector.load %arg11[%c19_157, %c0_158] : memref<31x64xf32, #tpu.memory_space<vmem>>, vector<1x64xf32>
    %c20_159 = arith.constant 20 : index
    %c0_160 = arith.constant 0 : index
    %305 = vector.load %arg20[%c20_159, %c0_160] : memref<72x64xf32, #tpu.memory_space<vmem>>, vector<40x64xf32>
    %306 = vector.broadcast %304 : vector<1x64xf32> to vector<40x64xf32>
    %307 = arith.mulf %305, %306 : vector<40x64xf32>
    %308 = arith.addf %303, %307 : vector<40x64xf32>
    %c23_161 = arith.constant 23 : index
    %c0_162 = arith.constant 0 : index
    %309 = vector.load %arg11[%c23_161, %c0_162] : memref<31x64xf32, #tpu.memory_space<vmem>>, vector<1x64xf32>
    %c24_163 = arith.constant 24 : index
    %c0_164 = arith.constant 0 : index
    %310 = vector.load %arg20[%c24_163, %c0_164] : memref<72x64xf32, #tpu.memory_space<vmem>>, vector<40x64xf32>
    %311 = vector.broadcast %309 : vector<1x64xf32> to vector<40x64xf32>
    %312 = arith.mulf %310, %311 : vector<40x64xf32>
    %313 = arith.addf %308, %312 : vector<40x64xf32>
    %c27_165 = arith.constant 27 : index
    %c0_166 = arith.constant 0 : index
    %314 = vector.load %arg11[%c27_165, %c0_166] : memref<31x64xf32, #tpu.memory_space<vmem>>, vector<1x64xf32>
    %c28_167 = arith.constant 28 : index
    %c0_168 = arith.constant 0 : index
    %315 = vector.load %arg20[%c28_167, %c0_168] : memref<72x64xf32, #tpu.memory_space<vmem>>, vector<40x64xf32>
    %316 = vector.broadcast %314 : vector<1x64xf32> to vector<40x64xf32>
    %317 = arith.mulf %315, %316 : vector<40x64xf32>
    %318 = arith.addf %313, %317 : vector<40x64xf32>
    %319 = arith.addf %206, %245 : vector<40x64xf32>
    %320 = arith.addf %284, %318 : vector<40x64xf32>
    %321 = arith.addf %319, %320 : vector<40x64xf32>
    %c0_169 = arith.constant 0 : index
    %c0_170 = arith.constant 0 : index
    %322 = vector.load %arg12[%c0_169, %c0_170] : memref<1x64xf32, #tpu.memory_space<vmem>>, vector<1x64xf32>
    %323 = vector.broadcast %322 : vector<1x64xf32> to vector<40x64xf32>
    %324 = arith.addf %321, %323 : vector<40x64xf32>
    %c0_171 = arith.constant 0 : index
    %c0_172 = arith.constant 0 : index
    %325 = vector.load %arg13[%c0_171, %c0_172] : memref<64x64xf32, #tpu.memory_space<vmem>>, vector<64x64xf32>
    %cst_173 = arith.constant dense<0.000000e+00> : vector<40x64xf32>
    %326 = tpu.matmul %324, %325, %cst_173 {dimension_numbers = #tpu.dot_dimension_numbers<[1], [0], [0], [1], [0, 0, 1, 1], [], []>} : vector<40x64xf32>, vector<64x64xf32>, vector<40x64xf32> -> vector<40x64xf32>
    %c0_174 = arith.constant 0 : index
    %c0_175 = arith.constant 0 : index
    %327 = vector.load %arg14[%c0_174, %c0_175] : memref<1x64xf32, #tpu.memory_space<vmem>>, vector<1x64xf32>
    %328 = vector.broadcast %327 : vector<1x64xf32> to vector<40x64xf32>
    %329 = arith.addf %326, %328 : vector<40x64xf32>
    %c0_176 = arith.constant 0 : index
    %c0_177 = arith.constant 0 : index
    %330 = vector.load %arg15[%c0_176, %c0_177] : memref<1x64xf32, #tpu.memory_space<vmem>>, vector<1x64xf32>
    %331 = vector.broadcast %330 : vector<1x64xf32> to vector<40x64xf32>
    %332 = arith.mulf %329, %331 : vector<40x64xf32>
    %c0_178 = arith.constant 0 : index
    %c0_179 = arith.constant 0 : index
    %333 = vector.load %arg16[%c0_178, %c0_179] : memref<1x64xf32, #tpu.memory_space<vmem>>, vector<1x64xf32>
    %334 = vector.broadcast %333 : vector<1x64xf32> to vector<40x64xf32>
    %335 = arith.addf %332, %334 : vector<40x64xf32>
    %cst_180 = arith.constant 5.000000e-01 : f32
    %336 = vector.broadcast %cst_180 : f32 to vector<40x64xf32>
    %337 = arith.mulf %336, %335 : vector<40x64xf32>
    %338 = math.tanh %337 : vector<40x64xf32>
    %cst_181 = arith.constant 1.000000e+00 : f32
    %339 = vector.broadcast %cst_181 : f32 to vector<40x64xf32>
    %340 = arith.addf %338, %339 : vector<40x64xf32>
    %cst_182 = arith.constant 5.000000e-01 : f32
    %341 = vector.broadcast %cst_182 : f32 to vector<40x64xf32>
    %342 = arith.mulf %341, %340 : vector<40x64xf32>
    %343 = arith.mulf %335, %342 : vector<40x64xf32>
    %c0_183 = arith.constant 0 : index
    %c0_184 = arith.constant 0 : index
    %344 = vector.load %arg17[%c0_183, %c0_184] : memref<64x32xf32, #tpu.memory_space<vmem>>, vector<64x32xf32>
    %cst_185 = arith.constant dense<0.000000e+00> : vector<40x32xf32>
    %345 = tpu.matmul %343, %344, %cst_185 {dimension_numbers = #tpu.dot_dimension_numbers<[1], [0], [0], [1], [0, 0, 1, 1], [], []>} : vector<40x64xf32>, vector<64x32xf32>, vector<40x32xf32> -> vector<40x32xf32>
    %c0_186 = arith.constant 0 : index
    %c0_187 = arith.constant 0 : index
    %346 = vector.load %arg18[%c0_186, %c0_187] : memref<1x32xf32, #tpu.memory_space<vmem>>, vector<1x32xf32>
    %347 = vector.broadcast %346 : vector<1x32xf32> to vector<40x32xf32>
    %348 = arith.addf %345, %347 : vector<40x32xf32>
    %c0_188 = arith.constant 0 : index
    %c0_189 = arith.constant 0 : index
    %c0_190 = arith.constant 0 : index
    %349 = vector.load %arg3[%c0_188, %c0_189, %c0_190] : memref<1x40x32xf32, #tpu.memory_space<vmem>>, vector<1x40x32xf32>
    %350 = vector.shape_cast %349 : vector<1x40x32xf32> to vector<40x32xf32>
    %351 = arith.addf %348, %350 : vector<40x32xf32>
    %c0_191 = arith.constant 0 : index
    %c0_192 = arith.constant 0 : index
    %c0_193 = arith.constant 0 : index
    %352 = vector.load %arg19[%c0_191, %c0_192, %c0_193] : memref<1x40x32xf32, #tpu.memory_space<vmem>>, vector<1x40x32xf32>
    %353 = vector.shape_cast %352 : vector<1x40x32xf32> to vector<40x32xf32>
    %354 = vector.shape_cast %351 : vector<40x32xf32> to vector<1x40x32xf32>
    tpu.vector_store %arg19[%c0_191, %c0_192, %c0_193], %354 {strides = array<i32>} : memref<1x40x32xf32, #tpu.memory_space<vmem>>, vector<1x40x32xf32>,
    return
  }
  func.func @transform_0(%arg0: i32, %arg1: i32) -> (i32, i32, i32) {
    %c1_i32 = arith.constant 1 : i32
    %0 = arith.subi %arg1, %c1_i32 : i32
    %c0_i32 = arith.constant 0 : i32
    %1 = arith.maxsi %0, %c0_i32 : i32
    %c0_i32_0 = arith.constant 0 : i32
    %c0_i32_1 = arith.constant 0 : i32
    return %arg0, %1, %c0_i32_0 : i32, i32, i32
  }
  func.func @transform_1(%arg0: i32, %arg1: i32) -> (i32, i32, i32) {
    %c0_i32 = arith.constant 0 : i32
    %c0_i32_0 = arith.constant 0 : i32
    return %arg0, %arg1, %c0_i32 : i32, i32, i32
  }
  func.func @transform_2(%arg0: i32, %arg1: i32) -> (i32, i32, i32) {
    %c1_i32 = arith.constant 1 : i32
    %0 = arith.addi %arg1, %c1_i32 : i32
    %c0_i32 = arith.constant 0 : i32
    %1 = arith.minsi %0, %c0_i32 : i32
    %c0_i32_0 = arith.constant 0 : i32
    %c0_i32_1 = arith.constant 0 : i32
    return %arg0, %1, %c0_i32_0 : i32, i32, i32
  }
  func.func @transform_3(%arg0: i32, %arg1: i32) -> (i32, i32) {
    %c0_i32 = arith.constant 0 : i32
    %c0_i32_0 = arith.constant 0 : i32
    %c0_i32_1 = arith.constant 0 : i32
    return %c0_i32, %c0_i32_0 : i32, i32
  }
  func.func @transform_4(%arg0: i32, %arg1: i32) -> (i32, i32) {
    %c0_i32 = arith.constant 0 : i32
    %c0_i32_0 = arith.constant 0 : i32
    %c0_i32_1 = arith.constant 0 : i32
    return %c0_i32, %c0_i32_0 : i32, i32
  }
  func.func @transform_5(%arg0: i32, %arg1: i32) -> (i32, i32) {
    %c0_i32 = arith.constant 0 : i32
    %c0_i32_0 = arith.constant 0 : i32
    %c0_i32_1 = arith.constant 0 : i32
    return %c0_i32, %c0_i32_0 : i32, i32
  }
  func.func @transform_6(%arg0: i32, %arg1: i32) -> (i32, i32) {
    %c0_i32 = arith.constant 0 : i32
    %c0_i32_0 = arith.constant 0 : i32
    %c0_i32_1 = arith.constant 0 : i32
    return %c0_i32, %c0_i32_0 : i32, i32
  }
  func.func @transform_7(%arg0: i32, %arg1: i32) -> (i32, i32) {
    %c0_i32 = arith.constant 0 : i32
    %c0_i32_0 = arith.constant 0 : i32
    %c0_i32_1 = arith.constant 0 : i32
    return %c0_i32, %c0_i32_0 : i32, i32
  }
  func.func @transform_8(%arg0: i32, %arg1: i32) -> (i32, i32) {
    %c0_i32 = arith.constant 0 : i32
    %c0_i32_0 = arith.constant 0 : i32
    %c0_i32_1 = arith.constant 0 : i32
    return %c0_i32, %c0_i32_0 : i32, i32
  }
  func.func @transform_9(%arg0: i32, %arg1: i32) -> (i32, i32) {
    %c0_i32 = arith.constant 0 : i32
    %c0_i32_0 = arith.constant 0 : i32
    %c0_i32_1 = arith.constant 0 : i32
    return %c0_i32, %c0_i32_0 : i32, i32
  }
  func.func @transform_10(%arg0: i32, %arg1: i32) -> (i32, i32) {
    %c0_i32 = arith.constant 0 : i32
    %c0_i32_0 = arith.constant 0 : i32
    %c0_i32_1 = arith.constant 0 : i32
    return %c0_i32, %c0_i32_0 : i32, i32
  }
  func.func @transform_11(%arg0: i32, %arg1: i32) -> (i32, i32) {
    %c0_i32 = arith.constant 0 : i32
    %c0_i32_0 = arith.constant 0 : i32
    %c0_i32_1 = arith.constant 0 : i32
    return %c0_i32, %c0_i32_0 : i32, i32
  }
  func.func @transform_12(%arg0: i32, %arg1: i32) -> (i32, i32) {
    %c0_i32 = arith.constant 0 : i32
    %c0_i32_0 = arith.constant 0 : i32
    %c0_i32_1 = arith.constant 0 : i32
    return %c0_i32, %c0_i32_0 : i32, i32
  }
  func.func @transform_13(%arg0: i32, %arg1: i32) -> (i32, i32) {
    %c0_i32 = arith.constant 0 : i32
    %c0_i32_0 = arith.constant 0 : i32
    %c0_i32_1 = arith.constant 0 : i32
    return %c0_i32, %c0_i32_0 : i32, i32
  }
  func.func @transform_14(%arg0: i32, %arg1: i32) -> (i32, i32) {
    %c0_i32 = arith.constant 0 : i32
    %c0_i32_0 = arith.constant 0 : i32
    %c0_i32_1 = arith.constant 0 : i32
    return %c0_i32, %c0_i32_0 : i32, i32
  }
  func.func @transform_15(%arg0: i32, %arg1: i32) -> (i32, i32) {
    %c0_i32 = arith.constant 0 : i32
    %c0_i32_0 = arith.constant 0 : i32
    %c0_i32_1 = arith.constant 0 : i32
    return %c0_i32, %c0_i32_0 : i32, i32
  }
  func.func @transform_16(%arg0: i32, %arg1: i32) -> (i32, i32) {
    %c0_i32 = arith.constant 0 : i32
    %c0_i32_0 = arith.constant 0 : i32
    %c0_i32_1 = arith.constant 0 : i32
    return %c0_i32, %c0_i32_0 : i32, i32
  }
  func.func @transform_17(%arg0: i32, %arg1: i32) -> (i32, i32, i32) {
    %c0_i32 = arith.constant 0 : i32
    %c0_i32_0 = arith.constant 0 : i32
    return %arg0, %arg1, %c0_i32 : i32, i32, i32
  }
}

</mosaic_0001>

<bundles_post_ra>
// kernel: tpu_custom_call.1
= control target key start
LH: loop header
LB: loop body
LE: loop exit
PB: predicated region body
PF: predicated region fallthrough
CT: control target
= control target key end

     0   :  { %s3049_s24 = smov 0   ;;  %s3051_s25 = smov 0   ;;  %s4027_s0 = inlined_call_operand.vmem [shape: f32[2,40,32], index: 0, kind: input, shape index: {}]   ;;  %s4028_s1 = inlined_call_operand.vmem [shape: f32[2,40,32], index: 1, kind: input, shape index: {}]   ;;  %s4029_s2 = inlined_call_operand.vmem [shape: f32[2,40,32], index: 2, kind: input, shape index: {}]   ;;  %s4030_s3 = inlined_call_operand.vmem [shape: f32[1,32], index: 3, kind: input, shape index: {}]   ;;  %s4031_s4 = inlined_call_operand.vmem [shape: f32[1,32], index: 4, kind: input, shape index: {}]   ;;  %s4032_s5 = inlined_call_operand.vmem [shape: f32[32,64], index: 5, kind: input, shape index: {}]   ;;  %s4033_s6 = inlined_call_operand.vmem [shape: f32[1,64], index: 6, kind: input, shape index: {}]   ;;  %s4034_s7 = inlined_call_operand.vmem [shape: f32[32,64], index: 7, kind: input, shape index: {}]   ;;  %s4035_s8 = inlined_call_operand.vmem [shape: f32[1,64], index: 8, kind: input, shape index: {}]   ;;  %s4036_s9 = inlined_call_operand.vmem [shape: f32[31,64], index: 9, kind: input, shape index: {}]   ;;  %s4037_s10 = inlined_call_operand.vmem [shape: f32[1,64], index: 10, kind: input, shape index: {}]   ;;  %s4038_s11 = inlined_call_operand.vmem [shape: f32[64,64], index: 11, kind: input, shape index: {}]   ;;  %s4039_s12 = inlined_call_operand.vmem [shape: f32[1,64], index: 12, kind: input, shape index: {}]   ;;  %s4040_s13 = inlined_call_operand.vmem [shape: f32[1,64], index: 13, kind: input, shape index: {}]   ;;  %s4041_s14 = inlined_call_operand.vmem [shape: f32[1,64], index: 14, kind: input, shape index: {}]   ;;  %s4042_s15 = inlined_call_operand.vmem [shape: f32[64,32], index: 15, kind: input, shape index: {}]   ;;  %s4043_s16 = inlined_call_operand.vmem [shape: f32[1,32], index: 16, kind: input, shape index: {}]   ;;  %s4044_s17 = inlined_call_operand.vmem [shape: f32[2,40,32], index: 17, kind: output, shape index: {}]  }
   0x1   :  { %4097 = sst [smem:[#allocation41_spill]] %s4027_s0  ;;  %s3053_s26 = smov 0  }
   0x2   :  { %4098 = sst [smem:[#allocation42_spill]] %s4028_s1 }
   0x3 LB: > { %s39_s27 = sadd.s32 1, %s2950_s25  ;;  %p2503_p0 = scmp.ge.s32.totalorder %s2954_s26, 1  ;;  %s2954_s26 = sphi %s3053_s26, %s27_s26   ;;  %s2950_s25 = sphi %s3051_s25, %s4211_s25   ;;  %s2946_s24 = sphi %s3049_s24, %s4210_s24  }
   0x4   : > { %p41_p1 = scmp.ge.s32.totalorder %s39_s27, 2  ;;  %p566_p2 = scmp.lt.s32.totalorder %s2954_s26, 3 }
   0x6   : > { %s4213_s27 = smov (%p41_p1, %s39_s27), 0  ;;  %p567_p3 = pnand %p2503_p0, %p566_p2 }
   0x8   : > { %570 = sbr.rel (%p567_p3) target bundleno = 1131 (0x46b), region = 88 }
   0xf   : > { %p654_p4 = scmp.lt.s32.totalorder %s2946_s24, 1  ;;  %vm708_vm0 = vcmask 261120   ;;  %s4099_s30 = sld [smem:[#allocation41_spill]]  ;;  %v752_v53 = vld [vmem:[%s4032_s5] sm:$0xff]  ;;  %v753_v54 = vld [vmem:[%s4032_s5 + $0x8] sm:$0xff]  ;;  %v754_v59 = vld [vmem:[%s4032_s5 + $0x10] sm:$0xff] }
  0x10   : > { %s4100_s20 = sld [smem:[#allocation42_spill]]  ;;  %v843_v55 = vld [vmem:[%s4034_s7] sm:$0xff]  ;;  %v3144_v56 = vpack.c.bf16 %v753_v54, %v752_v53  ;;  %v844_v57 = vld [vmem:[%s4034_s7 + $0x8] sm:$0xff]  ;;  %v755_v60 = vld [vmem:[%s4032_s5 + $0x18] sm:$0xff]  ;;  %vm2957_vm1 = vmmov 0   ;;  %v4047_v53 = vmov 0.0  }
  0x11   : > { %s4215_s24 = smov (!%p654_p4, %s2946_s24), 1  ;;  %v3149_v58 = vpack.c.bf16 %v844_v57, %v843_v55  ;;  %v845_v61 = vld [vmem:[%s4034_s7 + $0x10] sm:$0xff]  ;;  %v3164_v62 = vpack.c.bf16 %v755_v60, %v754_v59  ;;  %v846_v63 = vld [vmem:[%s4034_s7 + $0x18] sm:$0xff]  ;;  %vm958_vm2 = vcmask 523264  }
  0x12   : > { %s3067_s28 = smul.u32 40, %s4215_s24  ;;  %2799 = vmatprep.subr.bf16.mxu0 %v3144_v56  ;;  %959 = vst.msk [vmem:[#allocation2] sm:$0xff] %vm958_vm2, %v4047_v53  ;;  %960 = vst.msk [vmem:[#allocation2 + $0x8] sm:$0xff] %vm958_vm2, %v4047_v53 }
  0x13   : > { %2807 = vmatprep.subr.bf16.mxu1 %v3149_v58  ;;  %2801 = vmatpush3.bf16.msra.mxu0 %v3144_v56  ;;  %1535 = vst.msk [vmem:[#allocation2 + $0x38] sm:$0xff] %vm958_vm2, %v4047_v53  ;;  %1536 = vst.msk [vmem:[#allocation2 + $0x40] sm:$0xff] %vm958_vm2, %v4047_v53 }
  0x14   : > { %s687_s24 = scalar_lea.vmem %s4029_s2, %s3067_s28  ;;  %2809 = vmatpush3.bf16.msra.mxu1 %v3149_v58  ;;  %2803 = vmatprep.subr.bf16.mxu0 %v3164_v62  ;;  %s700_s29 = scalar_lea.vmem %s4044_s17, %s3067_s28 }
  0x15   : > { %s661_s18 = scalar_lea.vmem %s4099_s30, %s3067_s28  ;;  %v3129_v48 = vld [vmem:[%s687_s24] sm:$0xff]  ;;  %v1314_v49 = vld [vmem:[%s687_s24 + $0x8] sm:$0xff] }
  0x16   : > { %s3077_s21 = scalar_lea.vmem %s4100_s20, %s3067_s28  ;;  %v706_v0 = vld [vmem:[%s661_s18 + $0x18] sm:$0xff]  ;;  %v707_v2 = vld [vmem:[%s661_s18 + $0x20] sm:$0xff]  ;;  %v1315_v51 = vsel %vm708_vm0, %v3129_v48, 0.0  ;;  %v1318_v52 = vsel %vm708_vm0, %v1314_v49, 0.0 }
  0x17   : > { %v961_v1 = vld [vmem:[%s3077_s21] sm:$0xff]  ;;  %v709_v3 = vsel %vm708_vm0, %v706_v0, 0.0  ;;  %v962_v5 = vld [vmem:[%s3077_s21 + $0x8] sm:$0xff]  ;;  %v712_v6 = vsel %vm708_vm0, %v707_v2, 0.0  ;;  %v963_v8 = vld [vmem:[%s3077_s21 + $0x10] sm:$0xff]  ;;  %2805 = vmatpush3.bf16.msra.mxu0 %v3164_v62 }
  0x18   : > { %v966_v4 = vsel %vm708_vm0, %v961_v1, 0.0  ;;  %710 = vadd.xlane.f32.xlu0 %v709_v3  ;;  %v969_v7 = vsel %vm708_vm0, %v962_v5, 0.0  ;;  %v964_v9 = vld [vmem:[%s3077_s21 + $0x18] sm:$0xff]  ;;  %v972_v10 = vsel %vm708_vm0, %v963_v8, 0.0  ;;  %v965_v12 = vld [vmem:[%s3077_s21 + $0x20] sm:$0xff] }
  0x19   : > { %967 = vadd.xlane.f32.xlu1 %v966_v4  ;;  %v975_v11 = vsel %vm708_vm0, %v964_v9, 0.0  ;;  %v978_v13 = vsel %vm708_vm0, %v965_v12, 0.0 }
  0x1c   : > { %713 = vadd.xlane.f32.xlu0 %v712_v6 }
  0x1d   : > { %970 = vadd.xlane.f32.xlu1 %v969_v7 }
  0x20   : > { %973 = vadd.xlane.f32.xlu0 %v972_v10 }
  0x21   : > { %976 = vadd.xlane.f32.xlu1 %v975_v11 }
  0x24   : > { %979 = vadd.xlane.f32.xlu0 %v978_v13 }
  0xa5   : > { %v711_v14 = vpop.xlane.xlu0 %710 }
  0xa6   : > { %v968_v15 = vpop.xlane.xlu1 %967  ;;  %v716_v16 = vmul.f32 0.03125, %v711_v14 }
  0xa7   : > { %v981_v17 = vmul.f32 0.03125, %v968_v15 }
  0xa8   : > { %v3091_v18 = vsub.f32 %v706_v0, %v716_v16  ;;  %v3169_v0 = vpack.c.bf16 %v846_v63, %v845_v61 }
  0xa9   : > { %v3093_v19 = vsub.f32 %v961_v1, %v981_v17  ;;  %v714_v20 = vpop.xlane.xlu0 %713  ;;  %v4045_v1 = vmov 0.0|0.0  }
  0xaa   : > { %v971_v21 = vpop.xlane.xlu1 %970  ;;  %v717_v22 = vmul.f32 0.03125, %v714_v20  ;;  %v720_v24 = vmul.f32 %v3091_v18, %v3091_v18  ;;  %2811 = vmatprep.subr.bf16.mxu1 %v3169_v0  ;;  %2814 = vmatprep.subr.bf16.mxu0 %v4045_v1 }
  0xab   : > { %v982_v23 = vmul.f32 0.03125, %v971_v21  ;;  %v991_v25 = vmul.f32 %v3093_v19, %v3093_v19  ;;  %2813 = vmatpush3.bf16.msra.mxu1 %v3169_v0  ;;  %v3180_v21 = vld [vmem:[%s4030_s3] ss:$0 sm:$0xff] }
  0xac   : > { %v3099_v26 = vsub.f32 %v707_v2, %v717_v22  ;;  %v722_v28 = vsel %vm708_vm0, %v720_v24, 0.0  ;;  %2820 = vmatprep.subr.bf16.mxu1 %v4045_v1 }
  0xad   : > { %v3101_v27 = vsub.f32 %v962_v5, %v982_v23  ;;  %723 = vadd.xlane.f32.xlu1 %v722_v28  ;;  %v974_v29 = vpop.xlane.xlu0 %973  ;;  %v996_v31 = vsel %vm708_vm0, %v991_v25, 0.0 }
  0xae   : > { %v977_v30 = vpop.xlane.xlu1 %976  ;;  %v983_v32 = vmul.f32 0.03125, %v974_v29  ;;  %v721_v34 = vmul.f32 %v3099_v26, %v3099_v26 }
  0xaf   : > { %v984_v33 = vmul.f32 0.03125, %v977_v30  ;;  %v992_v35 = vmul.f32 %v3101_v27, %v3101_v27 }
  0xb0   : > { %v3109_v36 = vsub.f32 %v963_v8, %v983_v32  ;;  %v725_v38 = vsel %vm708_vm0, %v721_v34, 0.0 }
  0xb1   : > { %v3111_v37 = vsub.f32 %v964_v9, %v984_v33  ;;  %997 = vadd.xlane.f32.xlu1 %v996_v31  ;;  %726 = vadd.xlane.f32.xlu0 %v725_v38  ;;  %v980_v39 = vpop.xlane.xlu0 %979  ;;  %v999_v41 = vsel %vm708_vm0, %v992_v35, 0.0  ;;  %v3186_v31 = vld [vmem:[%s4031_s4] ss:$0 sm:$0xff] }
  0xb2   : > { %v985_v40 = vmul.f32 0.03125, %v980_v39  ;;  %v993_v42 = vmul.f32 %v3109_v36, %v3109_v36 }
  0xb3   : > { %v994_v43 = vmul.f32 %v3111_v37, %v3111_v37 }
  0xb4   : > { %v3119_v44 = vsub.f32 %v965_v12, %v985_v40  ;;  %v1002_v45 = vsel %vm708_vm0, %v993_v42, 0.0 }
  0xb5   : > { %1000 = vadd.xlane.f32.xlu0 %v999_v41  ;;  %1003 = vadd.xlane.f32.xlu1 %v1002_v45  ;;  %v1005_v46 = vsel %vm708_vm0, %v994_v43, 0.0 }
  0xb6   : > { %v995_v47 = vmul.f32 %v3119_v44, %v3119_v44 }
  0xb8   : > { %v1008_v50 = vsel %vm708_vm0, %v995_v47, 0.0 }
  0xb9   : > { %1006 = vadd.xlane.f32.xlu0 %v1005_v46  ;;  %1009 = vadd.xlane.f32.xlu1 %v1008_v50 }
  0xbd   : > { %1316 = vadd.xlane.f32.xlu0 %v1315_v51  ;;  %1319 = vadd.xlane.f32.xlu1 %v1318_v52 }
 0x13a   : > { %v724_v2 = vpop.xlane.xlu1 %723 }
 0x13b   : > { %v728_v3 = vmul.f32 0.03125, %v724_v2 }
 0x13d   : > { %v730_v4 = vadd.f32 1e-05, %v728_v3 }
 0x13e   : > { %v998_v5 = vpop.xlane.xlu1 %997  ;;  %v727_v6 = vpop.xlane.xlu0 %726 }
 0x13f   : > { %2894 = vrsqrt.f32 %v730_v4  ;;  %v1011_v7 = vmul.f32 0.03125, %v998_v5  ;;  %v729_v8 = vmul.f32 0.03125, %v727_v6 }
 0x141   : > { %v731_v9 = vadd.f32 1e-05, %v729_v8  ;;  %v1016_v10 = vadd.f32 1e-05, %v1011_v7 }
 0x142   : > { %v1004_v11 = vpop.xlane.xlu1 %1003  ;;  %v1001_v12 = vpop.xlane.xlu0 %1000 }
 0x143   : > { %v1012_v13 = vmul.f32 0.03125, %v1001_v12  ;;  %2896 = vrsqrt.f32 %v731_v9  ;;  %v1013_v14 = vmul.f32 0.03125, %v1004_v11  ;;  %v2072_v12 = vld [vmem:[%s4038_s11] sm:$0xff] }
 0x144   : > { %2898 = vrsqrt.f32 %v1016_v10 }
 0x145   : > { %v1017_v15 = vadd.f32 1e-05, %v1012_v13  ;;  %v1018_v22 = vadd.f32 1e-05, %v1013_v14  ;;  %v2073_v13 = vld [vmem:[%s4038_s11 + $0x8] sm:$0xff] }
 0x146   : > { %v1010_v16 = vpop.xlane.xlu1 %1009  ;;  %v1007_v17 = vpop.xlane.xlu0 %1006 }
 0x147   : > { %2900 = vrsqrt.f32 %v1017_v15  ;;  %v1014_v23 = vmul.f32 0.03125, %v1007_v17  ;;  %v1015_v38 = vmul.f32 0.03125, %v1010_v16  ;;  %v2843_v17 = vpack.c.bf16 %v2073_v13, %v2072_v12  ;;  %v3351_v12 = vld [vmem:[%s4036_s9 + $0x5] ss:$0 sm:$0xff] }
 0x148   : > { %2902 = vrsqrt.f32 %v1018_v22  ;;  %v2075_v22 = vld [vmem:[%s4038_s11 + $0x18] sm:$0xff] }
 0x149   : > { %v2895_v20 = vpop.eup %2894  ;;  %v1019_v39 = vadd.f32 1e-05, %v1014_v23  ;;  %v2076_v23 = vld [vmem:[%s4038_s11 + $0x20] sm:$0xff] }
 0x14a   : > { %v1320_v24 = vpop.xlane.xlu1 %1319  ;;  %v1317_v25 = vpop.xlane.xlu0 %1316  ;;  %v734_v28 = vmul.f32 %v2895_v20, %v3091_v18  ;;  %v2074_v20 = vld [vmem:[%s4038_s11 + $0x10] sm:$0xff] }
 0x14b   : > { %v1322_v29 = vmul.f32 0.03125, %v1320_v24  ;;  %v1321_v30 = vmul.f32 0.03125, %v1317_v25  ;;  %2904 = vrsqrt.f32 %v1019_v39  ;;  %v2077_v24 = vld [vmem:[%s4038_s11 + $0x28] sm:$0xff] }
 0x14c   : > { %v742_v32 = vmul.f32 %v3180_v21, %v734_v28  ;;  %v2849_v25 = vpack.c.bf16 %v2077_v24, %v2076_v23  ;;  %v2078_v28 = vld [vmem:[%s4038_s11 + $0x30] sm:$0xff] }
 0x14d   : > { %v3189_v33 = vsub.f32 %v1314_v49, %v1322_v29  ;;  %v3192_v34 = vsub.f32 %v3129_v48, %v1321_v30  ;;  %v2897_v35 = vpop.eup %2896  ;;  %v1020_v48 = vadd.f32 1e-05, %v1015_v38  ;;  %v2079_v29 = vld [vmem:[%s4038_s11 + $0x38] sm:$0xff] }
 0x14e   : > { %v750_v18 = vadd.f32 %v3186_v31, %v742_v32  ;;  %v735_v42 = vmul.f32 %v2897_v35, %v3099_v26  ;;  %v2899_v43 = vpop.eup %2898  ;;  %v2852_v30 = vpack.c.bf16 %v2079_v29, %v2078_v28  ;;  %v2513_v35 = vld [vmem:[%s4035_s8] ss:$0 sm:$0xff]  ;;  %v3373_v28 = vld [vmem:[%s4036_s9 + $0x7] ss:$0 sm:$0xff]  ;;  %v1946_v29 = vld [vmem:[#allocation2 + $0x8] sm:$0xff] }
 0x14f   : > { %v1326_v40 = vmul.f32 %v3189_v33, %v3189_v33  ;;  %v1325_v41 = vmul.f32 %v3192_v34, %v3192_v34  ;;  %v1026_v49 = vmul.f32 %v2899_v43, %v3093_v19  ;;  %2906 = vrsqrt.f32 %v1020_v48  ;;  %4103 = vst [vmem:[#allocation5_spill] sm:$0xff] %v3373_v28 }
 0x150   : > { %2654 = vmatprep.mubr.msk.f32.mxu0 %vm708_vm0, %v750_v18  ;;  %2665 = vmatprep.mubr.msk.f32.mxu1 %vm708_vm0, %v750_v18  ;;  %v743_v47 = vmul.f32 %v3180_v21, %v735_v42 }
 0x151   : > { %v1330_v45 = vsel %vm708_vm0, %v1326_v40, 0.0  ;;  %v1327_v46 = vsel %vm708_vm0, %v1325_v41, 0.0  ;;  %v2901_v26 = vpop.eup %2900  ;;  %v1031_v51 = vmul.f32 %v3180_v21, %v1026_v49 }
 0x152   : > { %1331 = vadd.xlane.f32.xlu1 %v1330_v45  ;;  %1328 = vadd.xlane.f32.xlu0 %v1327_v46  ;;  %v751_v50 = vadd.f32 %v3186_v31, %v743_v47  ;;  %v1027_v19 = vmul.f32 %v2901_v26, %v3101_v27  ;;  %v2903_v52 = vpop.eup %2902 }
 0x153   : > { %v1036_v54 = vadd.f32 %v3186_v31, %v1031_v51  ;;  %v1028_v57 = vmul.f32 %v2903_v52, %v3109_v36 }
 0x154   : > { %2655 = vmatmul.mubr.msk.f32.vlgmr.msra.gmra.mrb[0].mxu0 %vm708_vm0, %v751_v50  ;;  %2666 = vmatmul.mubr.msk.f32.vlgmr.msra.gmra.mrb[0].mxu1 %vm708_vm0, %v751_v50  ;;  %v1032_v55 = vmul.f32 %v3180_v21, %v1027_v19 }
 0x155   : > { %2816 = vmatpush3.bf16.msra.mxu0 %v3144_v56  ;;  %2822 = vmatpush3.bf16.msra.mxu1 %v3149_v58  ;;  %v2905_v27 = vpop.eup %2904  ;;  %v1033_v60 = vmul.f32 %v3180_v21, %v1028_v57 }
 0x156   : > { %2817 = vmatprep.subr.bf16.mxu0 %v4045_v1  ;;  %2823 = vmatprep.subr.bf16.mxu1 %v4045_v1  ;;  %v1037_v59 = vadd.f32 %v3186_v31, %v1032_v55  ;;  %v1029_v36 = vmul.f32 %v2905_v27, %v3111_v37 }
 0x157   : > { %2676 = vmatprep.mubr.msk.f32.mxu0 %vm2957_vm1, %v4047_v53  ;;  %2699 = vmatprep.mubr.msk.f32.mxu1 %vm2957_vm1, %v4047_v53  ;;  %v1038_v37 = vadd.f32 %v3186_v31, %v1033_v60 }
 0x159   : > { %2819 = vmatpush3.bf16.msra.mxu0 %v3164_v62  ;;  %2825 = vmatpush3.bf16.msra.mxu1 %v3169_v0  ;;  %v2907_v61 = vpop.eup %2906 }
 0x15a   : > { %2827 = vmatprep.subr.bf16.mxu0 %v3144_v56  ;;  %2835 = vmatprep.subr.bf16.mxu1 %v3149_v58 }
 0x15c   : > { %2677 = vmatmul.mubr.msk.f32.vlgmr.msra.gmra.mrb[2].mxu0 %vm708_vm0, %v1036_v54  ;;  %2700 = vmatmul.mubr.msk.f32.vlgmr.msra.gmra.mrb[2].mxu1 %vm708_vm0, %v1036_v54 }
 0x15d   : > { %2679 = vmatprep.mubr.msk.f32.mxu0 %vm2957_vm1, %v4047_v53  ;;  %2702 = vmatprep.mubr.msk.f32.mxu1 %vm2957_vm1, %v4047_v53 }
 0x15e   : > { %2829 = vmatpush3.bf16.msra.mxu0 %v3144_v56  ;;  %2837 = vmatpush3.bf16.msra.mxu1 %v3149_v58  ;;  %v1034_v56 = vmul.f32 %v3180_v21, %v1029_v36  ;;  %v1030_v58 = vmul.f32 %v2907_v61, %v3119_v44  ;;  %v3328_v61 = vld [vmem:[%s4033_s6] ss:$0 sm:$0xff] }
 0x15f   : > { %2831 = vmatprep.subr.bf16.mxu0 %v3164_v62  ;;  %2839 = vmatprep.subr.bf16.mxu1 %v3169_v0 }
 0x160   : > { %2680 = vmatmul.mubr.msk.f32.gmra.mrb[4].mxu0 %vm708_vm0, %v1037_v59  ;;  %2703 = vmatmul.mubr.msk.f32.gmra.mrb[4].mxu1 %vm708_vm0, %v1037_v59  ;;  %v1039_v44 = vadd.f32 %v3186_v31, %v1034_v56 }
 0x161   : > { %2682 = vmatprep.mubr.msk.f32.mxu0 %vm2957_vm1, %v4047_v53  ;;  %2705 = vmatprep.mubr.msk.f32.mxu1 %vm2957_vm1, %v4047_v53 }
 0x162   : > { %2833 = vmatpush3.bf16.msra.mxu0 %v3164_v62  ;;  %2841 = vmatpush3.bf16.msra.mxu1 %v3169_v0  ;;  %v1035_v62 = vmul.f32 %v3180_v21, %v1030_v58 }
 0x163   : > { %2842 = vmatprep.subr.bf16.mxu0 %v4045_v1  ;;  %2854 = vmatprep.subr.bf16.mxu1 %v4045_v1 }
 0x164   : > { %2683 = vmatmul.mubr.msk.f32.gmra.mrb[6].mxu0 %vm708_vm0, %v1038_v37  ;;  %2706 = vmatmul.mubr.msk.f32.gmra.mrb[6].mxu1 %vm708_vm0, %v1038_v37  ;;  %v1040_v63 = vadd.f32 %v3186_v31, %v1035_v62 }
 0x165   : > { %2685 = vmatprep.mubr.msk.f32.mxu0 %vm2957_vm1, %v4047_v53  ;;  %2708 = vmatprep.mubr.msk.f32.mxu1 %vm2957_vm1, %v4047_v53 }
 0x168   : > { %2686 = vmatmul.mubr.msk.f32.gmra.mrb[8].mxu0 %vm708_vm0, %v1039_v44  ;;  %2709 = vmatmul.mubr.msk.f32.gmra.mrb[8].mxu1 %vm708_vm0, %v1039_v44 }
 0x169   : > { %2688 = vmatprep.mubr.msk.f32.mxu0 %vm2957_vm1, %v4047_v53  ;;  %2711 = vmatprep.mubr.msk.f32.mxu1 %vm2957_vm1, %v4047_v53 }
 0x16c   : > { %2689 = vmatmul.mubr.msk.f32.gmra.mrb[10].mxu0 %vm708_vm0, %v1040_v63  ;;  %2712 = vmatmul.mubr.msk.f32.gmra.mrb[10].mxu1 %vm708_vm0, %v1040_v63 }
 0x1df   : > { %v1332_v0 = vpop.xlane.xlu1 %1331  ;;  %v1329_v2 = vpop.xlane.xlu0 %1328 }
 0x1e0   : > { %v1334_v3 = vmul.f32 0.03125, %v1332_v0  ;;  %v1333_v4 = vmul.f32 0.03125, %v1329_v2 }
 0x1e2   : > { %v1336_v5 = vadd.f32 1e-05, %v1334_v3  ;;  %v1335_v6 = vadd.f32 1e-05, %v1333_v4  ;;  %v3336_v4 = vld [vmem:[%s4036_s9] ss:$0 sm:$0xff] }
 0x1e3   : > { %4101 = vst [vmem:[#allocation3_spill] sm:$0xff] %v3336_v4 }
 0x1e4   : > { %2908 = vrsqrt.f32 %v1336_v5  ;;  %v1538_v5 = vld [vmem:[#allocation2 + $0x1] sm:$0xff] }
 0x1e5   : > { %2910 = vrsqrt.f32 %v1335_v6  ;;  %v3341_v6 = vld [vmem:[%s4036_s9 + $0x4] ss:$0 sm:$0xff] }
 0x1ee   : > { %v2909_v7 = vpop.eup %2908 }
 0x1ef   : > { %v2911_v8 = vpop.eup %2910  ;;  %v1340_v9 = vmul.f32 %v2909_v7, %v3189_v33  ;;  %v1553_v7 = vld [vmem:[#allocation2 + $0x5] sm:$0xff] }
 0x1f0   : > { %v1339_v10 = vmul.f32 %v2911_v8, %v3192_v34 }
 0x1f1   : > { %v1342_v11 = vmul.f32 %v3180_v21, %v1340_v9 }
 0x1f2   : > { %v1341_v14 = vmul.f32 %v3180_v21, %v1339_v10  ;;  %v2846_v21 = vpack.c.bf16 %v2075_v22, %v2074_v20  ;;  %v3346_v10 = vld [vmem:[%s4036_s9 + $0x1] ss:$0 sm:$0xff]  ;;  %v3361_v20 = vld [vmem:[%s4036_s9 + $0x6] ss:$0 sm:$0xff]  ;;  %v1815_v22 = vld [vmem:[#allocation2 + $0x7] sm:$0xff] }
 0x1f3   : > { %v1344_v15 = vadd.f32 %v3186_v31, %v1342_v11  ;;  %v1669_v11 = vld [vmem:[#allocation2 + $0x2] sm:$0xff] }
 0x1f4   : > { %v1343_v16 = vadd.f32 %v3186_v31, %v1341_v14 }
 0x1f6   : > { %2722 = vmatprep.mubr.msk.f32.mxu0 %vm708_vm0, %v1343_v16  ;;  %2733 = vmatprep.mubr.msk.f32.mxu1 %vm708_vm0, %v1343_v16  ;;  %v3356_v16 = vld [vmem:[%s4036_s9 + $0x2] ss:$0 sm:$0xff] }
 0x1f7   : > { %2723 = vmatmul.mubr.msk.f32.vlgmr.msra.gmra.mrb[12].mxu0 %vm708_vm0, %v1344_v15  ;;  %2734 = vmatmul.mubr.msk.f32.vlgmr.msra.gmra.mrb[12].mxu1 %vm708_vm0, %v1344_v15  ;;  %v1684_v15 = vld [vmem:[#allocation2 + $0x6] sm:$0xff] }
 0x1f8   : > { %2844 = vmatpush3.bf16.msra.mxu0 %v2843_v17  ;;  %2752 = vmatprep.mubr.msk.f32.mxu0 %vm2957_vm1, %v4047_v53  ;;  %v1800_v17 = vld [vmem:[#allocation2 + $0x3] sm:$0xff] }
 0x1f9   : > { %2845 = vmatprep.subr.bf16.mxu0 %v4045_v1  ;;  %2783 = vmatprep.mubr.msk.f32.mxu1 %vm2957_vm1, %v4047_v53 }
 0x1fc   : > { %2847 = vmatpush3.bf16.msra.mxu0 %v2846_v21  ;;  %v3366_v21 = vld [vmem:[%s4036_s9 + $0x3] ss:$0 sm:$0xff] }
 0x1fd   : > { %2848 = vmatprep.subr.bf16.mxu0 %v4045_v1  ;;  %4102 = vst [vmem:[#allocation4_spill] sm:$0xff] %v3366_v21 }
 0x200   : > { %2850 = vmatpush3.bf16.msra.mxu0 %v2849_v25  ;;  %v1931_v25 = vld [vmem:[#allocation2 + $0x4] sm:$0xff] }
 0x201   : > { %2851 = vmatprep.subr.bf16.mxu0 %v4045_v1 }
 0x204   : > { %2853 = vmatpush3.bf16.msra.mxu0 %v2852_v30 }
 0x227   : > { %v2656_v31 = vpop.f32.mrb[0].mxu0  ;;  %v2667_v32 = vpop.f32.mrb[0].mxu1 }
 0x228   : > { %v834_v33 = vpop.f32.mrb[1].mxu0  ;;  %v919_v34 = vpop.f32.mrb[1].mxu1  ;;  %v1547_v31 = vmul.f32 %v3336_v4, %v1538_v5  ;;  %v1562_v32 = vmul.f32 %v3341_v6, %v1553_v7 }
 0x229   : > { %v1678_v33 = vmul.f32 %v3346_v10, %v1669_v11  ;;  %v1693_v34 = vmul.f32 %v3351_v12, %v1684_v15 }
 0x22f   : > { %v1126_v38 = vpop.f32.mrb[2].mxu0  ;;  %v1220_v39 = vpop.f32.mrb[2].mxu1 }
 0x230   : > { %v1221_v18 = vadd.f32 %v2513_v35, %v1220_v39  ;;  %v2678_v40 = vpop.f32.mrb[3].mxu0  ;;  %v2701_v41 = vpop.f32.mrb[3].mxu1  ;;  %v1127_v2 = vadd.f32 %v3328_v61, %v1126_v38  ;;  %v1809_v39 = vmul.f32 %v3356_v16, %v1800_v17  ;;  %v3465_v17 = vld [vmem:[%s4036_s9 + $0x11] ss:$0 sm:$0xff] }
 0x231   : > { %v3384_v40 = vld [vmem:[%s4036_s9 + $0x8] ss:$0 sm:$0xff]  ;;  %v3389_v41 = vld [vmem:[%s4036_s9 + $0x9] ss:$0 sm:$0xff] }
 0x232   : > { %v1244_v42 = vmul.f32 0.5, %v1221_v18  ;;  %v1824_v18 = vmul.f32 %v3361_v20, %v1815_v22 }
 0x233   : > { %v1131_v43 = vpop.f32.mrb[4].mxu0  ;;  %v1225_v45 = vpop.f32.mrb[4].mxu1 }
 0x234   : > { %2912 = vtanh.f32 %v1244_v42  ;;  %v1226_v46 = vadd.f32 %v2513_v35, %v1225_v45  ;;  %v2681_v47 = vpop.f32.mrb[5].mxu0  ;;  %v2704_v48 = vpop.f32.mrb[5].mxu1  ;;  %v1132_v23 = vadd.f32 %v3328_v61, %v1131_v43  ;;  %v1940_v42 = vmul.f32 %v3366_v21, %v1931_v25 }
 0x235   : > { %v1955_v43 = vmul.f32 %v3373_v28, %v1946_v29  ;;  %v3399_v47 = vld [vmem:[%s4036_s9 + $0xc] ss:$0 sm:$0xff]  ;;  %v3404_v48 = vld [vmem:[%s4036_s9 + $0xd] ss:$0 sm:$0xff]  ;;  %v3477_v29 = vld [vmem:[%s4036_s9 + $0x14] ss:$0 sm:$0xff] }
 0x236   : > { %v1245_v49 = vmul.f32 0.5, %v1226_v46 }
 0x237   : > { %v3321_v50 = vpop.f32.mrb[6].mxu0  ;;  %v1230_v26 = vpop.f32.mrb[6].mxu1 }
 0x238   : > { %2914 = vtanh.f32 %v1245_v49  ;;  %v1231_v51 = vadd.f32 %v2513_v35, %v1230_v26  ;;  %v2684_v19 = vpop.f32.mrb[7].mxu0  ;;  %v2707_v52 = vpop.f32.mrb[7].mxu1  ;;  %v1137_v45 = vadd.f32 %v3328_v61, %v3321_v50  ;;  %v1637_v49 = vld [vmem:[#allocation2 + $0x39] sm:$0xff]  ;;  %v3409_v50 = vld [vmem:[%s4036_s9 + $0x18] ss:$0 sm:$0xff] }
 0x239   : > { %v1768_v26 = vld [vmem:[#allocation2 + $0x3a] sm:$0xff]  ;;  %v1567_v52 = vadd.f32 %v1562_v32, %v1547_v31  ;;  %4104 = vst [vmem:[#allocation6_spill] sm:$0xff] %v3409_v50  ;;  %v3446_v5 = vmul.f32 %v3409_v50, %v1637_v49 }
 0x23a   : > { %v1246_v54 = vmul.f32 0.5, %v1231_v51  ;;  %v2014_v51 = vld [vmem:[#allocation2 + $0x38] sm:$0xff] }
 0x23b   : > { %v3323_v55 = vpop.f32.mrb[8].mxu0  ;;  %v1235_v57 = vpop.f32.mrb[8].mxu1  ;;  %4110 = vst [vmem:[#allocation12_spill] sm:$0xff] %v3446_v5 }
 0x23c   : > { %2916 = vtanh.f32 %v1246_v54  ;;  %v1236_v27 = vadd.f32 %v2513_v35, %v1235_v57  ;;  %v2687_v59 = vpop.f32.mrb[9].mxu0  ;;  %v2710_v60 = vpop.f32.mrb[9].mxu1  ;;  %v3414_v54 = vld [vmem:[%s4036_s9 + $0x19] ss:$0 sm:$0xff]  ;;  %v3419_v57 = vld [vmem:[%s4036_s9 + $0xa] ss:$0 sm:$0xff] }
 0x23d   : > { %4105 = vst [vmem:[#allocation7_spill] sm:$0xff] %v3414_v54  ;;  %4106 = vst [vmem:[#allocation8_spill] sm:$0xff] %v3419_v57  ;;  %v1698_v60 = vadd.f32 %v1693_v34, %v1678_v33  ;;  %v3449_v7 = vmul.f32 %v3414_v54, %v1768_v26 }
 0x23e   : > { %v2913_v36 = vpop.eup %2912  ;;  %v1247_v37 = vmul.f32 0.5, %v1236_v27 }
 0x23f   : > { %v1254_v56 = vadd.f32 1.0, %v2913_v36  ;;  %v3330_v58 = vpop.f32.mrb[10].mxu0  ;;  %v1240_v44 = vpop.f32.mrb[10].mxu1  ;;  %v1829_v36 = vadd.f32 %v1824_v18, %v1809_v39  ;;  %4111 = vst [vmem:[#allocation13_spill] sm:$0xff] %v3449_v7  ;;  %v3495_v39 = vld [vmem:[%s4036_s9 + $0x15] ss:$0 sm:$0xff] }
 0x240   : > { %2918 = vtanh.f32 %v1247_v37  ;;  %v1241_v62 = vadd.f32 %v2513_v35, %v1240_v44  ;;  %v2690_v63 = vpop.f32.mrb[11].mxu0  ;;  %v2713_v0 = vpop.f32.mrb[11].mxu1  ;;  %v3424_v37 = vld [vmem:[%s4036_s9 + $0xe] ss:$0 sm:$0xff]  ;;  %v3434_v44 = vld [vmem:[%s4036_s9 + $0x17] ss:$0 sm:$0xff] }
 0x241   : > { %v1259_v3 = vmul.f32 0.5, %v1254_v56  ;;  %4107 = vst [vmem:[#allocation9_spill] sm:$0xff] %v3424_v37  ;;  %v3429_v56 = vld [vmem:[%s4036_s9 + $0xb] ss:$0 sm:$0xff]  ;;  %4109 = vst [vmem:[#allocation11_spill] sm:$0xff] %v3434_v44 }
 0x242   : > { %v2915_v8 = vpop.eup %2914  ;;  %v1248_v9 = vmul.f32 0.5, %v1241_v62  ;;  %4108 = vst [vmem:[#allocation10_spill] sm:$0xff] %v3429_v56  ;;  %v3439_v0 = vld [vmem:[%s4036_s9 + $0x10] ss:$0 sm:$0xff]  ;;  %4116 = vst [vmem:[#allocation18_spill] sm:$0xff] %v3495_v39 }
 0x243   : > { %v1264_v13 = vmul.f32 %v1259_v3, %v1127_v2  ;;  %v1255_v14 = vadd.f32 1.0, %v2915_v8  ;;  %v3443_v3 = vadd.f32 %v1955_v43, %v1940_v42  ;;  %v3452_v8 = vmul.f32 %v3434_v44, %v2014_v51  ;;  %v3500_v18 = vld [vmem:[%s4036_s9 + $0x12] ss:$0 sm:$0xff]  ;;  %v3505_v42 = vld [vmem:[%s4036_s9 + $0x16] ss:$0 sm:$0xff] }
 0x244   : > { %2920 = vtanh.f32 %v1248_v9  ;;  %v1142_v9 = vadd.f32 %v3328_v61, %v3323_v55  ;;  %v1147_v55 = vadd.f32 %v3328_v61, %v3330_v58  ;;  %v3490_v61 = vld [vmem:[%s4036_s9 + $0xf] ss:$0 sm:$0xff]  ;;  %4117 = vst [vmem:[#allocation19_spill] sm:$0xff] %v3500_v18  ;;  %4118 = vst [vmem:[#allocation20_spill] sm:$0xff] %v3505_v42 }
 0x245   : > { %1308 = vst.msk [vmem:[#allocation2 + $0x10] sm:$0xff] %vm958_vm2, %v1264_v13  ;;  %v1260_v24 = vmul.f32 0.5, %v1255_v14  ;;  %4112 = vst [vmem:[#allocation14_spill] sm:$0xff] %v3452_v8 }
 0x246   : > { %v2917_v30 = vpop.eup %2916  ;;  %4115 = vst [vmem:[#allocation17_spill] sm:$0xff] %v3490_v61 }
 0x247   : > { %v1265_v35 = vmul.f32 %v1260_v24, %v1132_v23  ;;  %v1256_v38 = vadd.f32 1.0, %v2917_v30 }
 0x249   : > { %1309 = vst.msk [vmem:[#allocation2 + $0x18] sm:$0xff] %vm958_vm2, %v1265_v35  ;;  %v1261_v46 = vmul.f32 0.5, %v1256_v38 }
 0x24a   : > { %v2919_v19 = vpop.eup %2918 }
 0x24b   : > { %v1266_v27 = vmul.f32 %v1261_v46, %v1137_v45  ;;  %v1257_v59 = vadd.f32 1.0, %v2919_v19 }
 0x24c   : > { %v1539_v62 = vld [vmem:[#allocation2 + $0x9] sm:$0xff] }
 0x24d   : > { %v1554_v63 = vld [vmem:[#allocation2 + $0xd] sm:$0xff]  ;;  %1310 = vst.msk [vmem:[#allocation2 + $0x20] sm:$0xff] %vm958_vm2, %v1266_v27  ;;  %v1262_v11 = vmul.f32 0.5, %v1257_v59  ;;  %v1578_v13 = vmul.f32 %v3384_v40, %v1539_v62  ;;  %v1548_v19 = vmul.f32 %v3336_v4, %v1539_v62  ;;  %v3532_v62 = vld [vmem:[%s4036_s9 + $0x1c] ss:$0 sm:$0xff] }
 0x24e   : > { %v3441_v2 = vld [vmem:[#allocation2 + $0xa] sm:$0xff]  ;;  %v2921_v24 = vpop.eup %2920  ;;  %v1594_v25 = vmul.f32 %v3399_v47, %v1554_v63  ;;  %4120 = vst [vmem:[#allocation22_spill] sm:$0xff] %v3532_v62 }
 0x24f   : > { %v3458_v14 = vld [vmem:[#allocation2 + $0xe] sm:$0xff]  ;;  %v1709_v15 = vmul.f32 %v3389_v41, %v3441_v2  ;;  %v1267_v58 = vmul.f32 %v1262_v11, %v1142_v9  ;;  %v1258_v34 = vadd.f32 1.0, %v2921_v24  ;;  %v1583_v35 = vadd.f32 %v1578_v13, %v1567_v52 }
 0x250   : > { %v3467_v22 = vld [vmem:[#allocation2 + $0xb] sm:$0xff]  ;;  %v1725_v30 = vmul.f32 %v3404_v48, %v3458_v14  ;;  %v3509_v45 = vld [vmem:[#allocation2 + $0x15] sm:$0xff] }
 0x251   : > { %v3469_v23 = vld [vmem:[#allocation2 + $0xf] sm:$0xff]  ;;  %v1840_v31 = vmul.f32 %v3419_v57, %v3467_v22  ;;  %v1714_v38 = vadd.f32 %v1709_v15, %v1698_v60  ;;  %1311 = vst.msk [vmem:[#allocation2 + $0x28] sm:$0xff] %vm958_vm2, %v1267_v58  ;;  %v1263_v52 = vmul.f32 0.5, %v1258_v34  ;;  %v1599_v27 = vadd.f32 %v1594_v25, %v1583_v35 }
 0x252   : > { %v3483_v32 = vld [vmem:[#allocation2 + $0xc] sm:$0xff]  ;;  %v1856_v26 = vmul.f32 %v3424_v37, %v3469_v23  ;;  %v3521_v60 = vld [vmem:[#allocation2 + $0x16] sm:$0xff]  ;;  %v1563_v58 = vmul.f32 %v3341_v6, %v1554_v63  ;;  %v1626_v1 = vmul.f32 %v3477_v29, %v3509_v45 }
 0x253   : > { %4113 = vst [vmem:[#allocation15_spill] sm:$0xff] %v3483_v32  ;;  %v3485_v33 = vld [vmem:[#allocation2 + $0x10] sm:$0xff]  ;;  %v1845_v49 = vadd.f32 %v1840_v31, %v1829_v36  ;;  %v1971_v51 = vmul.f32 %v3429_v56, %v3483_v32  ;;  %v1730_v13 = vadd.f32 %v1725_v30, %v1714_v38  ;;  %v1268_v34 = vmul.f32 %v1263_v52, %v1147_v55  ;;  %v3549_v30 = vld [vmem:[%s4036_s9 + $0x1d] ss:$0 sm:$0xff] }
 0x254   : > { %4114 = vst [vmem:[#allocation16_spill] sm:$0xff] %v3485_v33  ;;  %v3507_v43 = vld [vmem:[#allocation2 + $0x11] sm:$0xff]  ;;  %v1987_v11 = vmul.f32 %v3490_v61, %v3485_v33  ;;  %4123 = vst [vmem:[#allocation25_spill] sm:$0xff] %v3549_v30  ;;  %v3560_v63 = vld [vmem:[#allocation2 + $0x19] sm:$0xff] }
 0x255   : > { %v3511_v46 = vld [vmem:[#allocation2 + $0x12] sm:$0xff]  ;;  %v1610_v59 = vmul.f32 %v3439_v0, %v3507_v43  ;;  %v1861_v24 = vadd.f32 %v1856_v26, %v1845_v49  ;;  %v3556_v49 = vld [vmem:[%s4036_s9 + $0x1a] ss:$0 sm:$0xff]  ;;  %v3562_v55 = vld [vmem:[#allocation2 + $0x1d] sm:$0xff]  ;;  %v1976_v7 = vadd.f32 %v1971_v51, %v3443_v3  ;;  %1312 = vst.msk [vmem:[#allocation2 + $0x30] sm:$0xff] %vm958_vm2, %v1268_v34  ;;  %v1642_v8 = vmul.f32 %v3409_v50, %v3560_v63 }
 0x256   : > { %v3523_v9 = vld [vmem:[#allocation2 + $0x13] sm:$0xff]  ;;  %v1741_v15 = vmul.f32 %v3465_v17, %v3511_v46  ;;  %4124 = vst [vmem:[#allocation26_spill] sm:$0xff] %v3556_v49  ;;  %v3574_v61 = vld [vmem:[#allocation2 + $0x1e] sm:$0xff]  ;;  %v1579_v32 = vmul.f32 %v3384_v40, %v3507_v43 }
 0x257   : > { %v3525_v36 = vld [vmem:[#allocation2 + $0x17] sm:$0xff]  ;;  %v3541_v31 = vld [vmem:[%s4036_s9 + $0x13] ss:$0 sm:$0xff]  ;;  %v1615_v35 = vadd.f32 %v1610_v59, %v1599_v27  ;;  %v1872_v38 = vmul.f32 %v3500_v18, %v3523_v9  ;;  %v1757_v59 = vmul.f32 %v3495_v39, %v3521_v60 }
 0x258   : > { %4119 = vst [vmem:[#allocation21_spill] sm:$0xff] %v3525_v36  ;;  %v3536_v25 = vld [vmem:[#allocation2 + $0x14] sm:$0xff]  ;;  %4122 = vst [vmem:[#allocation24_spill] sm:$0xff] %v3541_v31  ;;  %v1746_v27 = vadd.f32 %v1741_v15, %v1730_v13  ;;  %v1888_v53 = vmul.f32 %v3505_v42, %v3525_v36  ;;  %v3583_v15 = vld [vmem:[%s4036_s9 + $0x1e] ss:$0 sm:$0xff] }
 0x259   : > { %4121 = vst [vmem:[#allocation23_spill] sm:$0xff] %v3536_v25  ;;  %v3558_v26 = vld [vmem:[#allocation2 + $0x18] sm:$0xff]  ;;  %v1631_v5 = vadd.f32 %v1626_v1, %v1615_v35  ;;  %4127 = vst [vmem:[#allocation29_spill] sm:$0xff] %v3583_v15  ;;  %v2003_v3 = vmul.f32 %v3541_v31, %v3536_v25  ;;  %v1877_v34 = vadd.f32 %v1872_v38, %v1861_v24  ;;  %v3610_v37 = vld [vmem:[#allocation2 + $0x21] sm:$0xff] }
 0x25a   : > { %4125 = vst [vmem:[#allocation27_spill] sm:$0xff] %v3558_v26  ;;  %v3564_v52 = vld [vmem:[#allocation2 + $0x1a] sm:$0xff]  ;;  %v1762_v51 = vadd.f32 %v1757_v59, %v1746_v27  ;;  %v2019_v33 = vmul.f32 %v3434_v44, %v3558_v26  ;;  %v1658_v27 = vmul.f32 %v3532_v62, %v3562_v55  ;;  %v1789_v24 = vmul.f32 %v3549_v30, %v3574_v61 }
 0x25b   : > { %v1773_v56 = vmul.f32 %v3414_v54, %v3564_v52  ;;  %v3578_v13 = vld [vmem:[#allocation2 + $0x1b] sm:$0xff]  ;;  %v1647_v21 = vadd.f32 %v1642_v8, %v1631_v5  ;;  %v1992_v38 = vadd.f32 %v1987_v11, %v1976_v7  ;;  %v1893_v31 = vadd.f32 %v1888_v53, %v1877_v34 }
 0x25c   : > { %4126 = vst [vmem:[#allocation28_spill] sm:$0xff] %v3578_v13  ;;  %v3587_v1 = vld [vmem:[#allocation2 + $0x1f] sm:$0xff]  ;;  %v1904_v35 = vmul.f32 %v3556_v49, %v3578_v13  ;;  %v3598_v42 = vld [vmem:[%s4036_s9 + $0x1b] ss:$0 sm:$0xff]  ;;  %v1568_v25 = vadd.f32 %v1563_v58, %v1548_v19  ;;  %v1595_v19 = vmul.f32 %v3399_v47, %v3509_v45  ;;  %v3624_v34 = vmul.f32 %v3336_v4, %v3610_v37 }
 0x25d   : > { %v3591_v28 = vld [vmem:[#allocation2 + $0x1c] sm:$0xff]  ;;  %4128 = vst [vmem:[#allocation30_spill] sm:$0xff] %v3598_v42  ;;  %v1778_v59 = vadd.f32 %v1773_v56, %v1762_v51  ;;  %v1663_v18 = vadd.f32 %v1658_v27, %v1647_v21  ;;  %v1920_v13 = vmul.f32 %v3583_v15, %v3587_v1  ;;  %v2008_v5 = vadd.f32 %v2003_v3, %v1992_v38 }
 0x25e   : > { %v1899_v44 = vld [vmem:[#allocation2 + $0x3b] sm:$0xff]  ;;  %v2035_v8 = vmul.f32 %v3598_v42, %v3591_v28  ;;  %v1909_v56 = vadd.f32 %v1904_v35, %v1893_v31  ;;  %v1584_v53 = vadd.f32 %v1579_v32, %v1568_v25  ;;  %v1611_v21 = vmul.f32 %v3439_v0, %v3560_v63  ;;  %4131 = vst [vmem:[#allocation33_spill] sm:$0xff] %v3624_v34  ;;  %v3626_v31 = vld [vmem:[#allocation2 + $0x25] sm:$0xff] }
 0x25f   : > { %v2030_v26 = vld [vmem:[#allocation2 + $0x3c] sm:$0xff]  ;;  %v1794_v7 = vadd.f32 %v1789_v24, %v1778_v59  ;;  %v2024_v11 = vadd.f32 %v2019_v33, %v2008_v5  ;;  %v3617_v58 = vmul.f32 %v3556_v49, %v1899_v44  ;;  %v1679_v44 = vmul.f32 %v3346_v10, %v3441_v2  ;;  %v3649_v5 = vld [vmem:[#allocation2 + $0x26] sm:$0xff] }
 0x260   : > { %v1653_v36 = vld [vmem:[#allocation2 + $0x3d] sm:$0xff]  ;;  %v3620_v3 = vmul.f32 %v3598_v42, %v2030_v26  ;;  %v1925_v51 = vadd.f32 %v1920_v13, %v1909_v56  ;;  %v1600_v32 = vadd.f32 %v1595_v19, %v1584_v53  ;;  %v1694_v26 = vmul.f32 %v3351_v12, %v3458_v14 }
 0x261   : > { %4129 = vst [vmem:[#allocation31_spill] sm:$0xff] %v3617_v58  ;;  %v3629_v25 = vmul.f32 %v3532_v62, %v1653_v36  ;;  %v2040_v33 = vadd.f32 %v2035_v8, %v2024_v11  ;;  %v2045_v35 = vadd.f32 %v1794_v7, %v1663_v18  ;;  %v3631_v27 = vld [vmem:[#allocation2 + $0x22] sm:$0xff]  ;;  %v1627_v24 = vmul.f32 %v3477_v29, %v3562_v55  ;;  %v3654_v8 = vld [vmem:[%s4037_s10] ss:$0 sm:$0xff] }
 0x262   : > { %4130 = vst [vmem:[#allocation32_spill] sm:$0xff] %v3620_v3  ;;  %v1616_v13 = vadd.f32 %v1611_v21, %v1600_v32  ;;  %v1643_v38 = vmul.f32 %v3409_v50, %v3610_v37  ;;  %v1710_v36 = vmul.f32 %v3389_v41, %v3511_v46  ;;  %v3645_v18 = vmul.f32 %v3341_v6, %v3626_v31  ;;  %v3666_v32 = vld [vmem:[#allocation2 + $0x23] sm:$0xff]  ;;  %v4139_v3 = vld [vmem:[#allocation21_spill] sm:$0xff] }
 0x263   : > { %4132 = vst [vmem:[#allocation34_spill] sm:$0xff] %v3629_v25  ;;  %v2050_v59 = vadd.f32 %v2040_v33, %v1925_v51  ;;  %v1659_v2 = vmul.f32 %v3532_v62, %v3626_v31  ;;  %v1699_v14 = vadd.f32 %v1694_v26, %v1679_v44  ;;  %4134 = vst [vmem:[#allocation36_spill] sm:$0xff] %v3654_v8  ;;  %v3668_v33 = vld [vmem:[#allocation2 + $0x27] sm:$0xff]  ;;  %v4140_v25 = vld [vmem:[#allocation9_spill] sm:$0xff] }
 0x264   : > { %4133 = vst [vmem:[#allocation35_spill] sm:$0xff] %v3645_v18  ;;  %v1632_v7 = vadd.f32 %v1627_v24, %v1616_v13  ;;  %v3658_v56 = vmul.f32 %v3346_v10, %v3631_v27  ;;  %v1726_v53 = vmul.f32 %v3404_v48, %v3521_v60  ;;  %v1810_v19 = vmul.f32 %v3356_v16, %v3467_v22  ;;  %v4144_v18 = vld [vmem:[#allocation4_spill] sm:$0xff] }
 0x265   : > { %v2055_v11 = vadd.f32 %v2050_v59, %v2045_v35  ;;  %v1715_v21 = vadd.f32 %v1710_v36, %v1699_v14  ;;  %v1742_v51 = vmul.f32 %v3465_v17, %v3564_v52  ;;  %v1825_v44 = vmul.f32 %v3361_v20, %v3469_v23 }
 0x266   : > { %4135 = vst [vmem:[#allocation37_spill] sm:$0xff] %v3658_v56  ;;  %v1648_v26 = vadd.f32 %v1643_v38, %v1632_v7  ;;  %v3674_v13 = vmul.f32 %v3351_v12, %v3649_v5  ;;  %v1758_v22 = vmul.f32 %v3495_v39, %v3574_v61  ;;  %v1841_v35 = vmul.f32 %v3419_v57, %v3523_v9  ;;  %v4143_v56 = vld [vmem:[#allocation15_spill] sm:$0xff] }
 0x267   : > { %v2067_v24 = vadd.f32 %v3654_v8, %v2055_v11  ;;  %v1731_v36 = vadd.f32 %v1726_v53, %v1715_v21  ;;  %v1774_v59 = vmul.f32 %v3414_v54, %v3631_v27  ;;  %v1830_v14 = vadd.f32 %v1825_v44, %v1810_v19  ;;  %v4141_v21 = vld [vmem:[#allocation28_spill] sm:$0xff]  ;;  %v4142_v19 = vld [vmem:[#allocation19_spill] sm:$0xff] }
 0x268   : > { %4136 = vst [vmem:[#allocation38_spill] sm:$0xff] %v3674_v13  ;;  %v1790_v23 = vmul.f32 %v3549_v30, %v3649_v5  ;;  %v3687_v38 = vmul.f32 %v3356_v16, %v3666_v32  ;;  %v3691_v7 = vmul.f32 %v3361_v20, %v3668_v33  ;;  %v1857_v58 = vmul.f32 %v4140_v25, %v4139_v3  ;;  %v3698_v13 = vld [vmem:[#allocation2 + $0x24] sm:$0xff] }
 0x269   : > { %2753 = vmatmul.mubr.msk.f32.vlgmr.msra.gmra.mrb[14].mxu0 %vm958_vm2, %v2067_v24  ;;  %v1747_v53 = vadd.f32 %v1742_v51, %v1731_v36  ;;  %v1846_v11 = vadd.f32 %v1841_v35, %v1830_v14  ;;  %v1873_v44 = vmul.f32 %v4142_v19, %v4141_v21  ;;  %v1941_v34 = vmul.f32 %v4144_v18, %v4143_v56  ;;  %v3706_v25 = vld [vmem:[#allocation2 + $0x20] sm:$0xff]  ;;  %v4147_v24 = vld [vmem:[#allocation16_spill] sm:$0xff]  ;;  %v4148_v51 = vld [vmem:[#allocation5_spill] sm:$0xff] }
 0x26a   : > { %4137 = vst [vmem:[#allocation39_spill] sm:$0xff] %v3687_v38  ;;  %4138 = vst [vmem:[#allocation40_spill] sm:$0xff] %v3691_v7  ;;  %v4145_v38 = vmov 0.0   ;;  %v1664_v8 = vadd.f32 %v1659_v2, %v1648_v26  ;;  %v4146_v7 = vld [vmem:[#allocation20_spill] sm:$0xff]  ;;  %v1956_v35 = vmul.f32 %v4148_v51, %v4147_v24  ;;  %v4149_v36 = vld [vmem:[#allocation23_spill] sm:$0xff]  ;;  %v1905_v56 = vmul.f32 %v3556_v49, %v3666_v32 }
 0x26b   : > { %2755 = vmatprep.mubr.msk.f32.mxu0 %vm2957_vm1, %v4145_v38  ;;  %v1889_v30 = vmul.f32 %v4146_v7, %v3587_v1  ;;  %v4150_v14 = vld [vmem:[#allocation10_spill] sm:$0xff]  ;;  %v1763_v54 = vadd.f32 %v1758_v22, %v1747_v53  ;;  %v1862_v39 = vadd.f32 %v1857_v58, %v1846_v11  ;;  %v1921_v38 = vmul.f32 %v3583_v15, %v3668_v33  ;;  %v4153_v15 = vld [vmem:[#allocation27_spill] sm:$0xff]  ;;  %v4154_v49 = vld [vmem:[#allocation17_spill] sm:$0xff] }
 0x26c   : > { %v1972_v19 = vmul.f32 %v4150_v14, %v4149_v36  ;;  %v3718_v2 = vmul.f32 %v4144_v18, %v3698_v13  ;;  %v1961_v26 = vadd.f32 %v1956_v35, %v1941_v34  ;;  %v1549_v7 = vmul.f32 %v3336_v4, %v3507_v43  ;;  %v4155_v34 = vld [vmem:[#allocation24_spill] sm:$0xff] }
 0x26d   : > { %v1564_v24 = vmul.f32 %v3341_v6, %v3509_v45  ;;  %v1779_v14 = vadd.f32 %v1774_v59, %v1763_v54  ;;  %v1878_v22 = vadd.f32 %v1873_v44, %v1862_v39  ;;  %v3726_v58 = vmul.f32 %v4148_v51, %v3706_v25  ;;  %v3734_v4 = vld [vmem:[#allocation2 + $0x29] sm:$0xff] }
 0x26e   : > { %4151 = vst [vmem:[#allocation21_spill] sm:$0xff] %v3718_v2  ;;  %v1580_v53 = vmul.f32 %v3384_v40, %v3560_v63  ;;  %v1977_v11 = vadd.f32 %v1972_v19, %v1961_v26  ;;  %v1988_v2 = vmul.f32 %v4154_v49, %v4153_v15  ;;  %v2004_v35 = vmul.f32 %v4155_v34, %v3591_v28  ;;  %v4156_v54 = vld [vmem:[#allocation11_spill] sm:$0xff] }
 0x26f   : > { %4152 = vst [vmem:[#allocation28_spill] sm:$0xff] %v3726_v58  ;;  %v1569_v43 = vadd.f32 %v1564_v24, %v1549_v7  ;;  %v1894_v45 = vadd.f32 %v1889_v30, %v1878_v22  ;;  %v2020_v39 = vmul.f32 %v4156_v54, %v3706_v25  ;;  %v2036_v59 = vmul.f32 %v3598_v42, %v3698_v13  ;;  %v3740_v44 = vld [vmem:[#allocation2 + $0x2d] sm:$0xff] }
 0x270   : > { %v1596_v19 = vmul.f32 %v3399_v47, %v3562_v55  ;;  %v1795_v26 = vadd.f32 %v1790_v23, %v1779_v14  ;;  %v1993_v58 = vadd.f32 %v1988_v2, %v1977_v11  ;;  %v1612_v7 = vmul.f32 %v3439_v0, %v3610_v37 }
 0x271   : > { %v1585_v49 = vadd.f32 %v1580_v53, %v1569_v43  ;;  %v1910_v24 = vadd.f32 %v1905_v56, %v1894_v45  ;;  %v3748_v30 = vmul.f32 %v3384_v40, %v3734_v4  ;;  %v1680_v22 = vmul.f32 %v3346_v10, %v3511_v46  ;;  %v3766_v45 = vld [vmem:[#allocation2 + $0x2a] sm:$0xff] }
 0x272   : > { %v1695_v42 = vmul.f32 %v3351_v12, %v3521_v60  ;;  %v2009_v54 = vadd.f32 %v2004_v35, %v1993_v58  ;;  %v3756_v23 = vmul.f32 %v3399_v47, %v3740_v44  ;;  %v1711_v2 = vmul.f32 %v3389_v41, %v3564_v52 }
 0x273   : > { %4157 = vst [vmem:[#allocation15_spill] sm:$0xff] %v3748_v30  ;;  %v1601_v14 = vadd.f32 %v1596_v19, %v1585_v49  ;;  %v1628_v56 = vmul.f32 %v3477_v29, %v3626_v31  ;;  %v1644_v53 = vmul.f32 %v3409_v50, %v3734_v4  ;;  %v1660_v46 = vmul.f32 %v3532_v62, %v3740_v44  ;;  %v3768_v49 = vld [vmem:[#allocation2 + $0x2e] sm:$0xff] }
 0x274   : > { %4158 = vst [vmem:[#allocation16_spill] sm:$0xff] %v3756_v23  ;;  %v1700_v11 = vadd.f32 %v1695_v42, %v1680_v22  ;;  %v1926_v60 = vadd.f32 %v1921_v38, %v1910_v24  ;;  %v2025_v58 = vadd.f32 %v2020_v39, %v2009_v54  ;;  %v2046_v35 = vadd.f32 %v1795_v26, %v1664_v8  ;;  %v3778_v38 = vld [vmem:[#allocation2 + $0x2b] sm:$0xff] }
 0x275   : > { %v1617_v43 = vadd.f32 %v1612_v7, %v1601_v14  ;;  %v1727_v23 = vmul.f32 %v3404_v48, %v3574_v61  ;;  %v1743_v30 = vmul.f32 %v3465_v17, %v3631_v27  ;;  %v1811_v50 = vmul.f32 %v3356_v16, %v3523_v9  ;;  %v4161_v9 = vld [vmem:[#allocation18_spill] sm:$0xff]  ;;  %v4163_v14 = vld [vmem:[#allocation25_spill] sm:$0xff] }
 0x276   : > { %v1716_v19 = vadd.f32 %v1711_v2, %v1700_v11  ;;  %v2041_v62 = vadd.f32 %v2036_v59, %v2025_v58  ;;  %v1826_v8 = vmul.f32 %v3361_v20, %v4139_v3  ;;  %v1842_v54 = vmul.f32 %v3419_v57, %v4141_v21  ;;  %v4162_v3 = vld [vmem:[#allocation7_spill] sm:$0xff] }
 0x277   : > { %v1633_v42 = vadd.f32 %v1628_v56, %v1617_v43  ;;  %v3784_v39 = vmul.f32 %v3389_v41, %v3766_v45  ;;  %v3788_v26 = vmul.f32 %v3404_v48, %v3768_v49  ;;  %v1759_v59 = vmul.f32 %v4161_v9, %v3649_v5  ;;  %v3796_v11 = vld [vmem:[#allocation2 + $0x2f] sm:$0xff] }
 0x278   : > { %v1732_v7 = vadd.f32 %v1727_v23, %v1716_v19  ;;  %v2051_v24 = vadd.f32 %v2041_v62, %v1926_v60  ;;  %v1775_v22 = vmul.f32 %v4162_v3, %v3766_v45  ;;  %v1791_v2 = vmul.f32 %v4163_v14, %v3768_v49  ;;  %v4165_v23 = vld [vmem:[#allocation9_spill] sm:$0xff]  ;;  %v4166_v60 = vld [vmem:[#allocation19_spill] sm:$0xff] }
 0x279   : > { %4159 = vst [vmem:[#allocation5_spill] sm:$0xff] %v3784_v39  ;;  %4160 = vst [vmem:[#allocation23_spill] sm:$0xff] %v3788_v26  ;;  %v1831_v56 = vadd.f32 %v1826_v8, %v1811_v50  ;;  %v1649_v58 = vadd.f32 %v1644_v53, %v1633_v42  ;;  %v3800_v39 = vmul.f32 %v3419_v57, %v3778_v38  ;;  %v4168_v8 = vld [vmem:[#allocation10_spill] sm:$0xff]  ;;  %v3825_v57 = vld [vmem:[#allocation2 + $0x2c] sm:$0xff] }
 0x27a   : > { %v1748_v43 = vadd.f32 %v1743_v30, %v1732_v7  ;;  %v1858_v19 = vmul.f32 %v4165_v23, %v3587_v1  ;;  %v2056_v26 = vadd.f32 %v2051_v24, %v2046_v35  ;;  %v1874_v3 = vmul.f32 %v4166_v60, %v3666_v32  ;;  %v3812_v30 = vld [vmem:[#allocation2 + $0x28] sm:$0xff] }
 0x27b   : > { %4164 = vst [vmem:[#allocation27_spill] sm:$0xff] %v3800_v39  ;;  %v1847_v62 = vadd.f32 %v1842_v54, %v1831_v56  ;;  %v1942_v14 = vmul.f32 %v4144_v18, %v4149_v36  ;;  %v3810_v53 = vmul.f32 %v4165_v23, %v3796_v11  ;;  %v1957_v42 = vmul.f32 %v4148_v51, %v4153_v15  ;;  %v4169_v54 = vld [vmem:[#allocation36_spill] sm:$0xff]  ;;  %v4171_v36 = vld [vmem:[#allocation26_spill] sm:$0xff] }
 0x27c   : > { %v1764_v50 = vadd.f32 %v1759_v59, %v1748_v43  ;;  %v1973_v35 = vmul.f32 %v4168_v8, %v3591_v28  ;;  %v2068_v7 = vadd.f32 %v4169_v54, %v2056_v26  ;;  %v4170_v56 = vld [vmem:[#allocation20_spill] sm:$0xff]  ;;  %v1906_v59 = vmul.f32 %v4171_v36, %v3778_v38 }
 0x27d   : > { %4167 = vst [vmem:[#allocation24_spill] sm:$0xff] %v3810_v53  ;;  %v1863_v24 = vadd.f32 %v1858_v19, %v1847_v62  ;;  %v1890_v39 = vmul.f32 %v4170_v56, %v3668_v33  ;;  %v1665_v43 = vadd.f32 %v1660_v46, %v1649_v58  ;;  %v4172_v53 = vld [vmem:[#allocation29_spill] sm:$0xff]  ;;  %v1962_v23 = vadd.f32 %v1957_v42, %v1942_v14  ;;  %v4174_v19 = vld [vmem:[#allocation3_spill] sm:$0xff] }
 0x27e   : > { %v1780_v18 = vadd.f32 %v1775_v22, %v1764_v50  ;;  %v1922_v60 = vmul.f32 %v4172_v53, %v3796_v11  ;;  %2756 = vmatmul.mubr.msk.f32.gmra.mrb[16].mxu0 %vm958_vm2, %v2068_v7  ;;  %v3830_v26 = vmul.f32 %v4148_v51, %v3812_v30  ;;  %v1550_v62 = vmul.f32 %v4174_v19, %v3560_v63  ;;  %v4176_v14 = vld [vmem:[#allocation17_spill] sm:$0xff] }
 0x27f   : > { %v1879_v15 = vadd.f32 %v1874_v3, %v1863_v24  ;;  %v1565_v46 = vmul.f32 %v3341_v6, %v3562_v55  ;;  %v4175_v22 = vmov 0.0   ;;  %v1978_v58 = vadd.f32 %v1973_v35, %v1962_v23  ;;  %v1605_v42 = vld [vmem:[#allocation2 + $0x31] sm:$0xff]  ;;  %v4177_v23 = vld [vmem:[#allocation11_spill] sm:$0xff] }
 0x280   : > { %4173 = vst [vmem:[#allocation18_spill] sm:$0xff] %v3830_v26  ;;  %2758 = vmatprep.mubr.msk.f32.mxu0 %vm2957_vm1, %v4175_v22  ;;  %v1989_v50 = vmul.f32 %v4176_v14, %v3706_v25  ;;  %v2005_v3 = vmul.f32 %v4155_v34, %v3698_v13  ;;  %v1581_v51 = vmul.f32 %v3384_v40, %v3610_v37  ;;  %v4178_v25 = vld [vmem:[#allocation30_spill] sm:$0xff]  ;;  %v1621_v22 = vld [vmem:[#allocation2 + $0x35] sm:$0xff] }
 0x281   : > { %v1796_v7 = vadd.f32 %v1791_v2, %v1780_v18  ;;  %v1895_v24 = vadd.f32 %v1890_v39, %v1879_v15  ;;  %v3846_v63 = vmul.f32 %v4168_v8, %v3825_v57  ;;  %v1570_v6 = vadd.f32 %v1565_v46, %v1550_v62 }
 0x282   : > { %v1994_v55 = vadd.f32 %v1989_v50, %v1978_v58  ;;  %v2021_v35 = vmul.f32 %v4177_v23, %v3812_v30  ;;  %v2037_v19 = vmul.f32 %v4178_v25, %v3825_v57  ;;  %v1597_v26 = vmul.f32 %v3399_v47, %v3626_v31  ;;  %v4179_v50 = vld [vmem:[#allocation6_spill] sm:$0xff] }
 0x283   : > { %v1911_v40 = vadd.f32 %v1906_v59, %v1895_v24  ;;  %v1586_v37 = vadd.f32 %v1581_v51, %v1570_v6  ;;  %v1613_v18 = vmul.f32 %v3439_v0, %v3734_v4  ;;  %v3857_v39 = vmul.f32 %v3439_v0, %v1605_v42  ;;  %v4180_v24 = vld [vmem:[#allocation22_spill] sm:$0xff] }
 0x284   : > { %v2010_v2 = vadd.f32 %v2005_v3, %v1994_v55  ;;  %v1681_v15 = vmul.f32 %v3346_v10, %v3564_v52  ;;  %v1696_v62 = vmul.f32 %v3351_v12, %v3574_v61  ;;  %v1712_v46 = vmul.f32 %v3389_v41, %v3631_v27  ;;  %v1736_v10 = vld [vmem:[#allocation2 + $0x32] sm:$0xff] }
 0x285   : > { %v2047_v47 = vadd.f32 %v1796_v7, %v1665_v43  ;;  %v1602_v31 = vadd.f32 %v1597_v26, %v1586_v37  ;;  %v1629_v59 = vmul.f32 %v3477_v29, %v3740_v44  ;;  %v3868_v4 = vmul.f32 %v3477_v29, %v1621_v22  ;;  %v1752_v27 = vld [vmem:[#allocation2 + $0x36] sm:$0xff] }
 0x286   : > { %v1927_v0 = vadd.f32 %v1922_v60, %v1911_v40  ;;  %v2026_v58 = vadd.f32 %v2021_v35, %v2010_v2  ;;  %v1645_v3 = vmul.f32 %v4179_v50, %v1605_v42  ;;  %v1701_v51 = vadd.f32 %v1696_v62, %v1681_v15  ;;  %v4182_v35 = vld [vmem:[#allocation7_spill] sm:$0xff]  ;;  %v1883_v15 = vld [vmem:[#allocation2 + $0x37] sm:$0xff] }
 0x287   : > { %v1618_v52 = vadd.f32 %v1613_v18, %v1602_v31  ;;  %v1661_v12 = vmul.f32 %v4180_v24, %v1621_v22  ;;  %v1728_v41 = vmul.f32 %v3404_v48, %v3649_v5  ;;  %v1744_v61 = vmul.f32 %v3465_v17, %v3766_v45  ;;  %v4181_v48 = vld [vmem:[#allocation8_spill] sm:$0xff]  ;;  %v4188_v24 = vld [vmem:[#allocation33_spill] sm:$0xff] }
 0x288   : > { %v2042_v44 = vadd.f32 %v2037_v19, %v2026_v58  ;;  %v1717_v43 = vadd.f32 %v1712_v46, %v1701_v51  ;;  %v1812_v29 = vmul.f32 %v3356_v16, %v4141_v21  ;;  %v1827_v60 = vmul.f32 %v3361_v20, %v3587_v1  ;;  %v1867_v16 = vld [vmem:[#allocation2 + $0x33] sm:$0xff] }
 0x289   : > { %v1634_v26 = vadd.f32 %v1629_v59, %v1618_v52  ;;  %v3881_v42 = vmul.f32 %v3465_v17, %v1736_v10  ;;  %v1760_v22 = vmul.f32 %v4161_v9, %v3768_v49  ;;  %v1843_v5 = vmul.f32 %v4181_v48, %v3666_v32  ;;  %v4183_v1 = vld [vmem:[#allocation25_spill] sm:$0xff]  ;;  %v4185_v32 = vld [vmem:[#allocation19_spill] sm:$0xff]  ;;  %v4186_v46 = vld [vmem:[#allocation4_spill] sm:$0xff] }
 0x28a   : > { %v2052_v45 = vadd.f32 %v2042_v44, %v1927_v0  ;;  %v1733_v7 = vadd.f32 %v1728_v41, %v1717_v43  ;;  %v3888_v6 = vmul.f32 %v4161_v9, %v1752_v27  ;;  %v1832_v55 = vadd.f32 %v1827_v60, %v1812_v29  ;;  %v4184_v17 = vld [vmem:[#allocation9_spill] sm:$0xff]  ;;  %v4189_v41 = vld [vmem:[#allocation35_spill] sm:$0xff]  ;;  %v4192_v44 = vld [vmem:[#allocation38_spill] sm:$0xff] }
 0x28b   : > { %v1650_v21 = vadd.f32 %v1645_v3, %v1634_v26  ;;  %v1776_v20 = vmul.f32 %v4182_v35, %v1736_v10  ;;  %v1792_v19 = vmul.f32 %v4183_v1, %v1752_v27  ;;  %v1859_v40 = vmul.f32 %v4184_v17, %v3668_v33  ;;  %v4187_v3 = vld [vmem:[#allocation28_spill] sm:$0xff]  ;;  %v4191_v27 = vld [vmem:[#allocation37_spill] sm:$0xff]  ;;  %v4193_v29 = vld [vmem:[#allocation39_spill] sm:$0xff] }
 0x28c   : > { %v2057_v37 = vadd.f32 %v2052_v45, %v2047_v47  ;;  %v1749_v49 = vadd.f32 %v1744_v61, %v1733_v7  ;;  %v1848_v18 = vadd.f32 %v1843_v5, %v1832_v55  ;;  %v1875_v2 = vmul.f32 %v4185_v32, %v3778_v38  ;;  %v1982_v10 = vld [vmem:[#allocation2 + $0x30] sm:$0xff]  ;;  %v4195_v26 = vld [vmem:[#allocation21_spill] sm:$0xff]  ;;  %v4197_v7 = vld [vmem:[#allocation15_spill] sm:$0xff] }
 0x28d   : > { %v1876_v9 = vmul.f32 %v4185_v32, %v1867_v16  ;;  %v1891_v62 = vmul.f32 %v4170_v56, %v3796_v11  ;;  %v1943_v31 = vmul.f32 %v4186_v46, %v3591_v28  ;;  %v1974_v59 = vmul.f32 %v4168_v8, %v3698_v13  ;;  %v1998_v52 = vld [vmem:[#allocation2 + $0x34] sm:$0xff]  ;;  %v4201_v46 = vld [vmem:[#allocation23_spill] sm:$0xff] }
 0x28e   : > { %v2069_v33 = vadd.f32 %v4169_v54, %v2057_v37  ;;  %v1765_v47 = vadd.f32 %v1760_v22, %v1749_v49  ;;  %v1864_v0 = vadd.f32 %v1859_v40, %v1848_v18  ;;  %v1907_v58 = vmul.f32 %v4171_v36, %v1867_v16  ;;  %v4196_v22 = vld [vmem:[#allocation18_spill] sm:$0xff]  ;;  %v4200_v32 = vld [vmem:[#allocation16_spill] sm:$0xff] }
 0x28f   : > { %v1666_v50 = vadd.f32 %v1661_v12, %v1650_v21  ;;  %v1923_v38 = vmul.f32 %v4172_v53, %v1883_v15  ;;  %v1963_v51 = vadd.f32 %v4187_v3, %v1943_v31  ;;  %v1990_v11 = vmul.f32 %v4176_v14, %v3812_v30  ;;  %v4194_v30 = vld [vmem:[#allocation40_spill] sm:$0xff]  ;;  %v4198_v21 = vld [vmem:[#allocation5_spill] sm:$0xff] }
 0x290   : > { %2759 = vmatmul.mubr.msk.f32.gmra.mrb[18].mxu0 %vm958_vm2, %v2069_v33  ;;  %v1781_v28 = vadd.f32 %v1776_v20, %v1765_v47  ;;  %v1880_v13 = vadd.f32 %v1875_v2, %v1864_v0  ;;  %v2006_v8 = vmul.f32 %v4155_v34, %v3825_v57  ;;  %v1571_v36 = vadd.f32 %v4189_v41, %v4188_v24  ;;  %v4199_v20 = vld [vmem:[#allocation27_spill] sm:$0xff]  ;;  %v1784_v31 = vld [vmem:[#allocation2 + $0x3e] sm:$0xff] }
 0x291   : > { %v4190_v12 = vmov 0.0   ;;  %v1979_v61 = vadd.f32 %v1974_v59, %v1963_v51  ;;  %v1702_v43 = vadd.f32 %v4192_v44, %v4191_v27  ;;  %v1833_v60 = vadd.f32 %v4194_v30, %v4193_v29  ;;  %v1915_v33 = vld [vmem:[#allocation2 + $0x3f] sm:$0xff] }
 0x292   : > { %2761 = vmatprep.mubr.msk.f32.mxu0 %vm2957_vm1, %v4190_v12  ;;  %v1964_v48 = vadd.f32 %v4196_v22, %v4195_v26  ;;  %v1896_v5 = vadd.f32 %v1891_v62, %v1880_v13  ;;  %v1991_v45 = vmul.f32 %v4176_v14, %v1982_v10  ;;  %v2007_v57 = vmul.f32 %v4155_v34, %v1998_v52  ;;  %v4202_v34 = vld [vmem:[#allocation24_spill] sm:$0xff] }
 0x293   : > { %v1587_v55 = vadd.f32 %v4197_v7, %v1571_v36  ;;  %v1995_v16 = vadd.f32 %v1990_v11, %v1979_v61  ;;  %v1718_v35 = vadd.f32 %v4198_v21, %v1702_v43  ;;  %v1849_v17 = vadd.f32 %v4199_v20, %v1833_v60  ;;  %v4205_v36 = vld [vmem:[#allocation13_spill] sm:$0xff]  ;;  %v4208_v43 = vld [vmem:[#allocation32_spill] sm:$0xff]  ;;  %v2242_v7 = vld [vmem:[%s4042_s15 + $0x8] sm:$0xff] }
 0x294   : > { %v1980_v40 = vadd.f32 %v3846_v63, %v1964_v48  ;;  %v1797_v37 = vadd.f32 %v1792_v19, %v1781_v28  ;;  %v1912_v49 = vadd.f32 %v1907_v58, %v1896_v5  ;;  %v2022_v18 = vmul.f32 %v4177_v23, %v1982_v10  ;;  %v2244_v21 = vld [vmem:[%s4042_s15 + $0x18] sm:$0xff]  ;;  %v2245_v20 = vld [vmem:[%s4042_s15 + $0x20] sm:$0xff] }
 0x295   : > { %v1603_v2 = vadd.f32 %v4200_v32, %v1587_v55  ;;  %v2011_v62 = vadd.f32 %v2006_v8, %v1995_v16  ;;  %v1734_v14 = vadd.f32 %v4201_v46, %v1718_v35  ;;  %v1865_v59 = vadd.f32 %v4202_v34, %v1849_v17  ;;  %v2246_v17 = vld [vmem:[%s4042_s15 + $0x28] sm:$0xff]  ;;  %v2562_v32 = vld [vmem:[%s4039_s12] ss:$0 sm:$0xff] }
 0x296   : > { %v1996_v47 = vadd.f32 %v1991_v45, %v1980_v40  ;;  %v1892_v0 = vmul.f32 %v4170_v56, %v1883_v15  ;;  %v1928_v3 = vadd.f32 %v1923_v38, %v1912_v49  ;;  %v2038_v51 = vmul.f32 %v4178_v25, %v1998_v52  ;;  %v4203_v38 = vld [vmem:[#allocation14_spill] sm:$0xff]  ;;  %v4204_v52 = vld [vmem:[#allocation12_spill] sm:$0xff]  ;;  %v2248_v49 = vld [vmem:[%s4042_s15 + $0x38] sm:$0xff] }
 0x297   : > { %v1619_v63 = vadd.f32 %v3857_v39, %v1603_v2  ;;  %v2027_v19 = vadd.f32 %v2022_v18, %v2011_v62  ;;  %v1750_v23 = vadd.f32 %v3881_v42, %v1734_v14  ;;  %v1881_v58 = vadd.f32 %v1876_v9, %v1865_v59  ;;  %v4206_v9 = vld [vmem:[#allocation31_spill] sm:$0xff]  ;;  %v2568_v62 = vld [vmem:[%s4040_s13] ss:$0 sm:$0xff] }
 0x298   : > { %v2012_v10 = vadd.f32 %v2007_v57, %v1996_v47  ;;  %v2048_v11 = vadd.f32 %v1797_v37, %v1666_v50  ;;  %v1793_v13 = vmul.f32 %v4183_v1, %v1784_v31  ;;  %v1924_v8 = vmul.f32 %v4172_v53, %v1915_v33  ;;  %v4207_v50 = vld [vmem:[#allocation34_spill] sm:$0xff]  ;;  %v2247_v37 = vld [vmem:[%s4042_s15 + $0x30] sm:$0xff] }
 0x299   : > { %v1635_v28 = vadd.f32 %v3868_v4, %v1619_v63  ;;  %v2043_v24 = vadd.f32 %v2038_v51, %v2027_v19  ;;  %v1766_v56 = vadd.f32 %v3888_v6, %v1750_v23  ;;  %v1897_v15 = vadd.f32 %v1892_v0, %v1881_v58  ;;  %v2241_v57 = vld [vmem:[%s4042_s15] sm:$0xff] }
 0x29a   : > { %v2028_v25 = vadd.f32 %v4203_v38, %v2012_v10  ;;  %v2855_v55 = vpack.c.bf16 %v2242_v7, %v2241_v57  ;;  %v4209_v16 = vmov 0.0|0.0   ;;  %v2861_v40 = vpack.c.bf16 %v2246_v17, %v2245_v20  ;;  %v2569_v31 = vld [vmem:[%s4041_s14] ss:$0 sm:$0xff] }
 0x29b   : > { %v1651_v39 = vadd.f32 %v4204_v52, %v1635_v28  ;;  %v2053_v41 = vadd.f32 %v2043_v24, %v1928_v3  ;;  %v1782_v42 = vadd.f32 %v4205_v36, %v1766_v56  ;;  %v1913_v61 = vadd.f32 %v4206_v9, %v1897_v15 }
 0x29c   : > { %v2044_v53 = vadd.f32 %v4208_v43, %v2028_v25  ;;  %2856 = vmatpush3.bf16.msra.mxu1 %v2855_v55  ;;  %v2864_v18 = vpack.c.bf16 %v2248_v49, %v2247_v37 }
 0x29d   : > { %v1667_v27 = vadd.f32 %v4207_v50, %v1651_v39  ;;  %v2058_v4 = vadd.f32 %v2053_v41, %v2048_v11  ;;  %v1798_v44 = vadd.f32 %v1793_v13, %v1782_v42  ;;  %v1929_v1 = vadd.f32 %v1924_v8, %v1913_v61  ;;  %2857 = vmatprep.subr.bf16.mxu1 %v4209_v16 }
 0x29f   : > { %v2070_v29 = vadd.f32 %v4169_v54, %v2058_v4  ;;  %v2049_v6 = vadd.f32 %v1798_v44, %v1667_v27  ;;  %v2054_v30 = vadd.f32 %v2044_v53, %v1929_v1 }
 0x2a1   : > { %2762 = vmatmul.mubr.msk.f32.gmra.mrb[20].mxu0 %vm958_vm2, %v2070_v29  ;;  %v2059_v60 = vadd.f32 %v2054_v30, %v2049_v6 }
 0x2a2   : > { %2764 = vmatprep.mubr.msk.f32.mxu0 %vm2957_vm1, %v4190_v12 }
 0x2a3   : > { %v2071_v26 = vadd.f32 %v4169_v54, %v2059_v60  ;;  %v2243_v54 = vld [vmem:[%s4042_s15 + $0x10] sm:$0xff] }
 0x2a4   : > { %v2858_v35 = vpack.c.bf16 %v2244_v21, %v2243_v54  ;;  %v2361_v21 = vld [vmem:[%s3077_s21] sm:$0xff] }
 0x2a5   : > { %2765 = vmatmul.mubr.msk.f32.gmra.mrb[22].mxu0 %vm958_vm2, %v2071_v26 }
 0x2a6   : > { %2859 = vmatpush3.bf16.msra.mxu1 %v2858_v35 }
 0x2a7   : > { %2860 = vmatprep.subr.bf16.mxu1 %v4209_v16 }
 0x2aa   : > { %2862 = vmatpush3.bf16.msra.mxu1 %v2861_v40  ;;  %v2362_v40 = vld [vmem:[%s3077_s21 + $0x8] sm:$0xff] }
 0x2ab   : > { %2863 = vmatprep.subr.bf16.mxu1 %v4209_v16  ;;  %v2570_v16 = vld [vmem:[%s4043_s16] ss:$0 sm:$0xff] }
 0x2ae   : > { %2865 = vmatpush3.bf16.msra.mxu1 %v2864_v18 }
 0x2ca   : > { %v2724_v22 = vpop.f32.mrb[12].mxu0  ;;  %v2735_v48 = vpop.f32.mrb[12].mxu1 }
 0x2cb   : > { %v1421_v5 = vpop.f32.mrb[13].mxu0  ;;  %v1500_v45 = vpop.f32.mrb[13].mxu1 }
 0x33c   : > { %v2168_v2 = vpop.f32.mrb[14].mxu0 }
 0x33d   : > { %v2169_v46 = vadd.f32 %v2562_v32, %v2168_v2  ;;  %v2754_v14 = vpop.f32.mrb[15].mxu0  ;;  %v2363_v2 = vld [vmem:[%s3077_s21 + $0x10] sm:$0xff] }
 0x33f   : > { %v2199_v34 = vmul.f32 %v2568_v62, %v2169_v46 }
 0x341   : > { %v2211_v59 = vadd.f32 %v2569_v31, %v2199_v34  ;;  %v2364_v34 = vld [vmem:[%s3077_s21 + $0x18] sm:$0xff] }
 0x343   : > { %v2216_v33 = vmul.f32 0.5, %v2211_v59 }
 0x345   : > { %2922 = vtanh.f32 %v2216_v33 }
 0x34f   : > { %v2923_v47 = vpop.eup %2922 }
 0x350   : > { %v2226_v0 = vadd.f32 1.0, %v2923_v47 }
 0x351   : > { %v2173_v3 = vpop.f32.mrb[16].mxu0 }
 0x352   : > { %v2231_v51 = vmul.f32 0.5, %v2226_v0  ;;  %v2174_v63 = vadd.f32 %v2562_v32, %v2173_v3  ;;  %v2757_v19 = vpop.f32.mrb[17].mxu0  ;;  %v2365_v3 = vld [vmem:[%s3077_s21 + $0x20] sm:$0xff] }
 0x354   : > { %v2236_v23 = vmul.f32 %v2231_v51, %v2211_v59  ;;  %v2200_v58 = vmul.f32 %v2568_v62, %v2174_v63 }
 0x356   : > { %v2212_v10 = vadd.f32 %v2569_v31, %v2200_v58  ;;  %2784 = vmatmul.mubr.msk.f32.vlgmr.msra.gmra.mrb[14].mxu1 %vm958_vm2, %v2236_v23 }
 0x357   : > { %2786 = vmatprep.mubr.msk.f32.mxu1 %vm2957_vm1, %v4190_v12 }
 0x358   : > { %v2217_v11 = vmul.f32 0.5, %v2212_v10 }
 0x35a   : > { %2924 = vtanh.f32 %v2217_v11 }
 0x363   : > { %v2178_v28 = vpop.f32.mrb[18].mxu0 }
 0x364   : > { %v2179_v13 = vadd.f32 %v2562_v32, %v2178_v28  ;;  %v2760_v8 = vpop.f32.mrb[19].mxu0  ;;  %v2925_v24 = vpop.eup %2924 }
 0x365   : > { %v2227_v56 = vadd.f32 1.0, %v2925_v24 }
 0x366   : > { %v2201_v15 = vmul.f32 %v2568_v62, %v2179_v13 }
 0x367   : > { %v2232_v38 = vmul.f32 0.5, %v2227_v56 }
 0x368   : > { %v2213_v25 = vadd.f32 %v2569_v31, %v2201_v15 }
 0x369   : > { %v2237_v52 = vmul.f32 %v2232_v38, %v2212_v10 }
 0x36a   : > { %v2218_v39 = vmul.f32 0.5, %v2213_v25 }
 0x36b   : > { %2787 = vmatmul.mubr.msk.f32.gmra.mrb[16].mxu1 %vm958_vm2, %v2237_v52 }
 0x36c   : > { %2926 = vtanh.f32 %v2218_v39  ;;  %2789 = vmatprep.mubr.msk.f32.mxu1 %vm2957_vm1, %v4190_v12 }
 0x374   : > { %v2183_v41 = vpop.f32.mrb[20].mxu0 }
 0x375   : > { %v2184_v36 = vadd.f32 %v2562_v32, %v2183_v41  ;;  %v2763_v42 = vpop.f32.mrb[21].mxu0 }
 0x376   : > { %v2927_v9 = vpop.eup %2926 }
 0x377   : > { %v2228_v61 = vadd.f32 1.0, %v2927_v9  ;;  %v2202_v50 = vmul.f32 %v2568_v62, %v2184_v36 }
 0x378   : > { %v2188_v27 = vpop.f32.mrb[22].mxu0 }
 0x379   : > { %v2233_v4 = vmul.f32 0.5, %v2228_v61  ;;  %v2214_v44 = vadd.f32 %v2569_v31, %v2202_v50  ;;  %v2189_v1 = vadd.f32 %v2562_v32, %v2188_v27  ;;  %v2766_v43 = vpop.f32.mrb[23].mxu0 }
 0x37b   : > { %v2238_v53 = vmul.f32 %v2233_v4, %v2213_v25  ;;  %v2219_v29 = vmul.f32 0.5, %v2214_v44  ;;  %v2203_v6 = vmul.f32 %v2568_v62, %v2189_v1 }
 0x37d   : > { %2928 = vtanh.f32 %v2219_v29  ;;  %v2215_v30 = vadd.f32 %v2569_v31, %v2203_v6  ;;  %2790 = vmatmul.mubr.msk.f32.gmra.mrb[18].mxu1 %vm958_vm2, %v2238_v53 }
 0x37e   : > { %2792 = vmatprep.mubr.msk.f32.mxu1 %vm2957_vm1, %v4190_v12 }
 0x37f   : > { %v2220_v60 = vmul.f32 0.5, %v2215_v30 }
 0x381   : > { %2930 = vtanh.f32 %v2220_v60 }
 0x387   : > { %v2929_v26 = vpop.eup %2928 }
 0x388   : > { %v2229_v22 = vadd.f32 1.0, %v2929_v26 }
 0x38a   : > { %v2234_v48 = vmul.f32 0.5, %v2229_v22 }
 0x38b   : > { %v2931_v5 = vpop.eup %2930 }
 0x38c   : > { %v2239_v45 = vmul.f32 %v2234_v48, %v2214_v44  ;;  %v2230_v57 = vadd.f32 1.0, %v2931_v5 }
 0x38e   : > { %v2235_v7 = vmul.f32 0.5, %v2230_v57  ;;  %2793 = vmatmul.mubr.msk.f32.gmra.mrb[20].mxu1 %vm958_vm2, %v2239_v45 }
 0x38f   : > { %2795 = vmatprep.mubr.msk.f32.mxu1 %vm2957_vm1, %v4190_v12 }
 0x390   : > { %v2240_v55 = vmul.f32 %v2235_v7, %v2215_v30 }
 0x392   : > { %2796 = vmatmul.mubr.msk.f32.gmra.mrb[22].mxu1 %vm958_vm2, %v2240_v55 }
 0x429   : > { %v2337_v54 = vpop.f32.mrb[14].mxu1 }
 0x42a   : > { %v2338_v35 = vadd.f32 %v2570_v16, %v2337_v54  ;;  %v2785_v20 = vpop.f32.mrb[15].mxu1 }
 0x42c   : > { %v2366_v17 = vadd.f32 %v2361_v21, %v2338_v35 }
 0x42e   : > { %2371 = vst.msk [vmem:[%s700_s29] sm:$0xff] %vm708_vm0, %v2366_v17 }
 0x43e   : > { %v2342_v12 = vpop.f32.mrb[16].mxu1 }
 0x43f   : > { %v2343_v37 = vadd.f32 %v2570_v16, %v2342_v12  ;;  %v2788_v49 = vpop.f32.mrb[17].mxu1 }
 0x441   : > { %v2367_v18 = vadd.f32 %v2362_v40, %v2343_v37 }
 0x443   : > { %2372 = vst.msk [vmem:[%s700_s29 + $0x8] sm:$0xff] %vm708_vm0, %v2367_v18 }
 0x450   : > { %v2347_v32 = vpop.f32.mrb[18].mxu1 }
 0x451   : > { %v2348_v62 = vadd.f32 %v2570_v16, %v2347_v32  ;;  %v2791_v46 = vpop.f32.mrb[19].mxu1 }
 0x453   : > { %v2368_v14 = vadd.f32 %v2363_v2, %v2348_v62 }
 0x455   : > { %2373 = vst.msk [vmem:[%s700_s29 + $0x10] sm:$0xff] %vm708_vm0, %v2368_v14 }
 0x461   : > { %v2352_v31 = vpop.f32.mrb[20].mxu1 }
 0x462   : > { %v2353_v59 = vadd.f32 %v2570_v16, %v2352_v31  ;;  %v2794_v33 = vpop.f32.mrb[21].mxu1 }
 0x464   : > { %v2369_v47 = vadd.f32 %v2364_v34, %v2353_v59 }
 0x465   : > { %v2357_v0 = vpop.f32.mrb[22].mxu1 }
 0x466   : > { %2374 = vst.msk [vmem:[%s700_s29 + $0x18] sm:$0xff] %vm708_vm0, %v2369_v47  ;;  %v2358_v51 = vadd.f32 %v2570_v16, %v2357_v0  ;;  %v2797_v63 = vpop.f32.mrb[23].mxu1 }
 0x468   : > { %v2370_v19 = vadd.f32 %v2365_v3, %v2358_v51 }
 0x46a   : > { %2375 = vst.msk [vmem:[%s700_s29 + $0x20] sm:$0xff] %vm708_vm0, %v2370_v19 }
 0x46b PF: > { %s27_s26 = sadd.s32 1, %s2954_s26   ;;  %s4210_s24 = smov %s2950_s25 }
 0x46c   : > { %p24_p5 = scmp.ge.s32.totalorder %s27_s26, 4   ;;  %s4211_s25 = smov %s4213_s27 }
 0x46e   :  { %26 = sbr.rel (!%p24_p5) target bundleno = 3 (0x3), region = 124 }

// kernel: tpu_custom_call.1
= control target key start
LH: loop header
LB: loop body
LE: loop exit
PB: predicated region body
PF: predicated region fallthrough
CT: control target
= control target key end

     0   :  { %s3049_s24 = smov 0   ;;  %s3051_s25 = smov 0   ;;  %s4027_s0 = inlined_call_operand.vmem [shape: f32[2,40,32], index: 0, kind: input, shape index: {}]   ;;  %s4028_s1 = inlined_call_operand.vmem [shape: f32[2,40,32], index: 1, kind: input, shape index: {}]   ;;  %s4029_s2 = inlined_call_operand.vmem [shape: f32[2,40,32], index: 2, kind: input, shape index: {}]   ;;  %s4030_s3 = inlined_call_operand.vmem [shape: f32[1,32], index: 3, kind: input, shape index: {}]   ;;  %s4031_s4 = inlined_call_operand.vmem [shape: f32[1,32], index: 4, kind: input, shape index: {}]   ;;  %s4032_s5 = inlined_call_operand.vmem [shape: f32[32,64], index: 5, kind: input, shape index: {}]   ;;  %s4033_s6 = inlined_call_operand.vmem [shape: f32[1,64], index: 6, kind: input, shape index: {}]   ;;  %s4034_s7 = inlined_call_operand.vmem [shape: f32[32,64], index: 7, kind: input, shape index: {}]   ;;  %s4035_s8 = inlined_call_operand.vmem [shape: f32[1,64], index: 8, kind: input, shape index: {}]   ;;  %s4036_s9 = inlined_call_operand.vmem [shape: f32[31,64], index: 9, kind: input, shape index: {}]   ;;  %s4037_s10 = inlined_call_operand.vmem [shape: f32[1,64], index: 10, kind: input, shape index: {}]   ;;  %s4038_s11 = inlined_call_operand.vmem [shape: f32[64,64], index: 11, kind: input, shape index: {}]   ;;  %s4039_s12 = inlined_call_operand.vmem [shape: f32[1,64], index: 12, kind: input, shape index: {}]   ;;  %s4040_s13 = inlined_call_operand.vmem [shape: f32[1,64], index: 13, kind: input, shape index: {}]   ;;  %s4041_s14 = inlined_call_operand.vmem [shape: f32[1,64], index: 14, kind: input, shape index: {}]   ;;  %s4042_s15 = inlined_call_operand.vmem [shape: f32[64,32], index: 15, kind: input, shape index: {}]   ;;  %s4043_s16 = inlined_call_operand.vmem [shape: f32[1,32], index: 16, kind: input, shape index: {}]   ;;  %s4044_s17 = inlined_call_operand.vmem [shape: f32[2,40,32], index: 17, kind: output, shape index: {}]  }
   0x1   :  { %4097 = sst [smem:[#allocation41_spill]] %s4027_s0  ;;  %s3053_s26 = smov 0  }
   0x2   :  { %4098 = sst [smem:[#allocation42_spill]] %s4028_s1 }
   0x3 LB: > { %s39_s27 = sadd.s32 1, %s2950_s25  ;;  %p2503_p0 = scmp.ge.s32.totalorder %s2954_s26, 1  ;;  %s2954_s26 = sphi %s3053_s26, %s27_s26   ;;  %s2950_s25 = sphi %s3051_s25, %s4211_s25   ;;  %s2946_s24 = sphi %s3049_s24, %s4210_s24  }
   0x4   : > { %p41_p1 = scmp.ge.s32.totalorder %s39_s27, 2  ;;  %p566_p2 = scmp.lt.s32.totalorder %s2954_s26, 3 }
   0x6   : > { %s4213_s27 = smov (%p41_p1, %s39_s27), 0  ;;  %p567_p3 = pnand %p2503_p0, %p566_p2 }
   0x8   : > { %570 = sbr.rel (%p567_p3) target bundleno = 1131 (0x46b), region = 88 }
   0xf   : > { %p654_p4 = scmp.lt.s32.totalorder %s2946_s24, 1  ;;  %vm708_vm0 = vcmask 261120   ;;  %s4099_s30 = sld [smem:[#allocation41_spill]]  ;;  %v752_v53 = vld [vmem:[%s4032_s5] sm:$0xff]  ;;  %v753_v54 = vld [vmem:[%s4032_s5 + $0x8] sm:$0xff]  ;;  %v754_v59 = vld [vmem:[%s4032_s5 + $0x10] sm:$0xff] }
  0x10   : > { %s4100_s20 = sld [smem:[#allocation42_spill]]  ;;  %v843_v55 = vld [vmem:[%s4034_s7] sm:$0xff]  ;;  %v3144_v56 = vpack.c.bf16 %v753_v54, %v752_v53  ;;  %v844_v57 = vld [vmem:[%s4034_s7 + $0x8] sm:$0xff]  ;;  %v755_v60 = vld [vmem:[%s4032_s5 + $0x18] sm:$0xff]  ;;  %vm2957_vm1 = vmmov 0   ;;  %v4047_v53 = vmov 0.0  }
  0x11   : > { %s4215_s24 = smov (!%p654_p4, %s2946_s24), 1  ;;  %v3149_v58 = vpack.c.bf16 %v844_v57, %v843_v55  ;;  %v845_v61 = vld [vmem:[%s4034_s7 + $0x10] sm:$0xff]  ;;  %v3164_v62 = vpack.c.bf16 %v755_v60, %v754_v59  ;;  %v846_v63 = vld [vmem:[%s4034_s7 + $0x18] sm:$0xff]  ;;  %vm958_vm2 = vcmask 523264  }
  0x12   : > { %s3067_s28 = smul.u32 40, %s4215_s24  ;;  %2799 = vmatprep.subr.bf16.mxu0 %v3144_v56  ;;  %959 = vst.msk [vmem:[#allocation2] sm:$0xff] %vm958_vm2, %v4047_v53  ;;  %960 = vst.msk [vmem:[#allocation2 + $0x8] sm:$0xff] %vm958_vm2, %v4047_v53 }
  0x13   : > { %2807 = vmatprep.subr.bf16.mxu1 %v3149_v58  ;;  %2801 = vmatpush3.bf16.msra.mxu0 %v3144_v56  ;;  %1535 = vst.msk [vmem:[#allocation2 + $0x38] sm:$0xff] %vm958_vm2, %v4047_v53  ;;  %1536 = vst.msk [vmem:[#allocation2 + $0x40] sm:$0xff] %vm958_vm2, %v4047_v53 }
  0x14   : > { %s687_s24 = scalar_lea.vmem %s4029_s2, %s3067_s28  ;;  %2809 = vmatpush3.bf16.msra.mxu1 %v3149_v58  ;;  %2803 = vmatprep.subr.bf16.mxu0 %v3164_v62  ;;  %s700_s29 = scalar_lea.vmem %s4044_s17, %s3067_s28 }
  0x15   : > { %s661_s18 = scalar_lea.vmem %s4099_s30, %s3067_s28  ;;  %v3129_v48 = vld [vmem:[%s687_s24] sm:$0xff]  ;;  %v1314_v49 = vld [vmem:[%s687_s24 + $0x8] sm:$0xff] }
  0x16   : > { %s3077_s21 = scalar_lea.vmem %s4100_s20, %s3067_s28  ;;  %v706_v0 = vld [vmem:[%s661_s18 + $0x18] sm:$0xff]  ;;  %v707_v2 = vld [vmem:[%s661_s18 + $0x20] sm:$0xff]  ;;  %v1315_v51 = vsel %vm708_vm0, %v3129_v48, 0.0  ;;  %v1318_v52 = vsel %vm708_vm0, %v1314_v49, 0.0 }
  0x17   : > { %v961_v1 = vld [vmem:[%s3077_s21] sm:$0xff]  ;;  %v709_v3 = vsel %vm708_vm0, %v706_v0, 0.0  ;;  %v962_v5 = vld [vmem:[%s3077_s21 + $0x8] sm:$0xff]  ;;  %v712_v6 = vsel %vm708_vm0, %v707_v2, 0.0  ;;  %v963_v8 = vld [vmem:[%s3077_s21 + $0x10] sm:$0xff]  ;;  %2805 = vmatpush3.bf16.msra.mxu0 %v3164_v62 }
  0x18   : > { %v966_v4 = vsel %vm708_vm0, %v961_v1, 0.0  ;;  %710 = vadd.xlane.f32.xlu0 %v709_v3  ;;  %v969_v7 = vsel %vm708_vm0, %v962_v5, 0.0  ;;  %v964_v9 = vld [vmem:[%s3077_s21 + $0x18] sm:$0xff]  ;;  %v972_v10 = vsel %vm708_vm0, %v963_v8, 0.0  ;;  %v965_v12 = vld [vmem:[%s3077_s21 + $0x20] sm:$0xff] }
  0x19   : > { %967 = vadd.xlane.f32.xlu1 %v966_v4  ;;  %v975_v11 = vsel %vm708_vm0, %v964_v9, 0.0  ;;  %v978_v13 = vsel %vm708_vm0, %v965_v12, 0.0 }
  0x1c   : > { %713 = vadd.xlane.f32.xlu0 %v712_v6 }
  0x1d   : > { %970 = vadd.xlane.f32.xlu1 %v969_v7 }
  0x20   : > { %973 = vadd.xlane.f32.xlu0 %v972_v10 }
  0x21   : > { %976 = vadd.xlane.f32.xlu1 %v975_v11 }
  0x24   : > { %979 = vadd.xlane.f32.xlu0 %v978_v13 }
  0xa5   : > { %v711_v14 = vpop.xlane.xlu0 %710 }
  0xa6   : > { %v968_v15 = vpop.xlane.xlu1 %967  ;;  %v716_v16 = vmul.f32 0.03125, %v711_v14 }
  0xa7   : > { %v981_v17 = vmul.f32 0.03125, %v968_v15 }
  0xa8   : > { %v3091_v18 = vsub.f32 %v706_v0, %v716_v16  ;;  %v3169_v0 = vpack.c.bf16 %v846_v63, %v845_v61 }
  0xa9   : > { %v3093_v19 = vsub.f32 %v961_v1, %v981_v17  ;;  %v714_v20 = vpop.xlane.xlu0 %713  ;;  %v4045_v1 = vmov 0.0|0.0  }
  0xaa   : > { %v971_v21 = vpop.xlane.xlu1 %970  ;;  %v717_v22 = vmul.f32 0.03125, %v714_v20  ;;  %v720_v24 = vmul.f32 %v3091_v18, %v3091_v18  ;;  %2811 = vmatprep.subr.bf16.mxu1 %v3169_v0  ;;  %2814 = vmatprep.subr.bf16.mxu0 %v4045_v1 }
  0xab   : > { %v982_v23 = vmul.f32 0.03125, %v971_v21  ;;  %v991_v25 = vmul.f32 %v3093_v19, %v3093_v19  ;;  %2813 = vmatpush3.bf16.msra.mxu1 %v3169_v0  ;;  %v3180_v21 = vld [vmem:[%s4030_s3] ss:$0 sm:$0xff] }
  0xac   : > { %v3099_v26 = vsub.f32 %v707_v2, %v717_v22  ;;  %v722_v28 = vsel %vm708_vm0, %v720_v24, 0.0  ;;  %2820 = vmatprep.subr.bf16.mxu1 %v4045_v1 }
  0xad   : > { %v3101_v27 = vsub.f32 %v962_v5, %v982_v23  ;;  %723 = vadd.xlane.f32.xlu1 %v722_v28  ;;  %v974_v29 = vpop.xlane.xlu0 %973  ;;  %v996_v31 = vsel %vm708_vm0, %v991_v25, 0.0 }
  0xae   : > { %v977_v30 = vpop.xlane.xlu1 %976  ;;  %v983_v32 = vmul.f32 0.03125, %v974_v29  ;;  %v721_v34 = vmul.f32 %v3099_v26, %v3099_v26 }
  0xaf   : > { %v984_v33 = vmul.f32 0.03125, %v977_v30  ;;  %v992_v35 = vmul.f32 %v3101_v27, %v3101_v27 }
  0xb0   : > { %v3109_v36 = vsub.f32 %v963_v8, %v983_v32  ;;  %v725_v38 = vsel %vm708_vm0, %v721_v34, 0.0 }
  0xb1   : > { %v3111_v37 = vsub.f32 %v964_v9, %v984_v33  ;;  %997 = vadd.xlane.f32.xlu1 %v996_v31  ;;  %726 = vadd.xlane.f32.xlu0 %v725_v38  ;;  %v980_v39 = vpop.xlane.xlu0 %979  ;;  %v999_v41 = vsel %vm708_vm0, %v992_v35, 0.0  ;;  %v3186_v31 = vld [vmem:[%s4031_s4] ss:$0 sm:$0xff] }
  0xb2   : > { %v985_v40 = vmul.f32 0.03125, %v980_v39  ;;  %v993_v42 = vmul.f32 %v3109_v36, %v3109_v36 }
  0xb3   : > { %v994_v43 = vmul.f32 %v3111_v37, %v3111_v37 }
  0xb4   : > { %v3119_v44 = vsub.f32 %v965_v12, %v985_v40  ;;  %v1002_v45 = vsel %vm708_vm0, %v993_v42, 0.0 }
  0xb5   : > { %1000 = vadd.xlane.f32.xlu0 %v999_v41  ;;  %1003 = vadd.xlane.f32.xlu1 %v1002_v45  ;;  %v1005_v46 = vsel %vm708_vm0, %v994_v43, 0.0 }
  0xb6   : > { %v995_v47 = vmul.f32 %v3119_v44, %v3119_v44 }
  0xb8   : > { %v1008_v50 = vsel %vm708_vm0, %v995_v47, 0.0 }
  0xb9   : > { %1006 = vadd.xlane.f32.xlu0 %v1005_v46  ;;  %1009 = vadd.xlane.f32.xlu1 %v1008_v50 }
  0xbd   : > { %1316 = vadd.xlane.f32.xlu0 %v1315_v51  ;;  %1319 = vadd.xlane.f32.xlu1 %v1318_v52 }
 0x13a   : > { %v724_v2 = vpop.xlane.xlu1 %723 }
 0x13b   : > { %v728_v3 = vmul.f32 0.03125, %v724_v2 }
 0x13d   : > { %v730_v4 = vadd.f32 1e-05, %v728_v3 }
 0x13e   : > { %v998_v5 = vpop.xlane.xlu1 %997  ;;  %v727_v6 = vpop.xlane.xlu0 %726 }
 0x13f   : > { %2894 = vrsqrt.f32 %v730_v4  ;;  %v1011_v7 = vmul.f32 0.03125, %v998_v5  ;;  %v729_v8 = vmul.f32 0.03125, %v727_v6 }
 0x141   : > { %v731_v9 = vadd.f32 1e-05, %v729_v8  ;;  %v1016_v10 = vadd.f32 1e-05, %v1011_v7 }
 0x142   : > { %v1004_v11 = vpop.xlane.xlu1 %1003  ;;  %v1001_v12 = vpop.xlane.xlu0 %1000 }
 0x143   : > { %v1012_v13 = vmul.f32 0.03125, %v1001_v12  ;;  %2896 = vrsqrt.f32 %v731_v9  ;;  %v1013_v14 = vmul.f32 0.03125, %v1004_v11  ;;  %v2072_v12 = vld [vmem:[%s4038_s11] sm:$0xff] }
 0x144   : > { %2898 = vrsqrt.f32 %v1016_v10 }
 0x145   : > { %v1017_v15 = vadd.f32 1e-05, %v1012_v13  ;;  %v1018_v22 = vadd.f32 1e-05, %v1013_v14  ;;  %v2073_v13 = vld [vmem:[%s4038_s11 + $0x8] sm:$0xff] }
 0x146   : > { %v1010_v16 = vpop.xlane.xlu1 %1009  ;;  %v1007_v17 = vpop.xlane.xlu0 %1006 }
 0x147   : > { %2900 = vrsqrt.f32 %v1017_v15  ;;  %v1014_v23 = vmul.f32 0.03125, %v1007_v17  ;;  %v1015_v38 = vmul.f32 0.03125, %v1010_v16  ;;  %v2843_v17 = vpack.c.bf16 %v2073_v13, %v2072_v12  ;;  %v3351_v12 = vld [vmem:[%s4036_s9 + $0x5] ss:$0 sm:$0xff] }
 0x148   : > { %2902 = vrsqrt.f32 %v1018_v22  ;;  %v2075_v22 = vld [vmem:[%s4038_s11 + $0x18] sm:$0xff] }
 0x149   : > { %v2895_v20 = vpop.eup %2894  ;;  %v1019_v39 = vadd.f32 1e-05, %v1014_v23  ;;  %v2076_v23 = vld [vmem:[%s4038_s11 + $0x20] sm:$0xff] }
 0x14a   : > { %v1320_v24 = vpop.xlane.xlu1 %1319  ;;  %v1317_v25 = vpop.xlane.xlu0 %1316  ;;  %v734_v28 = vmul.f32 %v2895_v20, %v3091_v18  ;;  %v2074_v20 = vld [vmem:[%s4038_s11 + $0x10] sm:$0xff] }
 0x14b   : > { %v1322_v29 = vmul.f32 0.03125, %v1320_v24  ;;  %v1321_v30 = vmul.f32 0.03125, %v1317_v25  ;;  %2904 = vrsqrt.f32 %v1019_v39  ;;  %v2077_v24 = vld [vmem:[%s4038_s11 + $0x28] sm:$0xff] }
 0x14c   : > { %v742_v32 = vmul.f32 %v3180_v21, %v734_v28  ;;  %v2849_v25 = vpack.c.bf16 %v2077_v24, %v2076_v23  ;;  %v2078_v28 = vld [vmem:[%s4038_s11 + $0x30] sm:$0xff] }
 0x14d   : > { %v3189_v33 = vsub.f32 %v1314_v49, %v1322_v29  ;;  %v3192_v34 = vsub.f32 %v3129_v48, %v1321_v30  ;;  %v2897_v35 = vpop.eup %2896  ;;  %v1020_v48 = vadd.f32 1e-05, %v1015_v38  ;;  %v2079_v29 = vld [vmem:[%s4038_s11 + $0x38] sm:$0xff] }
 0x14e   : > { %v750_v18 = vadd.f32 %v3186_v31, %v742_v32  ;;  %v735_v42 = vmul.f32 %v2897_v35, %v3099_v26  ;;  %v2899_v43 = vpop.eup %2898  ;;  %v2852_v30 = vpack.c.bf16 %v2079_v29, %v2078_v28  ;;  %v2513_v35 = vld [vmem:[%s4035_s8] ss:$0 sm:$0xff]  ;;  %v3373_v28 = vld [vmem:[%s4036_s9 + $0x7] ss:$0 sm:$0xff]  ;;  %v1946_v29 = vld [vmem:[#allocation2 + $0x8] sm:$0xff] }
 0x14f   : > { %v1326_v40 = vmul.f32 %v3189_v33, %v3189_v33  ;;  %v1325_v41 = vmul.f32 %v3192_v34, %v3192_v34  ;;  %v1026_v49 = vmul.f32 %v2899_v43, %v3093_v19  ;;  %2906 = vrsqrt.f32 %v1020_v48  ;;  %4103 = vst [vmem:[#allocation5_spill] sm:$0xff] %v3373_v28 }
 0x150   : > { %2654 = vmatprep.mubr.msk.f32.mxu0 %vm708_vm0, %v750_v18  ;;  %2665 = vmatprep.mubr.msk.f32.mxu1 %vm708_vm0, %v750_v18  ;;  %v743_v47 = vmul.f32 %v3180_v21, %v735_v42 }
 0x151   : > { %v1330_v45 = vsel %vm708_vm0, %v1326_v40, 0.0  ;;  %v1327_v46 = vsel %vm708_vm0, %v1325_v41, 0.0  ;;  %v2901_v26 = vpop.eup %2900  ;;  %v1031_v51 = vmul.f32 %v3180_v21, %v1026_v49 }
 0x152   : > { %1331 = vadd.xlane.f32.xlu1 %v1330_v45  ;;  %1328 = vadd.xlane.f32.xlu0 %v1327_v46  ;;  %v751_v50 = vadd.f32 %v3186_v31, %v743_v47  ;;  %v1027_v19 = vmul.f32 %v2901_v26, %v3101_v27  ;;  %v2903_v52 = vpop.eup %2902 }
 0x153   : > { %v1036_v54 = vadd.f32 %v3186_v31, %v1031_v51  ;;  %v1028_v57 = vmul.f32 %v2903_v52, %v3109_v36 }
 0x154   : > { %2655 = vmatmul.mubr.msk.f32.vlgmr.msra.gmra.mrb[0].mxu0 %vm708_vm0, %v751_v50  ;;  %2666 = vmatmul.mubr.msk.f32.vlgmr.msra.gmra.mrb[0].mxu1 %vm708_vm0, %v751_v50  ;;  %v1032_v55 = vmul.f32 %v3180_v21, %v1027_v19 }
 0x155   : > { %2816 = vmatpush3.bf16.msra.mxu0 %v3144_v56  ;;  %2822 = vmatpush3.bf16.msra.mxu1 %v3149_v58  ;;  %v2905_v27 = vpop.eup %2904  ;;  %v1033_v60 = vmul.f32 %v3180_v21, %v1028_v57 }
 0x156   : > { %2817 = vmatprep.subr.bf16.mxu0 %v4045_v1  ;;  %2823 = vmatprep.subr.bf16.mxu1 %v4045_v1  ;;  %v1037_v59 = vadd.f32 %v3186_v31, %v1032_v55  ;;  %v1029_v36 = vmul.f32 %v2905_v27, %v3111_v37 }
 0x157   : > { %2676 = vmatprep.mubr.msk.f32.mxu0 %vm2957_vm1, %v4047_v53  ;;  %2699 = vmatprep.mubr.msk.f32.mxu1 %vm2957_vm1, %v4047_v53  ;;  %v1038_v37 = vadd.f32 %v3186_v31, %v1033_v60 }
 0x159   : > { %2819 = vmatpush3.bf16.msra.mxu0 %v3164_v62  ;;  %2825 = vmatpush3.bf16.msra.mxu1 %v3169_v0  ;;  %v2907_v61 = vpop.eup %2906 }
 0x15a   : > { %2827 = vmatprep.subr.bf16.mxu0 %v3144_v56  ;;  %2835 = vmatprep.subr.bf16.mxu1 %v3149_v58 }
 0x15c   : > { %2677 = vmatmul.mubr.msk.f32.vlgmr.msra.gmra.mrb[2].mxu0 %vm708_vm0, %v1036_v54  ;;  %2700 = vmatmul.mubr.msk.f32.vlgmr.msra.gmra.mrb[2].mxu1 %vm708_vm0, %v1036_v54 }
 0x15d   : > { %2679 = vmatprep.mubr.msk.f32.mxu0 %vm2957_vm1, %v4047_v53  ;;  %2702 = vmatprep.mubr.msk.f32.mxu1 %vm2957_vm1, %v4047_v53 }
 0x15e   : > { %2829 = vmatpush3.bf16.msra.mxu0 %v3144_v56  ;;  %2837 = vmatpush3.bf16.msra.mxu1 %v3149_v58  ;;  %v1034_v56 = vmul.f32 %v3180_v21, %v1029_v36  ;;  %v1030_v58 = vmul.f32 %v2907_v61, %v3119_v44  ;;  %v3328_v61 = vld [vmem:[%s4033_s6] ss:$0 sm:$0xff] }
 0x15f   : > { %2831 = vmatprep.subr.bf16.mxu0 %v3164_v62  ;;  %2839 = vmatprep.subr.bf16.mxu1 %v3169_v0 }
 0x160   : > { %2680 = vmatmul.mubr.msk.f32.gmra.mrb[4].mxu0 %vm708_vm0, %v1037_v59  ;;  %2703 = vmatmul.mubr.msk.f32.gmra.mrb[4].mxu1 %vm708_vm0, %v1037_v59  ;;  %v1039_v44 = vadd.f32 %v3186_v31, %v1034_v56 }
 0x161   : > { %2682 = vmatprep.mubr.msk.f32.mxu0 %vm2957_vm1, %v4047_v53  ;;  %2705 = vmatprep.mubr.msk.f32.mxu1 %vm2957_vm1, %v4047_v53 }
 0x162   : > { %2833 = vmatpush3.bf16.msra.mxu0 %v3164_v62  ;;  %2841 = vmatpush3.bf16.msra.mxu1 %v3169_v0  ;;  %v1035_v62 = vmul.f32 %v3180_v21, %v1030_v58 }
 0x163   : > { %2842 = vmatprep.subr.bf16.mxu0 %v4045_v1  ;;  %2854 = vmatprep.subr.bf16.mxu1 %v4045_v1 }
 0x164   : > { %2683 = vmatmul.mubr.msk.f32.gmra.mrb[6].mxu0 %vm708_vm0, %v1038_v37  ;;  %2706 = vmatmul.mubr.msk.f32.gmra.mrb[6].mxu1 %vm708_vm0, %v1038_v37  ;;  %v1040_v63 = vadd.f32 %v3186_v31, %v1035_v62 }
 0x165   : > { %2685 = vmatprep.mubr.msk.f32.mxu0 %vm2957_vm1, %v4047_v53  ;;  %2708 = vmatprep.mubr.msk.f32.mxu1 %vm2957_vm1, %v4047_v53 }
 0x168   : > { %2686 = vmatmul.mubr.msk.f32.gmra.mrb[8].mxu0 %vm708_vm0, %v1039_v44  ;;  %2709 = vmatmul.mubr.msk.f32.gmra.mrb[8].mxu1 %vm708_vm0, %v1039_v44 }
 0x169   : > { %2688 = vmatprep.mubr.msk.f32.mxu0 %vm2957_vm1, %v4047_v53  ;;  %2711 = vmatprep.mubr.msk.f32.mxu1 %vm2957_vm1, %v4047_v53 }
 0x16c   : > { %2689 = vmatmul.mubr.msk.f32.gmra.mrb[10].mxu0 %vm708_vm0, %v1040_v63  ;;  %2712 = vmatmul.mubr.msk.f32.gmra.mrb[10].mxu1 %vm708_vm0, %v1040_v63 }
 0x1df   : > { %v1332_v0 = vpop.xlane.xlu1 %1331  ;;  %v1329_v2 = vpop.xlane.xlu0 %1328 }
 0x1e0   : > { %v1334_v3 = vmul.f32 0.03125, %v1332_v0  ;;  %v1333_v4 = vmul.f32 0.03125, %v1329_v2 }
 0x1e2   : > { %v1336_v5 = vadd.f32 1e-05, %v1334_v3  ;;  %v1335_v6 = vadd.f32 1e-05, %v1333_v4  ;;  %v3336_v4 = vld [vmem:[%s4036_s9] ss:$0 sm:$0xff] }
 0x1e3   : > { %4101 = vst [vmem:[#allocation3_spill] sm:$0xff] %v3336_v4 }
 0x1e4   : > { %2908 = vrsqrt.f32 %v1336_v5  ;;  %v1538_v5 = vld [vmem:[#allocation2 + $0x1] sm:$0xff] }
 0x1e5   : > { %2910 = vrsqrt.f32 %v1335_v6  ;;  %v3341_v6 = vld [vmem:[%s4036_s9 + $0x4] ss:$0 sm:$0xff] }
 0x1ee   : > { %v2909_v7 = vpop.eup %2908 }
 0x1ef   : > { %v2911_v8 = vpop.eup %2910  ;;  %v1340_v9 = vmul.f32 %v2909_v7, %v3189_v33  ;;  %v1553_v7 = vld [vmem:[#allocation2 + $0x5] sm:$0xff] }
 0x1f0   : > { %v1339_v10 = vmul.f32 %v2911_v8, %v3192_v34 }
 0x1f1   : > { %v1342_v11 = vmul.f32 %v3180_v21, %v1340_v9 }
 0x1f2   : > { %v1341_v14 = vmul.f32 %v3180_v21, %v1339_v10  ;;  %v2846_v21 = vpack.c.bf16 %v2075_v22, %v2074_v20  ;;  %v3346_v10 = vld [vmem:[%s4036_s9 + $0x1] ss:$0 sm:$0xff]  ;;  %v3361_v20 = vld [vmem:[%s4036_s9 + $0x6] ss:$0 sm:$0xff]  ;;  %v1815_v22 = vld [vmem:[#allocation2 + $0x7] sm:$0xff] }
 0x1f3   : > { %v1344_v15 = vadd.f32 %v3186_v31, %v1342_v11  ;;  %v1669_v11 = vld [vmem:[#allocation2 + $0x2] sm:$0xff] }
 0x1f4   : > { %v1343_v16 = vadd.f32 %v3186_v31, %v1341_v14 }
 0x1f6   : > { %2722 = vmatprep.mubr.msk.f32.mxu0 %vm708_vm0, %v1343_v16  ;;  %2733 = vmatprep.mubr.msk.f32.mxu1 %vm708_vm0, %v1343_v16  ;;  %v3356_v16 = vld [vmem:[%s4036_s9 + $0x2] ss:$0 sm:$0xff] }
 0x1f7   : > { %2723 = vmatmul.mubr.msk.f32.vlgmr.msra.gmra.mrb[12].mxu0 %vm708_vm0, %v1344_v15  ;;  %2734 = vmatmul.mubr.msk.f32.vlgmr.msra.gmra.mrb[12].mxu1 %vm708_vm0, %v1344_v15  ;;  %v1684_v15 = vld [vmem:[#allocation2 + $0x6] sm:$0xff] }
 0x1f8   : > { %2844 = vmatpush3.bf16.msra.mxu0 %v2843_v17  ;;  %2752 = vmatprep.mubr.msk.f32.mxu0 %vm2957_vm1, %v4047_v53  ;;  %v1800_v17 = vld [vmem:[#allocation2 + $0x3] sm:$0xff] }
 0x1f9   : > { %2845 = vmatprep.subr.bf16.mxu0 %v4045_v1  ;;  %2783 = vmatprep.mubr.msk.f32.mxu1 %vm2957_vm1, %v4047_v53 }
 0x1fc   : > { %2847 = vmatpush3.bf16.msra.mxu0 %v2846_v21  ;;  %v3366_v21 = vld [vmem:[%s4036_s9 + $0x3] ss:$0 sm:$0xff] }
 0x1fd   : > { %2848 = vmatprep.subr.bf16.mxu0 %v4045_v1  ;;  %4102 = vst [vmem:[#allocation4_spill] sm:$0xff] %v3366_v21 }
 0x200   : > { %2850 = vmatpush3.bf16.msra.mxu0 %v2849_v25  ;;  %v1931_v25 = vld [vmem:[#allocation2 + $0x4] sm:$0xff] }
 0x201   : > { %2851 = vmatprep.subr.bf16.mxu0 %v4045_v1 }
 0x204   : > { %2853 = vmatpush3.bf16.msra.mxu0 %v2852_v30 }
 0x227   : > { %v2656_v31 = vpop.f32.mrb[0].mxu0  ;;  %v2667_v32 = vpop.f32.mrb[0].mxu1 }
 0x228   : > { %v834_v33 = vpop.f32.mrb[1].mxu0  ;;  %v919_v34 = vpop.f32.mrb[1].mxu1  ;;  %v1547_v31 = vmul.f32 %v3336_v4, %v1538_v5  ;;  %v1562_v32 = vmul.f32 %v3341_v6, %v1553_v7 }
 0x229   : > { %v1678_v33 = vmul.f32 %v3346_v10, %v1669_v11  ;;  %v1693_v34 = vmul.f32 %v3351_v12, %v1684_v15 }
 0x22f   : > { %v1126_v38 = vpop.f32.mrb[2].mxu0  ;;  %v1220_v39 = vpop.f32.mrb[2].mxu1 }
 0x230   : > { %v1221_v18 = vadd.f32 %v2513_v35, %v1220_v39  ;;  %v2678_v40 = vpop.f32.mrb[3].mxu0  ;;  %v2701_v41 = vpop.f32.mrb[3].mxu1  ;;  %v1127_v2 = vadd.f32 %v3328_v61, %v1126_v38  ;;  %v1809_v39 = vmul.f32 %v3356_v16, %v1800_v17  ;;  %v3465_v17 = vld [vmem:[%s4036_s9 + $0x11] ss:$0 sm:$0xff] }
 0x231   : > { %v3384_v40 = vld [vmem:[%s4036_s9 + $0x8] ss:$0 sm:$0xff]  ;;  %v3389_v41 = vld [vmem:[%s4036_s9 + $0x9] ss:$0 sm:$0xff] }
 0x232   : > { %v1244_v42 = vmul.f32 0.5, %v1221_v18  ;;  %v1824_v18 = vmul.f32 %v3361_v20, %v1815_v22 }
 0x233   : > { %v1131_v43 = vpop.f32.mrb[4].mxu0  ;;  %v1225_v45 = vpop.f32.mrb[4].mxu1 }
 0x234   : > { %2912 = vtanh.f32 %v1244_v42  ;;  %v1226_v46 = vadd.f32 %v2513_v35, %v1225_v45  ;;  %v2681_v47 = vpop.f32.mrb[5].mxu0  ;;  %v2704_v48 = vpop.f32.mrb[5].mxu1  ;;  %v1132_v23 = vadd.f32 %v3328_v61, %v1131_v43  ;;  %v1940_v42 = vmul.f32 %v3366_v21, %v1931_v25 }
 0x235   : > { %v1955_v43 = vmul.f32 %v3373_v28, %v1946_v29  ;;  %v3399_v47 = vld [vmem:[%s4036_s9 + $0xc] ss:$0 sm:$0xff]  ;;  %v3404_v48 = vld [vmem:[%s4036_s9 + $0xd] ss:$0 sm:$0xff]  ;;  %v3477_v29 = vld [vmem:[%s4036_s9 + $0x14] ss:$0 sm:$0xff] }
 0x236   : > { %v1245_v49 = vmul.f32 0.5, %v1226_v46 }
 0x237   : > { %v3321_v50 = vpop.f32.mrb[6].mxu0  ;;  %v1230_v26 = vpop.f32.mrb[6].mxu1 }
 0x238   : > { %2914 = vtanh.f32 %v1245_v49  ;;  %v1231_v51 = vadd.f32 %v2513_v35, %v1230_v26  ;;  %v2684_v19 = vpop.f32.mrb[7].mxu0  ;;  %v2707_v52 = vpop.f32.mrb[7].mxu1  ;;  %v1137_v45 = vadd.f32 %v3328_v61, %v3321_v50  ;;  %v1637_v49 = vld [vmem:[#allocation2 + $0x39] sm:$0xff]  ;;  %v3409_v50 = vld [vmem:[%s4036_s9 + $0x18] ss:$0 sm:$0xff] }
 0x239   : > { %v1768_v26 = vld [vmem:[#allocation2 + $0x3a] sm:$0xff]  ;;  %v1567_v52 = vadd.f32 %v1562_v32, %v1547_v31  ;;  %4104 = vst [vmem:[#allocation6_spill] sm:$0xff] %v3409_v50  ;;  %v3446_v5 = vmul.f32 %v3409_v50, %v1637_v49 }
 0x23a   : > { %v1246_v54 = vmul.f32 0.5, %v1231_v51  ;;  %v2014_v51 = vld [vmem:[#allocation2 + $0x38] sm:$0xff] }
 0x23b   : > { %v3323_v55 = vpop.f32.mrb[8].mxu0  ;;  %v1235_v57 = vpop.f32.mrb[8].mxu1  ;;  %4110 = vst [vmem:[#allocation12_spill] sm:$0xff] %v3446_v5 }
 0x23c   : > { %2916 = vtanh.f32 %v1246_v54  ;;  %v1236_v27 = vadd.f32 %v2513_v35, %v1235_v57  ;;  %v2687_v59 = vpop.f32.mrb[9].mxu0  ;;  %v2710_v60 = vpop.f32.mrb[9].mxu1  ;;  %v3414_v54 = vld [vmem:[%s4036_s9 + $0x19] ss:$0 sm:$0xff]  ;;  %v3419_v57 = vld [vmem:[%s4036_s9 + $0xa] ss:$0 sm:$0xff] }
 0x23d   : > { %4105 = vst [vmem:[#allocation7_spill] sm:$0xff] %v3414_v54  ;;  %4106 = vst [vmem:[#allocation8_spill] sm:$0xff] %v3419_v57  ;;  %v1698_v60 = vadd.f32 %v1693_v34, %v1678_v33  ;;  %v3449_v7 = vmul.f32 %v3414_v54, %v1768_v26 }
 0x23e   : > { %v2913_v36 = vpop.eup %2912  ;;  %v1247_v37 = vmul.f32 0.5, %v1236_v27 }
 0x23f   : > { %v1254_v56 = vadd.f32 1.0, %v2913_v36  ;;  %v3330_v58 = vpop.f32.mrb[10].mxu0  ;;  %v1240_v44 = vpop.f32.mrb[10].mxu1  ;;  %v1829_v36 = vadd.f32 %v1824_v18, %v1809_v39  ;;  %4111 = vst [vmem:[#allocation13_spill] sm:$0xff] %v3449_v7  ;;  %v3495_v39 = vld [vmem:[%s4036_s9 + $0x15] ss:$0 sm:$0xff] }
 0x240   : > { %2918 = vtanh.f32 %v1247_v37  ;;  %v1241_v62 = vadd.f32 %v2513_v35, %v1240_v44  ;;  %v2690_v63 = vpop.f32.mrb[11].mxu0  ;;  %v2713_v0 = vpop.f32.mrb[11].mxu1  ;;  %v3424_v37 = vld [vmem:[%s4036_s9 + $0xe] ss:$0 sm:$0xff]  ;;  %v3434_v44 = vld [vmem:[%s4036_s9 + $0x17] ss:$0 sm:$0xff] }
 0x241   : > { %v1259_v3 = vmul.f32 0.5, %v1254_v56  ;;  %4107 = vst [vmem:[#allocation9_spill] sm:$0xff] %v3424_v37  ;;  %v3429_v56 = vld [vmem:[%s4036_s9 + $0xb] ss:$0 sm:$0xff]  ;;  %4109 = vst [vmem:[#allocation11_spill] sm:$0xff] %v3434_v44 }
 0x242   : > { %v2915_v8 = vpop.eup %2914  ;;  %v1248_v9 = vmul.f32 0.5, %v1241_v62  ;;  %4108 = vst [vmem:[#allocation10_spill] sm:$0xff] %v3429_v56  ;;  %v3439_v0 = vld [vmem:[%s4036_s9 + $0x10] ss:$0 sm:$0xff]  ;;  %4116 = vst [vmem:[#allocation18_spill] sm:$0xff] %v3495_v39 }
 0x243   : > { %v1264_v13 = vmul.f32 %v1259_v3, %v1127_v2  ;;  %v1255_v14 = vadd.f32 1.0, %v2915_v8  ;;  %v3443_v3 = vadd.f32 %v1955_v43, %v1940_v42  ;;  %v3452_v8 = vmul.f32 %v3434_v44, %v2014_v51  ;;  %v3500_v18 = vld [vmem:[%s4036_s9 + $0x12] ss:$0 sm:$0xff]  ;;  %v3505_v42 = vld [vmem:[%s4036_s9 + $0x16] ss:$0 sm:$0xff] }
 0x244   : > { %2920 = vtanh.f32 %v1248_v9  ;;  %v1142_v9 = vadd.f32 %v3328_v61, %v3323_v55  ;;  %v1147_v55 = vadd.f32 %v3328_v61, %v3330_v58  ;;  %v3490_v61 = vld [vmem:[%s4036_s9 + $0xf] ss:$0 sm:$0xff]  ;;  %4117 = vst [vmem:[#allocation19_spill] sm:$0xff] %v3500_v18  ;;  %4118 = vst [vmem:[#allocation20_spill] sm:$0xff] %v3505_v42 }
 0x245   : > { %1308 = vst.msk [vmem:[#allocation2 + $0x10] sm:$0xff] %vm958_vm2, %v1264_v13  ;;  %v1260_v24 = vmul.f32 0.5, %v1255_v14  ;;  %4112 = vst [vmem:[#allocation14_spill] sm:$0xff] %v3452_v8 }
 0x246   : > { %v2917_v30 = vpop.eup %2916  ;;  %4115 = vst [vmem:[#allocation17_spill] sm:$0xff] %v3490_v61 }
 0x247   : > { %v1265_v35 = vmul.f32 %v1260_v24, %v1132_v23  ;;  %v1256_v38 = vadd.f32 1.0, %v2917_v30 }
 0x249   : > { %1309 = vst.msk [vmem:[#allocation2 + $0x18] sm:$0xff] %vm958_vm2, %v1265_v35  ;;  %v1261_v46 = vmul.f32 0.5, %v1256_v38 }
 0x24a   : > { %v2919_v19 = vpop.eup %2918 }
 0x24b   : > { %v1266_v27 = vmul.f32 %v1261_v46, %v1137_v45  ;;  %v1257_v59 = vadd.f32 1.0, %v2919_v19 }
 0x24c   : > { %v1539_v62 = vld [vmem:[#allocation2 + $0x9] sm:$0xff] }
 0x24d   : > { %v1554_v63 = vld [vmem:[#allocation2 + $0xd] sm:$0xff]  ;;  %1310 = vst.msk [vmem:[#allocation2 + $0x20] sm:$0xff] %vm958_vm2, %v1266_v27  ;;  %v1262_v11 = vmul.f32 0.5, %v1257_v59  ;;  %v1578_v13 = vmul.f32 %v3384_v40, %v1539_v62  ;;  %v1548_v19 = vmul.f32 %v3336_v4, %v1539_v62  ;;  %v3532_v62 = vld [vmem:[%s4036_s9 + $0x1c] ss:$0 sm:$0xff] }
 0x24e   : > { %v3441_v2 = vld [vmem:[#allocation2 + $0xa] sm:$0xff]  ;;  %v2921_v24 = vpop.eup %2920  ;;  %v1594_v25 = vmul.f32 %v3399_v47, %v1554_v63  ;;  %4120 = vst [vmem:[#allocation22_spill] sm:$0xff] %v3532_v62 }
 0x24f   : > { %v3458_v14 = vld [vmem:[#allocation2 + $0xe] sm:$0xff]  ;;  %v1709_v15 = vmul.f32 %v3389_v41, %v3441_v2  ;;  %v1267_v58 = vmul.f32 %v1262_v11, %v1142_v9  ;;  %v1258_v34 = vadd.f32 1.0, %v2921_v24  ;;  %v1583_v35 = vadd.f32 %v1578_v13, %v1567_v52 }
 0x250   : > { %v3467_v22 = vld [vmem:[#allocation2 + $0xb] sm:$0xff]  ;;  %v1725_v30 = vmul.f32 %v3404_v48, %v3458_v14  ;;  %v3509_v45 = vld [vmem:[#allocation2 + $0x15] sm:$0xff] }
 0x251   : > { %v3469_v23 = vld [vmem:[#allocation2 + $0xf] sm:$0xff]  ;;  %v1840_v31 = vmul.f32 %v3419_v57, %v3467_v22  ;;  %v1714_v38 = vadd.f32 %v1709_v15, %v1698_v60  ;;  %1311 = vst.msk [vmem:[#allocation2 + $0x28] sm:$0xff] %vm958_vm2, %v1267_v58  ;;  %v1263_v52 = vmul.f32 0.5, %v1258_v34  ;;  %v1599_v27 = vadd.f32 %v1594_v25, %v1583_v35 }
 0x252   : > { %v3483_v32 = vld [vmem:[#allocation2 + $0xc] sm:$0xff]  ;;  %v1856_v26 = vmul.f32 %v3424_v37, %v3469_v23  ;;  %v3521_v60 = vld [vmem:[#allocation2 + $0x16] sm:$0xff]  ;;  %v1563_v58 = vmul.f32 %v3341_v6, %v1554_v63  ;;  %v1626_v1 = vmul.f32 %v3477_v29, %v3509_v45 }
 0x253   : > { %4113 = vst [vmem:[#allocation15_spill] sm:$0xff] %v3483_v32  ;;  %v3485_v33 = vld [vmem:[#allocation2 + $0x10] sm:$0xff]  ;;  %v1845_v49 = vadd.f32 %v1840_v31, %v1829_v36  ;;  %v1971_v51 = vmul.f32 %v3429_v56, %v3483_v32  ;;  %v1730_v13 = vadd.f32 %v1725_v30, %v1714_v38  ;;  %v1268_v34 = vmul.f32 %v1263_v52, %v1147_v55  ;;  %v3549_v30 = vld [vmem:[%s4036_s9 + $0x1d] ss:$0 sm:$0xff] }
 0x254   : > { %4114 = vst [vmem:[#allocation16_spill] sm:$0xff] %v3485_v33  ;;  %v3507_v43 = vld [vmem:[#allocation2 + $0x11] sm:$0xff]  ;;  %v1987_v11 = vmul.f32 %v3490_v61, %v3485_v33  ;;  %4123 = vst [vmem:[#allocation25_spill] sm:$0xff] %v3549_v30  ;;  %v3560_v63 = vld [vmem:[#allocation2 + $0x19] sm:$0xff] }
 0x255   : > { %v3511_v46 = vld [vmem:[#allocation2 + $0x12] sm:$0xff]  ;;  %v1610_v59 = vmul.f32 %v3439_v0, %v3507_v43  ;;  %v1861_v24 = vadd.f32 %v1856_v26, %v1845_v49  ;;  %v3556_v49 = vld [vmem:[%s4036_s9 + $0x1a] ss:$0 sm:$0xff]  ;;  %v3562_v55 = vld [vmem:[#allocation2 + $0x1d] sm:$0xff]  ;;  %v1976_v7 = vadd.f32 %v1971_v51, %v3443_v3  ;;  %1312 = vst.msk [vmem:[#allocation2 + $0x30] sm:$0xff] %vm958_vm2, %v1268_v34  ;;  %v1642_v8 = vmul.f32 %v3409_v50, %v3560_v63 }
 0x256   : > { %v3523_v9 = vld [vmem:[#allocation2 + $0x13] sm:$0xff]  ;;  %v1741_v15 = vmul.f32 %v3465_v17, %v3511_v46  ;;  %4124 = vst [vmem:[#allocation26_spill] sm:$0xff] %v3556_v49  ;;  %v3574_v61 = vld [vmem:[#allocation2 + $0x1e] sm:$0xff]  ;;  %v1579_v32 = vmul.f32 %v3384_v40, %v3507_v43 }
 0x257   : > { %v3525_v36 = vld [vmem:[#allocation2 + $0x17] sm:$0xff]  ;;  %v3541_v31 = vld [vmem:[%s4036_s9 + $0x13] ss:$0 sm:$0xff]  ;;  %v1615_v35 = vadd.f32 %v1610_v59, %v1599_v27  ;;  %v1872_v38 = vmul.f32 %v3500_v18, %v3523_v9  ;;  %v1757_v59 = vmul.f32 %v3495_v39, %v3521_v60 }
 0x258   : > { %4119 = vst [vmem:[#allocation21_spill] sm:$0xff] %v3525_v36  ;;  %v3536_v25 = vld [vmem:[#allocation2 + $0x14] sm:$0xff]  ;;  %4122 = vst [vmem:[#allocation24_spill] sm:$0xff] %v3541_v31  ;;  %v1746_v27 = vadd.f32 %v1741_v15, %v1730_v13  ;;  %v1888_v53 = vmul.f32 %v3505_v42, %v3525_v36  ;;  %v3583_v15 = vld [vmem:[%s4036_s9 + $0x1e] ss:$0 sm:$0xff] }
 0x259   : > { %4121 = vst [vmem:[#allocation23_spill] sm:$0xff] %v3536_v25  ;;  %v3558_v26 = vld [vmem:[#allocation2 + $0x18] sm:$0xff]  ;;  %v1631_v5 = vadd.f32 %v1626_v1, %v1615_v35  ;;  %4127 = vst [vmem:[#allocation29_spill] sm:$0xff] %v3583_v15  ;;  %v2003_v3 = vmul.f32 %v3541_v31, %v3536_v25  ;;  %v1877_v34 = vadd.f32 %v1872_v38, %v1861_v24  ;;  %v3610_v37 = vld [vmem:[#allocation2 + $0x21] sm:$0xff] }
 0x25a   : > { %4125 = vst [vmem:[#allocation27_spill] sm:$0xff] %v3558_v26  ;;  %v3564_v52 = vld [vmem:[#allocation2 + $0x1a] sm:$0xff]  ;;  %v1762_v51 = vadd.f32 %v1757_v59, %v1746_v27  ;;  %v2019_v33 = vmul.f32 %v3434_v44, %v3558_v26  ;;  %v1658_v27 = vmul.f32 %v3532_v62, %v3562_v55  ;;  %v1789_v24 = vmul.f32 %v3549_v30, %v3574_v61 }
 0x25b   : > { %v1773_v56 = vmul.f32 %v3414_v54, %v3564_v52  ;;  %v3578_v13 = vld [vmem:[#allocation2 + $0x1b] sm:$0xff]  ;;  %v1647_v21 = vadd.f32 %v1642_v8, %v1631_v5  ;;  %v1992_v38 = vadd.f32 %v1987_v11, %v1976_v7  ;;  %v1893_v31 = vadd.f32 %v1888_v53, %v1877_v34 }
 0x25c   : > { %4126 = vst [vmem:[#allocation28_spill] sm:$0xff] %v3578_v13  ;;  %v3587_v1 = vld [vmem:[#allocation2 + $0x1f] sm:$0xff]  ;;  %v1904_v35 = vmul.f32 %v3556_v49, %v3578_v13  ;;  %v3598_v42 = vld [vmem:[%s4036_s9 + $0x1b] ss:$0 sm:$0xff]  ;;  %v1568_v25 = vadd.f32 %v1563_v58, %v1548_v19  ;;  %v1595_v19 = vmul.f32 %v3399_v47, %v3509_v45  ;;  %v3624_v34 = vmul.f32 %v3336_v4, %v3610_v37 }
 0x25d   : > { %v3591_v28 = vld [vmem:[#allocation2 + $0x1c] sm:$0xff]  ;;  %4128 = vst [vmem:[#allocation30_spill] sm:$0xff] %v3598_v42  ;;  %v1778_v59 = vadd.f32 %v1773_v56, %v1762_v51  ;;  %v1663_v18 = vadd.f32 %v1658_v27, %v1647_v21  ;;  %v1920_v13 = vmul.f32 %v3583_v15, %v3587_v1  ;;  %v2008_v5 = vadd.f32 %v2003_v3, %v1992_v38 }
 0x25e   : > { %v1899_v44 = vld [vmem:[#allocation2 + $0x3b] sm:$0xff]  ;;  %v2035_v8 = vmul.f32 %v3598_v42, %v3591_v28  ;;  %v1909_v56 = vadd.f32 %v1904_v35, %v1893_v31  ;;  %v1584_v53 = vadd.f32 %v1579_v32, %v1568_v25  ;;  %v1611_v21 = vmul.f32 %v3439_v0, %v3560_v63  ;;  %4131 = vst [vmem:[#allocation33_spill] sm:$0xff] %v3624_v34  ;;  %v3626_v31 = vld [vmem:[#allocation2 + $0x25] sm:$0xff] }
 0x25f   : > { %v2030_v26 = vld [vmem:[#allocation2 + $0x3c] sm:$0xff]  ;;  %v1794_v7 = vadd.f32 %v1789_v24, %v1778_v59  ;;  %v2024_v11 = vadd.f32 %v2019_v33, %v2008_v5  ;;  %v3617_v58 = vmul.f32 %v3556_v49, %v1899_v44  ;;  %v1679_v44 = vmul.f32 %v3346_v10, %v3441_v2  ;;  %v3649_v5 = vld [vmem:[#allocation2 + $0x26] sm:$0xff] }
 0x260   : > { %v1653_v36 = vld [vmem:[#allocation2 + $0x3d] sm:$0xff]  ;;  %v3620_v3 = vmul.f32 %v3598_v42, %v2030_v26  ;;  %v1925_v51 = vadd.f32 %v1920_v13, %v1909_v56  ;;  %v1600_v32 = vadd.f32 %v1595_v19, %v1584_v53  ;;  %v1694_v26 = vmul.f32 %v3351_v12, %v3458_v14 }
 0x261   : > { %4129 = vst [vmem:[#allocation31_spill] sm:$0xff] %v3617_v58  ;;  %v3629_v25 = vmul.f32 %v3532_v62, %v1653_v36  ;;  %v2040_v33 = vadd.f32 %v2035_v8, %v2024_v11  ;;  %v2045_v35 = vadd.f32 %v1794_v7, %v1663_v18  ;;  %v3631_v27 = vld [vmem:[#allocation2 + $0x22] sm:$0xff]  ;;  %v1627_v24 = vmul.f32 %v3477_v29, %v3562_v55  ;;  %v3654_v8 = vld [vmem:[%s4037_s10] ss:$0 sm:$0xff] }
 0x262   : > { %4130 = vst [vmem:[#allocation32_spill] sm:$0xff] %v3620_v3  ;;  %v1616_v13 = vadd.f32 %v1611_v21, %v1600_v32  ;;  %v1643_v38 = vmul.f32 %v3409_v50, %v3610_v37  ;;  %v1710_v36 = vmul.f32 %v3389_v41, %v3511_v46  ;;  %v3645_v18 = vmul.f32 %v3341_v6, %v3626_v31  ;;  %v3666_v32 = vld [vmem:[#allocation2 + $0x23] sm:$0xff]  ;;  %v4139_v3 = vld [vmem:[#allocation21_spill] sm:$0xff] }
 0x263   : > { %4132 = vst [vmem:[#allocation34_spill] sm:$0xff] %v3629_v25  ;;  %v2050_v59 = vadd.f32 %v2040_v33, %v1925_v51  ;;  %v1659_v2 = vmul.f32 %v3532_v62, %v3626_v31  ;;  %v1699_v14 = vadd.f32 %v1694_v26, %v1679_v44  ;;  %4134 = vst [vmem:[#allocation36_spill] sm:$0xff] %v3654_v8  ;;  %v3668_v33 = vld [vmem:[#allocation2 + $0x27] sm:$0xff]  ;;  %v4140_v25 = vld [vmem:[#allocation9_spill] sm:$0xff] }
 0x264   : > { %4133 = vst [vmem:[#allocation35_spill] sm:$0xff] %v3645_v18  ;;  %v1632_v7 = vadd.f32 %v1627_v24, %v1616_v13  ;;  %v3658_v56 = vmul.f32 %v3346_v10, %v3631_v27  ;;  %v1726_v53 = vmul.f32 %v3404_v48, %v3521_v60  ;;  %v1810_v19 = vmul.f32 %v3356_v16, %v3467_v22  ;;  %v4144_v18 = vld [vmem:[#allocation4_spill] sm:$0xff] }
 0x265   : > { %v2055_v11 = vadd.f32 %v2050_v59, %v2045_v35  ;;  %v1715_v21 = vadd.f32 %v1710_v36, %v1699_v14  ;;  %v1742_v51 = vmul.f32 %v3465_v17, %v3564_v52  ;;  %v1825_v44 = vmul.f32 %v3361_v20, %v3469_v23 }
 0x266   : > { %4135 = vst [vmem:[#allocation37_spill] sm:$0xff] %v3658_v56  ;;  %v1648_v26 = vadd.f32 %v1643_v38, %v1632_v7  ;;  %v3674_v13 = vmul.f32 %v3351_v12, %v3649_v5  ;;  %v1758_v22 = vmul.f32 %v3495_v39, %v3574_v61  ;;  %v1841_v35 = vmul.f32 %v3419_v57, %v3523_v9  ;;  %v4143_v56 = vld [vmem:[#allocation15_spill] sm:$0xff] }
 0x267   : > { %v2067_v24 = vadd.f32 %v3654_v8, %v2055_v11  ;;  %v1731_v36 = vadd.f32 %v1726_v53, %v1715_v21  ;;  %v1774_v59 = vmul.f32 %v3414_v54, %v3631_v27  ;;  %v1830_v14 = vadd.f32 %v1825_v44, %v1810_v19  ;;  %v4141_v21 = vld [vmem:[#allocation28_spill] sm:$0xff]  ;;  %v4142_v19 = vld [vmem:[#allocation19_spill] sm:$0xff] }
 0x268   : > { %4136 = vst [vmem:[#allocation38_spill] sm:$0xff] %v3674_v13  ;;  %v1790_v23 = vmul.f32 %v3549_v30, %v3649_v5  ;;  %v3687_v38 = vmul.f32 %v3356_v16, %v3666_v32  ;;  %v3691_v7 = vmul.f32 %v3361_v20, %v3668_v33  ;;  %v1857_v58 = vmul.f32 %v4140_v25, %v4139_v3  ;;  %v3698_v13 = vld [vmem:[#allocation2 + $0x24] sm:$0xff] }
 0x269   : > { %2753 = vmatmul.mubr.msk.f32.vlgmr.msra.gmra.mrb[14].mxu0 %vm958_vm2, %v2067_v24  ;;  %v1747_v53 = vadd.f32 %v1742_v51, %v1731_v36  ;;  %v1846_v11 = vadd.f32 %v1841_v35, %v1830_v14  ;;  %v1873_v44 = vmul.f32 %v4142_v19, %v4141_v21  ;;  %v1941_v34 = vmul.f32 %v4144_v18, %v4143_v56  ;;  %v3706_v25 = vld [vmem:[#allocation2 + $0x20] sm:$0xff]  ;;  %v4147_v24 = vld [vmem:[#allocation16_spill] sm:$0xff]  ;;  %v4148_v51 = vld [vmem:[#allocation5_spill] sm:$0xff] }
 0x26a   : > { %4137 = vst [vmem:[#allocation39_spill] sm:$0xff] %v3687_v38  ;;  %4138 = vst [vmem:[#allocation40_spill] sm:$0xff] %v3691_v7  ;;  %v4145_v38 = vmov 0.0   ;;  %v1664_v8 = vadd.f32 %v1659_v2, %v1648_v26  ;;  %v4146_v7 = vld [vmem:[#allocation20_spill] sm:$0xff]  ;;  %v1956_v35 = vmul.f32 %v4148_v51, %v4147_v24  ;;  %v4149_v36 = vld [vmem:[#allocation23_spill] sm:$0xff]  ;;  %v1905_v56 = vmul.f32 %v3556_v49, %v3666_v32 }
 0x26b   : > { %2755 = vmatprep.mubr.msk.f32.mxu0 %vm2957_vm1, %v4145_v38  ;;  %v1889_v30 = vmul.f32 %v4146_v7, %v3587_v1  ;;  %v4150_v14 = vld [vmem:[#allocation10_spill] sm:$0xff]  ;;  %v1763_v54 = vadd.f32 %v1758_v22, %v1747_v53  ;;  %v1862_v39 = vadd.f32 %v1857_v58, %v1846_v11  ;;  %v1921_v38 = vmul.f32 %v3583_v15, %v3668_v33  ;;  %v4153_v15 = vld [vmem:[#allocation27_spill] sm:$0xff]  ;;  %v4154_v49 = vld [vmem:[#allocation17_spill] sm:$0xff] }
 0x26c   : > { %v1972_v19 = vmul.f32 %v4150_v14, %v4149_v36  ;;  %v3718_v2 = vmul.f32 %v4144_v18, %v3698_v13  ;;  %v1961_v26 = vadd.f32 %v1956_v35, %v1941_v34  ;;  %v1549_v7 = vmul.f32 %v3336_v4, %v3507_v43  ;;  %v4155_v34 = vld [vmem:[#allocation24_spill] sm:$0xff] }
 0x26d   : > { %v1564_v24 = vmul.f32 %v3341_v6, %v3509_v45  ;;  %v1779_v14 = vadd.f32 %v1774_v59, %v1763_v54  ;;  %v1878_v22 = vadd.f32 %v1873_v44, %v1862_v39  ;;  %v3726_v58 = vmul.f32 %v4148_v51, %v3706_v25  ;;  %v3734_v4 = vld [vmem:[#allocation2 + $0x29] sm:$0xff] }
 0x26e   : > { %4151 = vst [vmem:[#allocation21_spill] sm:$0xff] %v3718_v2  ;;  %v1580_v53 = vmul.f32 %v3384_v40, %v3560_v63  ;;  %v1977_v11 = vadd.f32 %v1972_v19, %v1961_v26  ;;  %v1988_v2 = vmul.f32 %v4154_v49, %v4153_v15  ;;  %v2004_v35 = vmul.f32 %v4155_v34, %v3591_v28  ;;  %v4156_v54 = vld [vmem:[#allocation11_spill] sm:$0xff] }
 0x26f   : > { %4152 = vst [vmem:[#allocation28_spill] sm:$0xff] %v3726_v58  ;;  %v1569_v43 = vadd.f32 %v1564_v24, %v1549_v7  ;;  %v1894_v45 = vadd.f32 %v1889_v30, %v1878_v22  ;;  %v2020_v39 = vmul.f32 %v4156_v54, %v3706_v25  ;;  %v2036_v59 = vmul.f32 %v3598_v42, %v3698_v13  ;;  %v3740_v44 = vld [vmem:[#allocation2 + $0x2d] sm:$0xff] }
 0x270   : > { %v1596_v19 = vmul.f32 %v3399_v47, %v3562_v55  ;;  %v1795_v26 = vadd.f32 %v1790_v23, %v1779_v14  ;;  %v1993_v58 = vadd.f32 %v1988_v2, %v1977_v11  ;;  %v1612_v7 = vmul.f32 %v3439_v0, %v3610_v37 }
 0x271   : > { %v1585_v49 = vadd.f32 %v1580_v53, %v1569_v43  ;;  %v1910_v24 = vadd.f32 %v1905_v56, %v1894_v45  ;;  %v3748_v30 = vmul.f32 %v3384_v40, %v3734_v4  ;;  %v1680_v22 = vmul.f32 %v3346_v10, %v3511_v46  ;;  %v3766_v45 = vld [vmem:[#allocation2 + $0x2a] sm:$0xff] }
 0x272   : > { %v1695_v42 = vmul.f32 %v3351_v12, %v3521_v60  ;;  %v2009_v54 = vadd.f32 %v2004_v35, %v1993_v58  ;;  %v3756_v23 = vmul.f32 %v3399_v47, %v3740_v44  ;;  %v1711_v2 = vmul.f32 %v3389_v41, %v3564_v52 }
 0x273   : > { %4157 = vst [vmem:[#allocation15_spill] sm:$0xff] %v3748_v30  ;;  %v1601_v14 = vadd.f32 %v1596_v19, %v1585_v49  ;;  %v1628_v56 = vmul.f32 %v3477_v29, %v3626_v31  ;;  %v1644_v53 = vmul.f32 %v3409_v50, %v3734_v4  ;;  %v1660_v46 = vmul.f32 %v3532_v62, %v3740_v44  ;;  %v3768_v49 = vld [vmem:[#allocation2 + $0x2e] sm:$0xff] }
 0x274   : > { %4158 = vst [vmem:[#allocation16_spill] sm:$0xff] %v3756_v23  ;;  %v1700_v11 = vadd.f32 %v1695_v42, %v1680_v22  ;;  %v1926_v60 = vadd.f32 %v1921_v38, %v1910_v24  ;;  %v2025_v58 = vadd.f32 %v2020_v39, %v2009_v54  ;;  %v2046_v35 = vadd.f32 %v1795_v26, %v1664_v8  ;;  %v3778_v38 = vld [vmem:[#allocation2 + $0x2b] sm:$0xff] }
 0x275   : > { %v1617_v43 = vadd.f32 %v1612_v7, %v1601_v14  ;;  %v1727_v23 = vmul.f32 %v3404_v48, %v3574_v61  ;;  %v1743_v30 = vmul.f32 %v3465_v17, %v3631_v27  ;;  %v1811_v50 = vmul.f32 %v3356_v16, %v3523_v9  ;;  %v4161_v9 = vld [vmem:[#allocation18_spill] sm:$0xff]  ;;  %v4163_v14 = vld [vmem:[#allocation25_spill] sm:$0xff] }
 0x276   : > { %v1716_v19 = vadd.f32 %v1711_v2, %v1700_v11  ;;  %v2041_v62 = vadd.f32 %v2036_v59, %v2025_v58  ;;  %v1826_v8 = vmul.f32 %v3361_v20, %v4139_v3  ;;  %v1842_v54 = vmul.f32 %v3419_v57, %v4141_v21  ;;  %v4162_v3 = vld [vmem:[#allocation7_spill] sm:$0xff] }
 0x277   : > { %v1633_v42 = vadd.f32 %v1628_v56, %v1617_v43  ;;  %v3784_v39 = vmul.f32 %v3389_v41, %v3766_v45  ;;  %v3788_v26 = vmul.f32 %v3404_v48, %v3768_v49  ;;  %v1759_v59 = vmul.f32 %v4161_v9, %v3649_v5  ;;  %v3796_v11 = vld [vmem:[#allocation2 + $0x2f] sm:$0xff] }
 0x278   : > { %v1732_v7 = vadd.f32 %v1727_v23, %v1716_v19  ;;  %v2051_v24 = vadd.f32 %v2041_v62, %v1926_v60  ;;  %v1775_v22 = vmul.f32 %v4162_v3, %v3766_v45  ;;  %v1791_v2 = vmul.f32 %v4163_v14, %v3768_v49  ;;  %v4165_v23 = vld [vmem:[#allocation9_spill] sm:$0xff]  ;;  %v4166_v60 = vld [vmem:[#allocation19_spill] sm:$0xff] }
 0x279   : > { %4159 = vst [vmem:[#allocation5_spill] sm:$0xff] %v3784_v39  ;;  %4160 = vst [vmem:[#allocation23_spill] sm:$0xff] %v3788_v26  ;;  %v1831_v56 = vadd.f32 %v1826_v8, %v1811_v50  ;;  %v1649_v58 = vadd.f32 %v1644_v53, %v1633_v42  ;;  %v3800_v39 = vmul.f32 %v3419_v57, %v3778_v38  ;;  %v4168_v8 = vld [vmem:[#allocation10_spill] sm:$0xff]  ;;  %v3825_v57 = vld [vmem:[#allocation2 + $0x2c] sm:$0xff] }
 0x27a   : > { %v1748_v43 = vadd.f32 %v1743_v30, %v1732_v7  ;;  %v1858_v19 = vmul.f32 %v4165_v23, %v3587_v1  ;;  %v2056_v26 = vadd.f32 %v2051_v24, %v2046_v35  ;;  %v1874_v3 = vmul.f32 %v4166_v60, %v3666_v32  ;;  %v3812_v30 = vld [vmem:[#allocation2 + $0x28] sm:$0xff] }
 0x27b   : > { %4164 = vst [vmem:[#allocation27_spill] sm:$0xff] %v3800_v39  ;;  %v1847_v62 = vadd.f32 %v1842_v54, %v1831_v56  ;;  %v1942_v14 = vmul.f32 %v4144_v18, %v4149_v36  ;;  %v3810_v53 = vmul.f32 %v4165_v23, %v3796_v11  ;;  %v1957_v42 = vmul.f32 %v4148_v51, %v4153_v15  ;;  %v4169_v54 = vld [vmem:[#allocation36_spill] sm:$0xff]  ;;  %v4171_v36 = vld [vmem:[#allocation26_spill] sm:$0xff] }
 0x27c   : > { %v1764_v50 = vadd.f32 %v1759_v59, %v1748_v43  ;;  %v1973_v35 = vmul.f32 %v4168_v8, %v3591_v28  ;;  %v2068_v7 = vadd.f32 %v4169_v54, %v2056_v26  ;;  %v4170_v56 = vld [vmem:[#allocation20_spill] sm:$0xff]  ;;  %v1906_v59 = vmul.f32 %v4171_v36, %v3778_v38 }
 0x27d   : > { %4167 = vst [vmem:[#allocation24_spill] sm:$0xff] %v3810_v53  ;;  %v1863_v24 = vadd.f32 %v1858_v19, %v1847_v62  ;;  %v1890_v39 = vmul.f32 %v4170_v56, %v3668_v33  ;;  %v1665_v43 = vadd.f32 %v1660_v46, %v1649_v58  ;;  %v4172_v53 = vld [vmem:[#allocation29_spill] sm:$0xff]  ;;  %v1962_v23 = vadd.f32 %v1957_v42, %v1942_v14  ;;  %v4174_v19 = vld [vmem:[#allocation3_spill] sm:$0xff] }
 0x27e   : > { %v1780_v18 = vadd.f32 %v1775_v22, %v1764_v50  ;;  %v1922_v60 = vmul.f32 %v4172_v53, %v3796_v11  ;;  %2756 = vmatmul.mubr.msk.f32.gmra.mrb[16].mxu0 %vm958_vm2, %v2068_v7  ;;  %v3830_v26 = vmul.f32 %v4148_v51, %v3812_v30  ;;  %v1550_v62 = vmul.f32 %v4174_v19, %v3560_v63  ;;  %v4176_v14 = vld [vmem:[#allocation17_spill] sm:$0xff] }
 0x27f   : > { %v1879_v15 = vadd.f32 %v1874_v3, %v1863_v24  ;;  %v1565_v46 = vmul.f32 %v3341_v6, %v3562_v55  ;;  %v4175_v22 = vmov 0.0   ;;  %v1978_v58 = vadd.f32 %v1973_v35, %v1962_v23  ;;  %v1605_v42 = vld [vmem:[#allocation2 + $0x31] sm:$0xff]  ;;  %v4177_v23 = vld [vmem:[#allocation11_spill] sm:$0xff] }
 0x280   : > { %4173 = vst [vmem:[#allocation18_spill] sm:$0xff] %v3830_v26  ;;  %2758 = vmatprep.mubr.msk.f32.mxu0 %vm2957_vm1, %v4175_v22  ;;  %v1989_v50 = vmul.f32 %v4176_v14, %v3706_v25  ;;  %v2005_v3 = vmul.f32 %v4155_v34, %v3698_v13  ;;  %v1581_v51 = vmul.f32 %v3384_v40, %v3610_v37  ;;  %v4178_v25 = vld [vmem:[#allocation30_spill] sm:$0xff]  ;;  %v1621_v22 = vld [vmem:[#allocation2 + $0x35] sm:$0xff] }
 0x281   : > { %v1796_v7 = vadd.f32 %v1791_v2, %v1780_v18  ;;  %v1895_v24 = vadd.f32 %v1890_v39, %v1879_v15  ;;  %v3846_v63 = vmul.f32 %v4168_v8, %v3825_v57  ;;  %v1570_v6 = vadd.f32 %v1565_v46, %v1550_v62 }
 0x282   : > { %v1994_v55 = vadd.f32 %v1989_v50, %v1978_v58  ;;  %v2021_v35 = vmul.f32 %v4177_v23, %v3812_v30  ;;  %v2037_v19 = vmul.f32 %v4178_v25, %v3825_v57  ;;  %v1597_v26 = vmul.f32 %v3399_v47, %v3626_v31  ;;  %v4179_v50 = vld [vmem:[#allocation6_spill] sm:$0xff] }
 0x283   : > { %v1911_v40 = vadd.f32 %v1906_v59, %v1895_v24  ;;  %v1586_v37 = vadd.f32 %v1581_v51, %v1570_v6  ;;  %v1613_v18 = vmul.f32 %v3439_v0, %v3734_v4  ;;  %v3857_v39 = vmul.f32 %v3439_v0, %v1605_v42  ;;  %v4180_v24 = vld [vmem:[#allocation22_spill] sm:$0xff] }
 0x284   : > { %v2010_v2 = vadd.f32 %v2005_v3, %v1994_v55  ;;  %v1681_v15 = vmul.f32 %v3346_v10, %v3564_v52  ;;  %v1696_v62 = vmul.f32 %v3351_v12, %v3574_v61  ;;  %v1712_v46 = vmul.f32 %v3389_v41, %v3631_v27  ;;  %v1736_v10 = vld [vmem:[#allocation2 + $0x32] sm:$0xff] }
 0x285   : > { %v2047_v47 = vadd.f32 %v1796_v7, %v1665_v43  ;;  %v1602_v31 = vadd.f32 %v1597_v26, %v1586_v37  ;;  %v1629_v59 = vmul.f32 %v3477_v29, %v3740_v44  ;;  %v3868_v4 = vmul.f32 %v3477_v29, %v1621_v22  ;;  %v1752_v27 = vld [vmem:[#allocation2 + $0x36] sm:$0xff] }
 0x286   : > { %v1927_v0 = vadd.f32 %v1922_v60, %v1911_v40  ;;  %v2026_v58 = vadd.f32 %v2021_v35, %v2010_v2  ;;  %v1645_v3 = vmul.f32 %v4179_v50, %v1605_v42  ;;  %v1701_v51 = vadd.f32 %v1696_v62, %v1681_v15  ;;  %v4182_v35 = vld [vmem:[#allocation7_spill] sm:$0xff]  ;;  %v1883_v15 = vld [vmem:[#allocation2 + $0x37] sm:$0xff] }
 0x287   : > { %v1618_v52 = vadd.f32 %v1613_v18, %v1602_v31  ;;  %v1661_v12 = vmul.f32 %v4180_v24, %v1621_v22  ;;  %v1728_v41 = vmul.f32 %v3404_v48, %v3649_v5  ;;  %v1744_v61 = vmul.f32 %v3465_v17, %v3766_v45  ;;  %v4181_v48 = vld [vmem:[#allocation8_spill] sm:$0xff]  ;;  %v4188_v24 = vld [vmem:[#allocation33_spill] sm:$0xff] }
 0x288   : > { %v2042_v44 = vadd.f32 %v2037_v19, %v2026_v58  ;;  %v1717_v43 = vadd.f32 %v1712_v46, %v1701_v51  ;;  %v1812_v29 = vmul.f32 %v3356_v16, %v4141_v21  ;;  %v1827_v60 = vmul.f32 %v3361_v20, %v3587_v1  ;;  %v1867_v16 = vld [vmem:[#allocation2 + $0x33] sm:$0xff] }
 0x289   : > { %v1634_v26 = vadd.f32 %v1629_v59, %v1618_v52  ;;  %v3881_v42 = vmul.f32 %v3465_v17, %v1736_v10  ;;  %v1760_v22 = vmul.f32 %v4161_v9, %v3768_v49  ;;  %v1843_v5 = vmul.f32 %v4181_v48, %v3666_v32  ;;  %v4183_v1 = vld [vmem:[#allocation25_spill] sm:$0xff]  ;;  %v4185_v32 = vld [vmem:[#allocation19_spill] sm:$0xff]  ;;  %v4186_v46 = vld [vmem:[#allocation4_spill] sm:$0xff] }
 0x28a   : > { %v2052_v45 = vadd.f32 %v2042_v44, %v1927_v0  ;;  %v1733_v7 = vadd.f32 %v1728_v41, %v1717_v43  ;;  %v3888_v6 = vmul.f32 %v4161_v9, %v1752_v27  ;;  %v1832_v55 = vadd.f32 %v1827_v60, %v1812_v29  ;;  %v4184_v17 = vld [vmem:[#allocation9_spill] sm:$0xff]  ;;  %v4189_v41 = vld [vmem:[#allocation35_spill] sm:$0xff]  ;;  %v4192_v44 = vld [vmem:[#allocation38_spill] sm:$0xff] }
 0x28b   : > { %v1650_v21 = vadd.f32 %v1645_v3, %v1634_v26  ;;  %v1776_v20 = vmul.f32 %v4182_v35, %v1736_v10  ;;  %v1792_v19 = vmul.f32 %v4183_v1, %v1752_v27  ;;  %v1859_v40 = vmul.f32 %v4184_v17, %v3668_v33  ;;  %v4187_v3 = vld [vmem:[#allocation28_spill] sm:$0xff]  ;;  %v4191_v27 = vld [vmem:[#allocation37_spill] sm:$0xff]  ;;  %v4193_v29 = vld [vmem:[#allocation39_spill] sm:$0xff] }
 0x28c   : > { %v2057_v37 = vadd.f32 %v2052_v45, %v2047_v47  ;;  %v1749_v49 = vadd.f32 %v1744_v61, %v1733_v7  ;;  %v1848_v18 = vadd.f32 %v1843_v5, %v1832_v55  ;;  %v1875_v2 = vmul.f32 %v4185_v32, %v3778_v38  ;;  %v1982_v10 = vld [vmem:[#allocation2 + $0x30] sm:$0xff]  ;;  %v4195_v26 = vld [vmem:[#allocation21_spill] sm:$0xff]  ;;  %v4197_v7 = vld [vmem:[#allocation15_spill] sm:$0xff] }
 0x28d   : > { %v1876_v9 = vmul.f32 %v4185_v32, %v1867_v16  ;;  %v1891_v62 = vmul.f32 %v4170_v56, %v3796_v11  ;;  %v1943_v31 = vmul.f32 %v4186_v46, %v3591_v28  ;;  %v1974_v59 = vmul.f32 %v4168_v8, %v3698_v13  ;;  %v1998_v52 = vld [vmem:[#allocation2 + $0x34] sm:$0xff]  ;;  %v4201_v46 = vld [vmem:[#allocation23_spill] sm:$0xff] }
 0x28e   : > { %v2069_v33 = vadd.f32 %v4169_v54, %v2057_v37  ;;  %v1765_v47 = vadd.f32 %v1760_v22, %v1749_v49  ;;  %v1864_v0 = vadd.f32 %v1859_v40, %v1848_v18  ;;  %v1907_v58 = vmul.f32 %v4171_v36, %v1867_v16  ;;  %v4196_v22 = vld [vmem:[#allocation18_spill] sm:$0xff]  ;;  %v4200_v32 = vld [vmem:[#allocation16_spill] sm:$0xff] }
 0x28f   : > { %v1666_v50 = vadd.f32 %v1661_v12, %v1650_v21  ;;  %v1923_v38 = vmul.f32 %v4172_v53, %v1883_v15  ;;  %v1963_v51 = vadd.f32 %v4187_v3, %v1943_v31  ;;  %v1990_v11 = vmul.f32 %v4176_v14, %v3812_v30  ;;  %v4194_v30 = vld [vmem:[#allocation40_spill] sm:$0xff]  ;;  %v4198_v21 = vld [vmem:[#allocation5_spill] sm:$0xff] }
 0x290   : > { %2759 = vmatmul.mubr.msk.f32.gmra.mrb[18].mxu0 %vm958_vm2, %v2069_v33  ;;  %v1781_v28 = vadd.f32 %v1776_v20, %v1765_v47  ;;  %v1880_v13 = vadd.f32 %v1875_v2, %v1864_v0  ;;  %v2006_v8 = vmul.f32 %v4155_v34, %v3825_v57  ;;  %v1571_v36 = vadd.f32 %v4189_v41, %v4188_v24  ;;  %v4199_v20 = vld [vmem:[#allocation27_spill] sm:$0xff]  ;;  %v1784_v31 = vld [vmem:[#allocation2 + $0x3e] sm:$0xff] }
 0x291   : > { %v4190_v12 = vmov 0.0   ;;  %v1979_v61 = vadd.f32 %v1974_v59, %v1963_v51  ;;  %v1702_v43 = vadd.f32 %v4192_v44, %v4191_v27  ;;  %v1833_v60 = vadd.f32 %v4194_v30, %v4193_v29  ;;  %v1915_v33 = vld [vmem:[#allocation2 + $0x3f] sm:$0xff] }
 0x292   : > { %2761 = vmatprep.mubr.msk.f32.mxu0 %vm2957_vm1, %v4190_v12  ;;  %v1964_v48 = vadd.f32 %v4196_v22, %v4195_v26  ;;  %v1896_v5 = vadd.f32 %v1891_v62, %v1880_v13  ;;  %v1991_v45 = vmul.f32 %v4176_v14, %v1982_v10  ;;  %v2007_v57 = vmul.f32 %v4155_v34, %v1998_v52  ;;  %v4202_v34 = vld [vmem:[#allocation24_spill] sm:$0xff] }
 0x293   : > { %v1587_v55 = vadd.f32 %v4197_v7, %v1571_v36  ;;  %v1995_v16 = vadd.f32 %v1990_v11, %v1979_v61  ;;  %v1718_v35 = vadd.f32 %v4198_v21, %v1702_v43  ;;  %v1849_v17 = vadd.f32 %v4199_v20, %v1833_v60  ;;  %v4205_v36 = vld [vmem:[#allocation13_spill] sm:$0xff]  ;;  %v4208_v43 = vld [vmem:[#allocation32_spill] sm:$0xff]  ;;  %v2242_v7 = vld [vmem:[%s4042_s15 + $0x8] sm:$0xff] }
 0x294   : > { %v1980_v40 = vadd.f32 %v3846_v63, %v1964_v48  ;;  %v1797_v37 = vadd.f32 %v1792_v19, %v1781_v28  ;;  %v1912_v49 = vadd.f32 %v1907_v58, %v1896_v5  ;;  %v2022_v18 = vmul.f32 %v4177_v23, %v1982_v10  ;;  %v2244_v21 = vld [vmem:[%s4042_s15 + $0x18] sm:$0xff]  ;;  %v2245_v20 = vld [vmem:[%s4042_s15 + $0x20] sm:$0xff] }
 0x295   : > { %v1603_v2 = vadd.f32 %v4200_v32, %v1587_v55  ;;  %v2011_v62 = vadd.f32 %v2006_v8, %v1995_v16  ;;  %v1734_v14 = vadd.f32 %v4201_v46, %v1718_v35  ;;  %v1865_v59 = vadd.f32 %v4202_v34, %v1849_v17  ;;  %v2246_v17 = vld [vmem:[%s4042_s15 + $0x28] sm:$0xff]  ;;  %v2562_v32 = vld [vmem:[%s4039_s12] ss:$0 sm:$0xff] }
 0x296   : > { %v1996_v47 = vadd.f32 %v1991_v45, %v1980_v40  ;;  %v1892_v0 = vmul.f32 %v4170_v56, %v1883_v15  ;;  %v1928_v3 = vadd.f32 %v1923_v38, %v1912_v49  ;;  %v2038_v51 = vmul.f32 %v4178_v25, %v1998_v52  ;;  %v4203_v38 = vld [vmem:[#allocation14_spill] sm:$0xff]  ;;  %v4204_v52 = vld [vmem:[#allocation12_spill] sm:$0xff]  ;;  %v2248_v49 = vld [vmem:[%s4042_s15 + $0x38] sm:$0xff] }
 0x297   : > { %v1619_v63 = vadd.f32 %v3857_v39, %v1603_v2  ;;  %v2027_v19 = vadd.f32 %v2022_v18, %v2011_v62  ;;  %v1750_v23 = vadd.f32 %v3881_v42, %v1734_v14  ;;  %v1881_v58 = vadd.f32 %v1876_v9, %v1865_v59  ;;  %v4206_v9 = vld [vmem:[#allocation31_spill] sm:$0xff]  ;;  %v2568_v62 = vld [vmem:[%s4040_s13] ss:$0 sm:$0xff] }
 0x298   : > { %v2012_v10 = vadd.f32 %v2007_v57, %v1996_v47  ;;  %v2048_v11 = vadd.f32 %v1797_v37, %v1666_v50  ;;  %v1793_v13 = vmul.f32 %v4183_v1, %v1784_v31  ;;  %v1924_v8 = vmul.f32 %v4172_v53, %v1915_v33  ;;  %v4207_v50 = vld [vmem:[#allocation34_spill] sm:$0xff]  ;;  %v2247_v37 = vld [vmem:[%s4042_s15 + $0x30] sm:$0xff] }
 0x299   : > { %v1635_v28 = vadd.f32 %v3868_v4, %v1619_v63  ;;  %v2043_v24 = vadd.f32 %v2038_v51, %v2027_v19  ;;  %v1766_v56 = vadd.f32 %v3888_v6, %v1750_v23  ;;  %v1897_v15 = vadd.f32 %v1892_v0, %v1881_v58  ;;  %v2241_v57 = vld [vmem:[%s4042_s15] sm:$0xff] }
 0x29a   : > { %v2028_v25 = vadd.f32 %v4203_v38, %v2012_v10  ;;  %v2855_v55 = vpack.c.bf16 %v2242_v7, %v2241_v57  ;;  %v4209_v16 = vmov 0.0|0.0   ;;  %v2861_v40 = vpack.c.bf16 %v2246_v17, %v2245_v20  ;;  %v2569_v31 = vld [vmem:[%s4041_s14] ss:$0 sm:$0xff] }
 0x29b   : > { %v1651_v39 = vadd.f32 %v4204_v52, %v1635_v28  ;;  %v2053_v41 = vadd.f32 %v2043_v24, %v1928_v3  ;;  %v1782_v42 = vadd.f32 %v4205_v36, %v1766_v56  ;;  %v1913_v61 = vadd.f32 %v4206_v9, %v1897_v15 }
 0x29c   : > { %v2044_v53 = vadd.f32 %v4208_v43, %v2028_v25  ;;  %2856 = vmatpush3.bf16.msra.mxu1 %v2855_v55  ;;  %v2864_v18 = vpack.c.bf16 %v2248_v49, %v2247_v37 }
 0x29d   : > { %v1667_v27 = vadd.f32 %v4207_v50, %v1651_v39  ;;  %v2058_v4 = vadd.f32 %v2053_v41, %v2048_v11  ;;  %v1798_v44 = vadd.f32 %v1793_v13, %v1782_v42  ;;  %v1929_v1 = vadd.f32 %v1924_v8, %v1913_v61  ;;  %2857 = vmatprep.subr.bf16.mxu1 %v4209_v16 }
 0x29f   : > { %v2070_v29 = vadd.f32 %v4169_v54, %v2058_v4  ;;  %v2049_v6 = vadd.f32 %v1798_v44, %v1667_v27  ;;  %v2054_v30 = vadd.f32 %v2044_v53, %v1929_v1 }
 0x2a1   : > { %2762 = vmatmul.mubr.msk.f32.gmra.mrb[20].mxu0 %vm958_vm2, %v2070_v29  ;;  %v2059_v60 = vadd.f32 %v2054_v30, %v2049_v6 }
 0x2a2   : > { %2764 = vmatprep.mubr.msk.f32.mxu0 %vm2957_vm1, %v4190_v12 }
 0x2a3   : > { %v2071_v26 = vadd.f32 %v4169_v54, %v2059_v60  ;;  %v2243_v54 = vld [vmem:[%s4042_s15 + $0x10] sm:$0xff] }
 0x2a4   : > { %v2858_v35 = vpack.c.bf16 %v2244_v21, %v2243_v54  ;;  %v2361_v21 = vld [vmem:[%s3077_s21] sm:$0xff] }
 0x2a5   : > { %2765 = vmatmul.mubr.msk.f32.gmra.mrb[22].mxu0 %vm958_vm2, %v2071_v26 }
 0x2a6   : > { %2859 = vmatpush3.bf16.msra.mxu1 %v2858_v35 }
 0x2a7   : > { %2860 = vmatprep.subr.bf16.mxu1 %v4209_v16 }
 0x2aa   : > { %2862 = vmatpush3.bf16.msra.mxu1 %v2861_v40  ;;  %v2362_v40 = vld [vmem:[%s3077_s21 + $0x8] sm:$0xff] }
 0x2ab   : > { %2863 = vmatprep.subr.bf16.mxu1 %v4209_v16  ;;  %v2570_v16 = vld [vmem:[%s4043_s16] ss:$0 sm:$0xff] }
 0x2ae   : > { %2865 = vmatpush3.bf16.msra.mxu1 %v2864_v18 }
 0x2ca   : > { %v2724_v22 = vpop.f32.mrb[12].mxu0  ;;  %v2735_v48 = vpop.f32.mrb[12].mxu1 }
 0x2cb   : > { %v1421_v5 = vpop.f32.mrb[13].mxu0  ;;  %v1500_v45 = vpop.f32.mrb[13].mxu1 }
 0x33c   : > { %v2168_v2 = vpop.f32.mrb[14].mxu0 }
 0x33d   : > { %v2169_v46 = vadd.f32 %v2562_v32, %v2168_v2  ;;  %v2754_v14 = vpop.f32.mrb[15].mxu0  ;;  %v2363_v2 = vld [vmem:[%s3077_s21 + $0x10] sm:$0xff] }
 0x33f   : > { %v2199_v34 = vmul.f32 %v2568_v62, %v2169_v46 }
 0x341   : > { %v2211_v59 = vadd.f32 %v2569_v31, %v2199_v34  ;;  %v2364_v34 = vld [vmem:[%s3077_s21 + $0x18] sm:$0xff] }
 0x343   : > { %v2216_v33 = vmul.f32 0.5, %v2211_v59 }
 0x345   : > { %2922 = vtanh.f32 %v2216_v33 }
 0x34f   : > { %v2923_v47 = vpop.eup %2922 }
 0x350   : > { %v2226_v0 = vadd.f32 1.0, %v2923_v47 }
 0x351   : > { %v2173_v3 = vpop.f32.mrb[16].mxu0 }
 0x352   : > { %v2231_v51 = vmul.f32 0.5, %v2226_v0  ;;  %v2174_v63 = vadd.f32 %v2562_v32, %v2173_v3  ;;  %v2757_v19 = vpop.f32.mrb[17].mxu0  ;;  %v2365_v3 = vld [vmem:[%s3077_s21 + $0x20] sm:$0xff] }
 0x354   : > { %v2236_v23 = vmul.f32 %v2231_v51, %v2211_v59  ;;  %v2200_v58 = vmul.f32 %v2568_v62, %v2174_v63 }
 0x356   : > { %v2212_v10 = vadd.f32 %v2569_v31, %v2200_v58  ;;  %2784 = vmatmul.mubr.msk.f32.vlgmr.msra.gmra.mrb[14].mxu1 %vm958_vm2, %v2236_v23 }
 0x357   : > { %2786 = vmatprep.mubr.msk.f32.mxu1 %vm2957_vm1, %v4190_v12 }
 0x358   : > { %v2217_v11 = vmul.f32 0.5, %v2212_v10 }
 0x35a   : > { %2924 = vtanh.f32 %v2217_v11 }
 0x363   : > { %v2178_v28 = vpop.f32.mrb[18].mxu0 }
 0x364   : > { %v2179_v13 = vadd.f32 %v2562_v32, %v2178_v28  ;;  %v2760_v8 = vpop.f32.mrb[19].mxu0  ;;  %v2925_v24 = vpop.eup %2924 }
 0x365   : > { %v2227_v56 = vadd.f32 1.0, %v2925_v24 }
 0x366   : > { %v2201_v15 = vmul.f32 %v2568_v62, %v2179_v13 }
 0x367   : > { %v2232_v38 = vmul.f32 0.5, %v2227_v56 }
 0x368   : > { %v2213_v25 = vadd.f32 %v2569_v31, %v2201_v15 }
 0x369   : > { %v2237_v52 = vmul.f32 %v2232_v38, %v2212_v10 }
 0x36a   : > { %v2218_v39 = vmul.f32 0.5, %v2213_v25 }
 0x36b   : > { %2787 = vmatmul.mubr.msk.f32.gmra.mrb[16].mxu1 %vm958_vm2, %v2237_v52 }
 0x36c   : > { %2926 = vtanh.f32 %v2218_v39  ;;  %2789 = vmatprep.mubr.msk.f32.mxu1 %vm2957_vm1, %v4190_v12 }
 0x374   : > { %v2183_v41 = vpop.f32.mrb[20].mxu0 }
 0x375   : > { %v2184_v36 = vadd.f32 %v2562_v32, %v2183_v41  ;;  %v2763_v42 = vpop.f32.mrb[21].mxu0 }
 0x376   : > { %v2927_v9 = vpop.eup %2926 }
 0x377   : > { %v2228_v61 = vadd.f32 1.0, %v2927_v9  ;;  %v2202_v50 = vmul.f32 %v2568_v62, %v2184_v36 }
 0x378   : > { %v2188_v27 = vpop.f32.mrb[22].mxu0 }
 0x379   : > { %v2233_v4 = vmul.f32 0.5, %v2228_v61  ;;  %v2214_v44 = vadd.f32 %v2569_v31, %v2202_v50  ;;  %v2189_v1 = vadd.f32 %v2562_v32, %v2188_v27  ;;  %v2766_v43 = vpop.f32.mrb[23].mxu0 }
 0x37b   : > { %v2238_v53 = vmul.f32 %v2233_v4, %v2213_v25  ;;  %v2219_v29 = vmul.f32 0.5, %v2214_v44  ;;  %v2203_v6 = vmul.f32 %v2568_v62, %v2189_v1 }
 0x37d   : > { %2928 = vtanh.f32 %v2219_v29  ;;  %v2215_v30 = vadd.f32 %v2569_v31, %v2203_v6  ;;  %2790 = vmatmul.mubr.msk.f32.gmra.mrb[18].mxu1 %vm958_vm2, %v2238_v53 }
 0x37e   : > { %2792 = vmatprep.mubr.msk.f32.mxu1 %vm2957_vm1, %v4190_v12 }
 0x37f   : > { %v2220_v60 = vmul.f32 0.5, %v2215_v30 }
 0x381   : > { %2930 = vtanh.f32 %v2220_v60 }
 0x387   : > { %v2929_v26 = vpop.eup %2928 }
 0x388   : > { %v2229_v22 = vadd.f32 1.0, %v2929_v26 }
 0x38a   : > { %v2234_v48 = vmul.f32 0.5, %v2229_v22 }
 0x38b   : > { %v2931_v5 = vpop.eup %2930 }
 0x38c   : > { %v2239_v45 = vmul.f32 %v2234_v48, %v2214_v44  ;;  %v2230_v57 = vadd.f32 1.0, %v2931_v5 }
 0x38e   : > { %v2235_v7 = vmul.f32 0.5, %v2230_v57  ;;  %2793 = vmatmul.mubr.msk.f32.gmra.mrb[20].mxu1 %vm958_vm2, %v2239_v45 }
 0x38f   : > { %2795 = vmatprep.mubr.msk.f32.mxu1 %vm2957_vm1, %v4190_v12 }
 0x390   : > { %v2240_v55 = vmul.f32 %v2235_v7, %v2215_v30 }
 0x392   : > { %2796 = vmatmul.mubr.msk.f32.gmra.mrb[22].mxu1 %vm958_vm2, %v2240_v55 }
 0x429   : > { %v2337_v54 = vpop.f32.mrb[14].mxu1 }
 0x42a   : > { %v2338_v35 = vadd.f32 %v2570_v16, %v2337_v54  ;;  %v2785_v20 = vpop.f32.mrb[15].mxu1 }
 0x42c   : > { %v2366_v17 = vadd.f32 %v2361_v21, %v2338_v35 }
 0x42e   : > { %2371 = vst.msk [vmem:[%s700_s29] sm:$0xff] %vm708_vm0, %v2366_v17 }
 0x43e   : > { %v2342_v12 = vpop.f32.mrb[16].mxu1 }
 0x43f   : > { %v2343_v37 = vadd.f32 %v2570_v16, %v2342_v12  ;;  %v2788_v49 = vpop.f32.mrb[17].mxu1 }
 0x441   : > { %v2367_v18 = vadd.f32 %v2362_v40, %v2343_v37 }
 0x443   : > { %2372 = vst.msk [vmem:[%s700_s29 + $0x8] sm:$0xff] %vm708_vm0, %v2367_v18 }
 0x450   : > { %v2347_v32 = vpop.f32.mrb[18].mxu1 }
 0x451   : > { %v2348_v62 = vadd.f32 %v2570_v16, %v2347_v32  ;;  %v2791_v46 = vpop.f32.mrb[19].mxu1 }
 0x453   : > { %v2368_v14 = vadd.f32 %v2363_v2, %v2348_v62 }
 0x455   : > { %2373 = vst.msk [vmem:[%s700_s29 + $0x10] sm:$0xff] %vm708_vm0, %v2368_v14 }
 0x461   : > { %v2352_v31 = vpop.f32.mrb[20].mxu1 }
 0x462   : > { %v2353_v59 = vadd.f32 %v2570_v16, %v2352_v31  ;;  %v2794_v33 = vpop.f32.mrb[21].mxu1 }
 0x464   : > { %v2369_v47 = vadd.f32 %v2364_v34, %v2353_v59 }
 0x465   : > { %v2357_v0 = vpop.f32.mrb[22].mxu1 }
 0x466   : > { %2374 = vst.msk [vmem:[%s700_s29 + $0x18] sm:$0xff] %vm708_vm0, %v2369_v47  ;;  %v2358_v51 = vadd.f32 %v2570_v16, %v2357_v0  ;;  %v2797_v63 = vpop.f32.mrb[23].mxu1 }
 0x468   : > { %v2370_v19 = vadd.f32 %v2365_v3, %v2358_v51 }
 0x46a   : > { %2375 = vst.msk [vmem:[%s700_s29 + $0x20] sm:$0xff] %vm708_vm0, %v2370_v19 }
 0x46b PF: > { %s27_s26 = sadd.s32 1, %s2954_s26   ;;  %s4210_s24 = smov %s2950_s25 }
 0x46c   : > { %p24_p5 = scmp.ge.s32.totalorder %s27_s26, 4   ;;  %s4211_s25 = smov %s4213_s27 }
 0x46e   :  { %26 = sbr.rel (!%p24_p5) target bundleno = 3 (0x3), region = 124 }

</bundles_post_ra>
